<compile_context>
chip_gen: v5e
topology: v5e:2x2
jax: 0.10.0
libtpu: 0.0.40
codegen_flags: <defaults>
</compile_context>

<pallas_src>
import functools

import jax
import jax.numpy as jnp
from jax.experimental import pallas as pl
from jax.experimental.pallas import tpu as pltpu  # noqa: F401  (TPU backend)

MROWS = 8      # batch rows padded to the 8-sublane minimum
LANE = 128     # lane-dense padded width for hidden / output features


def _full_spec(shape):
    zeros = (0,) * len(shape)
    return pl.BlockSpec(shape, lambda i, _z=zeros: _z)


# ----------------------------------------------------------------------------
# Kernels
# ----------------------------------------------------------------------------
def _elu(y):
    # ELU(alpha=1); exp on the clamped arg avoids overflow in the untaken branch.
    return jnp.where(y > 0, y, jnp.exp(jnp.minimum(y, 0.0)) - 1.0)


def _conv_pool_kernel(p_ref, w_ref, b_ref, o_ref, *, phases):
    """o = max_p relu(p_ref[p] @ w + b): conv matmul + bias + ReLU + max-pool."""
    w = w_ref[...]
    b = b_ref[...]

    def branch(p):
        y = jnp.dot(p_ref[p], w, preferred_element_type=jnp.float32) + b
        return jnp.maximum(y, 0.0)

    acc = branch(0)
    for p in range(1, phases):          # static, tiny trip count (1..9)
        acc = jnp.maximum(acc, branch(p))
    o_ref[...] = acc


def _lstm_gates(x, wx, h, wh, b, hp):
    # Fused gates: two matmuls, 4*hp lane-dense output, 128-aligned gate slices.
    gates = (jnp.dot(x, wx, preferred_element_type=jnp.float32)
             + jnp.dot(h, wh, preferred_element_type=jnp.float32) + b)
    i_g = jax.nn.sigmoid(gates[:, 0 * hp:1 * hp])
    f_g = jax.nn.sigmoid(gates[:, 1 * hp:2 * hp])
    g_g = jnp.tanh(gates[:, 2 * hp:3 * hp])
    o_g = jax.nn.sigmoid(gates[:, 3 * hp:4 * hp])
    return i_g, f_g, g_g, o_g


def _actor_head_kernel(x_ref, h0_ref, c0_ref, wx_ref, wh_ref, bg_ref,
                       wmlp_ref, bmlp_ref, o_ref, *, h_pad, n_layers):
    i_g, f_g, g_g, o_g = _lstm_gates(x_ref[...], wx_ref[...], h0_ref[...],
                                     wh_ref[...], bg_ref[...], h_pad)
    c = f_g * c0_ref[...] + i_g * g_g
    a = o_g * jnp.tanh(c)                                   # (8, 128) f32
    for l in range(n_layers - 1):
        y = (jnp.dot(a.astype(jnp.bfloat16), wmlp_ref[l],
                     preferred_element_type=jnp.float32) + bmlp_ref[l])
        a = _elu(y)
    o_ref[...] = (jnp.dot(a.astype(jnp.bfloat16), wmlp_ref[n_layers - 1],
                          preferred_element_type=jnp.float32)
                  + bmlp_ref[n_layers - 1])


def _critic_head_kernel(x_ref, xf_ref, h0f_ref, c0f_ref, wxf_ref, whf_ref,
                        bgf_ref, w1_ref, b1_ref, wmlp_ref, bmlp_ref,
                        v_ref, feat_ref, *, h_pad, n_rest):
    # fake-feature LSTM (memory_depth) on the first 4 combined features
    i_g, f_g, g_g, o_g = _lstm_gates(xf_ref[...], wxf_ref[...], h0f_ref[...],
                                     whf_ref[...], bgf_ref[...], h_pad)
    c = f_g * c0f_ref[...] + i_g * g_g
    feat_ref[...] = o_g * jnp.tanh(c)
    # critic MLP
    a = _elu(jnp.dot(x_ref[...], w1_ref[...],
                     preferred_element_type=jnp.float32) + b1_ref[...])
    for l in range(n_rest - 1):
        a = _elu(jnp.dot(a.astype(jnp.bfloat16), wmlp_ref[l],
                         preferred_element_type=jnp.float32) + bmlp_ref[l])
    v_ref[...] = (jnp.dot(a.astype(jnp.bfloat16), wmlp_ref[n_rest - 1],
                          preferred_element_type=jnp.float32)
                  + bmlp_ref[n_rest - 1])


# ----------------------------------------------------------------------------
# Conv stage wrapper (im2col / pool-phase extraction in JAX, fused kernel on TPU)
# ----------------------------------------------------------------------------
def conv_pool_stage(x_nhwc, w_hwio, b, *, stride, pad, pool):
    """Conv2d + ReLU followed by a uniform max-pool with window==stride==pool.

    pool=(1,1) means no pooling.  Covers MaxPool2d(2,2) floor mode and the
    AdaptiveMaxPool2d cases used here (output bins divide the input evenly).
    """
    N, H, W, Cin = x_nhwc.shape
    kh, kw, _, Cout = w_hwio.shape
    Ho = (H + 2 * pad - kh) // stride + 1
    Wo = (W + 2 * pad - kw) // stride + 1
    bh, bw = pool
    PH, PW = Ho // bh, Wo // bw
    K = kh * kw * Cin

    xp = jnp.pad(x_nhwc, ((0, 0), (pad, pad), (pad, pad), (0, 0)))
    # full im2col, column order (kh, kw, cin) == w_hwio.reshape(K, Cout) rows
    cols = [xp[:, ki:ki + stride * Ho:stride, kj:kj + stride * Wo:stride, :]
            for ki in range(kh) for kj in range(kw)]
    patches = jnp.concatenate(cols, axis=-1)                      # (N, Ho, Wo, K)
    # one patch matrix per pool phase; rows ordered (n, ph, pw); floor-mode rows
    # that never reach the pooled output are dropped (identical result).
    phase_mats = [
        patches[:, di::bh, dj::bw, :][:, :PH, :PW, :].reshape(N * PH * PW, K)
        for di in range(bh) for dj in range(bw)
    ]
    stacked = jnp.stack(phase_mats, axis=0).astype(jnp.bfloat16)  # (P, M, K)
    P, M, _ = stacked.shape
    w_mat = w_hwio.reshape(K, Cout).astype(jnp.bfloat16)
    b2 = b.reshape(1, Cout).astype(jnp.float32)

    out = pl.pallas_call(
        functools.partial(_conv_pool_kernel, phases=P),
        out_shape=jax.ShapeDtypeStruct((M, Cout), jnp.float32),
        grid=(1,),
        in_specs=[_full_spec((P, M, K)), _full_spec((K, Cout)),
                  _full_spec((1, Cout))],
        out_specs=_full_spec((M, Cout)),
    )(stacked, w_mat, b2)
    return out.reshape(N, PH, PW, Cout)


def flatten_chw(x_nhwc):
    # Match torch.nn.Flatten(start_dim=1) on NCHW: feature order (C, H, W).
    N = x_nhwc.shape[0]
    return jnp.transpose(x_nhwc, (0, 3, 1, 2)).reshape(N, -1)


def conv_image_net(x_nchw, p):
    x = jnp.transpose(x_nchw, (0, 2, 3, 1))                                  # NHWC
    x = conv_pool_stage(x, p["c1_w"], p["c1_b"], stride=2, pad=2, pool=(2, 2))
    x = conv_pool_stage(x, p["c2_w"], p["c2_b"], stride=2, pad=2, pool=(2, 2))
    H3, W3 = x.shape[1], x.shape[2]         # conv3 (k3,s1,p1) preserves spatial
    x = conv_pool_stage(x, p["c3_w"], p["c3_b"], stride=1, pad=1,
                        pool=(H3 // 2, W3 // 1))          # AdaptiveMaxPool2d((2,1))
    return flatten_chw(x)                                                    # (N,128)


def conv_depth_net(x_nchw, p):
    x = jnp.transpose(x_nchw, (0, 2, 3, 1))
    x = conv_pool_stage(x, p["c1_w"], p["c1_b"], stride=2, pad=2, pool=(1, 1))
    x = conv_pool_stage(x, p["c2_w"], p["c2_b"], stride=2, pad=2, pool=(1, 1))
    H3, W3 = x.shape[1], x.shape[2]
    x = conv_pool_stage(x, p["c3_w"], p["c3_b"], stride=1, pad=1,
                        pool=(H3 // 2, W3 // 2))          # AdaptiveMaxPool2d((2,2))
    return flatten_chw(x)                                                    # (N,256)


# ----------------------------------------------------------------------------
# Fused head wrappers (LSTM + MLP in one pallas_call each)
# ----------------------------------------------------------------------------
def _pad_rows(x, rows):
    return jnp.zeros((rows, x.shape[1]), x.dtype).at[:x.shape[0]].set(x)


def actor_head(x, lstm, w_mlp, b_mlp, num_actions):
    B = x.shape[0]
    xp = _pad_rows(x, MROWS).astype(jnp.bfloat16)
    h0 = jnp.zeros((MROWS, LANE), jnp.bfloat16)     # zero initial hidden state
    c0 = jnp.zeros((MROWS, LANE), jnp.float32)
    n_layers = w_mlp.shape[0]
    args = (xp, h0, c0, lstm["wx"].astype(jnp.bfloat16),
            lstm["wh"].astype(jnp.bfloat16), lstm["b"],
            w_mlp.astype(jnp.bfloat16), b_mlp)
    out = pl.pallas_call(
        functools.partial(_actor_head_kernel, h_pad=LANE, n_layers=n_layers),
        out_shape=jax.ShapeDtypeStruct((MROWS, LANE), jnp.float32),
        grid=(1,),
        in_specs=[_full_spec(a.shape) for a in args],
        out_specs=_full_spec((MROWS, LANE)),
    )(*args)
    return out[:B, :num_actions]


def critic_head(x, lstm_f, w1, b1, w_rest, b_rest):
    B = x.shape[0]
    xp = _pad_rows(x, MROWS).astype(jnp.bfloat16)
    xf = jnp.pad(_pad_rows(x[:, :4], MROWS), ((0, 0), (0, 4))).astype(jnp.bfloat16)
    h0 = jnp.zeros((MROWS, LANE), jnp.bfloat16)
    c0 = jnp.zeros((MROWS, LANE), jnp.float32)
    n_rest = w_rest.shape[0]
    args = (xp, xf, h0, c0, lstm_f["wx"].astype(jnp.bfloat16),
            lstm_f["wh"].astype(jnp.bfloat16), lstm_f["b"],
            w1.astype(jnp.bfloat16), b1,
            w_rest.astype(jnp.bfloat16), b_rest)
    value, feat = pl.pallas_call(
        functools.partial(_critic_head_kernel, h_pad=LANE, n_rest=n_rest),
        out_shape=(jax.ShapeDtypeStruct((MROWS, LANE), jnp.float32),
                   jax.ShapeDtypeStruct((MROWS, LANE), jnp.float32)),
        grid=(1,),
        in_specs=[_full_spec(a.shape) for a in args],
        out_specs=(_full_spec((MROWS, LANE)), _full_spec((MROWS, LANE))),
    )(*args)
    return value[:B, :1], feat[:B, :4]


# ----------------------------------------------------------------------------
# Forward passes (non-batch mode: masks=None, zero initial hidden state)
# ----------------------------------------------------------------------------
def act_inference(observations, params, cfg):
    B = observations.shape[0]
    nif = cfg["num_image_features"]
    other_obs = observations[:, :-nif]
    image_obs = observations[:, -nif:].reshape(B, *cfg["image_input_dims"])  # NCHW
    image_features = conv_image_net(image_obs, params["conv_image"])
    combined = jnp.concatenate([image_features, other_obs], axis=-1)
    return actor_head(combined, params["lstm_image"],
                      params["actor_w"], params["actor_b"], cfg["num_actions"])


def evaluate(critic_observations, params, cfg):
    B = critic_observations.shape[0]
    ndf = cfg["num_depth_features"]
    other_obs = critic_observations[:, :-ndf]
    depth_obs = critic_observations[:, -ndf:].reshape(B, *cfg["depth_input_dims"])
    depth_features = conv_depth_net(depth_obs, params["conv_depth"])
    combined = jnp.concatenate([depth_features, other_obs], axis=-1)
    value, fake_feat = critic_head(combined, params["lstm_depth"],
                                   params["critic_w1"], params["critic_b1"],
                                   params["critic_w"], params["critic_b"])
    return value, fake_feat


# ----------------------------------------------------------------------------
# Deterministic synthetic parameter init (already in padded / fused layouts)
# ----------------------------------------------------------------------------
def init_conv(key, in_ch, scale=0.1):
    ks = jax.random.split(key, 6)
    return {
        "c1_w": scale * jax.random.normal(ks[0], (5, 5, in_ch, 16), jnp.float32),
        "c1_b": scale * jax.random.normal(ks[1], (16,), jnp.float32),
        "c2_w": scale * jax.random.normal(ks[2], (5, 5, 16, 32), jnp.float32),
        "c2_b": scale * jax.random.normal(ks[3], (32,), jnp.float32),
        "c3_w": scale * jax.random.normal(ks[4], (3, 3, 32, 64), jnp.float32),
        "c3_b": scale * jax.random.normal(ks[5], (64,), jnp.float32),
    }


def build_lstm_padded(key, d_in, h, *, d_pad=None, h_pad=LANE, scale=0.1):
    """Single-layer LSTM params, gates stacked (i,f,g,o), each gate zero-padded
    from h to h_pad lanes (128-aligned gate slices, lane-dense hidden state;
    padded hidden lanes provably stay exactly 0)."""
    d_pad = d_in if d_pad is None else d_pad
    ks = jax.random.split(key, 12)
    wx = jnp.zeros((d_pad, 4 * h_pad), jnp.float32)
    wh = jnp.zeros((h_pad, 4 * h_pad), jnp.float32)
    b = jnp.zeros((1, 4 * h_pad), jnp.float32)
    for g in range(4):
        lo = g * h_pad
        wx = wx.at[:d_in, lo:lo + h].set(scale * jax.random.normal(ks[3 * g], (d_in, h)))
        wh = wh.at[:h, lo:lo + h].set(scale * jax.random.normal(ks[3 * g + 1], (h, h)))
        b = b.at[:, lo:lo + h].set(scale * jax.random.normal(ks[3 * g + 2], (1, h)))
    return {"wx": wx, "wh": wh, "b": b}


def build_mlp_stack(key, dims_real, pad=LANE, scale=0.1):
    """Stack of Linear layers, in/out widths zero-padded to `pad` (exact)."""
    n = len(dims_real) - 1
    ks = jax.random.split(key, 2 * n)
    W = jnp.zeros((n, pad, pad), jnp.float32)
    Bz = jnp.zeros((n, pad), jnp.float32)
    for l in range(n):
        din, dout = dims_real[l], dims_real[l + 1]
        W = W.at[l, :din, :dout].set(scale * jax.random.normal(ks[2 * l], (din, dout)))
        Bz = Bz.at[l, :dout].set(scale * jax.random.normal(ks[2 * l + 1], (dout,)))
    return W, Bz


def build_linear_padded(key, din, dout, pad=LANE, scale=0.1):
    kw_, kb_ = jax.random.split(key)
    w = jnp.zeros((din, pad), jnp.float32).at[:, :dout].set(
        scale * jax.random.normal(kw_, (din, dout)))
    b = jnp.zeros((1, pad), jnp.float32).at[:, :dout].set(
        scale * jax.random.normal(kb_, (dout,)))
    return w, b


# ----------------------------------------------------------------------------
# Main
# ----------------------------------------------------------------------------
if __name__ == "__main__":
    B = 2
    image_input_dims = (1, 40, 64)   # -> cnn_image_output_size = 128
    depth_input_dims = (1, 21, 21)   # -> cnn_depth_output_size = 256
    num_image_features = 1 * 40 * 64
    num_depth_features = 1 * 21 * 21
    num_other_actor = 12
    num_other_critic = 12
    num_actor_obs = num_image_features + num_other_actor     # 2572
    num_critic_obs = num_depth_features + num_other_critic   # 453
    num_actions = 8
    rnn_hidden_size = 64
    actor_hidden_dims = [64, 64, 64]
    critic_hidden_dims = [64, 64, 64]

    cnn_image_output_size = 128
    cnn_depth_output_size = 256
    mlp_input_dim_actor_image = num_actor_obs - num_image_features + cnn_image_output_size   # 140
    mlp_input_dim_critic_depth = num_critic_obs - num_depth_features + cnn_depth_output_size  # 268

    cfg = dict(
        image_input_dims=image_input_dims,
        depth_input_dims=depth_input_dims,
        num_image_features=num_image_features,
        num_depth_features=num_depth_features,
        num_actions=num_actions,
    )

    root = jax.random.PRNGKey(0)
    k_ci, k_cd, k_li, k_ld, k_a, k_c1, k_c, k_x1, k_x2 = jax.random.split(root, 9)
    actor_w, actor_b = build_mlp_stack(
        k_a, [rnn_hidden_size] + actor_hidden_dims + [num_actions])
    critic_w1, critic_b1 = build_linear_padded(
        k_c1, mlp_input_dim_critic_depth, critic_hidden_dims[0])
    critic_w, critic_b = build_mlp_stack(k_c, critic_hidden_dims + [1])
    params = {
        "conv_image": init_conv(k_ci, image_input_dims[0]),
        "conv_depth": init_conv(k_cd, depth_input_dims[0]),
        "lstm_image": build_lstm_padded(k_li, mlp_input_dim_actor_image, rnn_hidden_size),
        "lstm_depth": build_lstm_padded(k_ld, 4, 4, d_pad=8),
        "actor_w": actor_w, "actor_b": actor_b,
        "critic_w1": critic_w1, "critic_b1": critic_b1,
        "critic_w": critic_w, "critic_b": critic_b,
    }
    # TODO(synk): persistent RNN hidden-state buffers / reset(dones), batch-mode
    # (masks + unpad_trajectories) and Normal sampling in act() are runtime state
    # / stochastic policy API, not forward compute; the deterministic
    # act_inference / evaluate paths are implemented with zero hidden state.

    actor_obs = jax.random.normal(k_x1, (B, num_actor_obs), dtype=jnp.float32)
    critic_obs = jax.random.normal(k_x2, (B, num_critic_obs), dtype=jnp.float32)

    act_fn = jax.jit(lambda obs, p: act_inference(obs, p, cfg))
    eval_fn = jax.jit(lambda obs, p: evaluate(obs, p, cfg))

    actions_mean = act_fn(actor_obs, params)
    value, fake_feat = eval_fn(critic_obs, params)
    jax.block_until_ready((actions_mean, value, fake_feat))

    assert actions_mean.shape == (B, num_actions)
    assert value.shape == (B, 1)
    assert fake_feat.shape == (B, 4)
    assert bool(jnp.all(jnp.isfinite(actions_mean)))
    assert bool(jnp.all(jnp.isfinite(value)))
    assert bool(jnp.all(jnp.isfinite(fake_feat)))
    print("KERNEL_OK")
</pallas_src>

<mosaic_0001>
module attributes {stable_mosaic.version = 11 : i64} {
  func.func @_conv_pool_kernel(%arg0: i32, %arg1: memref<4x320x25xbf16, #tpu.memory_space<vmem>>, %arg2: memref<25x16xbf16, #tpu.memory_space<vmem>>, %arg3: memref<1x16xf32, #tpu.memory_space<vmem>>, %arg4: memref<320x16xf32, #tpu.memory_space<vmem>>) attributes {dimension_semantics = [#tpu.dimension_semantics<arbitrary>], iteration_bounds = array<i64: 1>, scalar_prefetch = 0 : i64, scratch_operands = 0 : i64, tpu.core_type = #tpu.core_type<tc>, window_params = [{pipeline_mode = #tpu.pipeline_mode<synchronous>, transform_indices = @transform_0, window_bounds = array<i64: 4, 320, 25>}, {pipeline_mode = #tpu.pipeline_mode<synchronous>, transform_indices = @transform_1, window_bounds = array<i64: 25, 16>}, {pipeline_mode = #tpu.pipeline_mode<synchronous>, transform_indices = @transform_2, window_bounds = array<i64: 1, 16>}, {pipeline_mode = #tpu.pipeline_mode<synchronous>, transform_indices = @transform_3, window_bounds = array<i64: 320, 16>}]} {
    %c0 = arith.constant 0 : index
    %c0_0 = arith.constant 0 : index
    %0 = vector.load %arg2[%c0, %c0_0] : memref<25x16xbf16, #tpu.memory_space<vmem>>, vector<25x16xbf16>
    %c0_1 = arith.constant 0 : index
    %c0_2 = arith.constant 0 : index
    %1 = vector.load %arg3[%c0_1, %c0_2] : memref<1x16xf32, #tpu.memory_space<vmem>>, vector<1x16xf32>
    %c0_3 = arith.constant 0 : index
    %c0_4 = arith.constant 0 : index
    %c0_5 = arith.constant 0 : index
    %2 = vector.load %arg1[%c0_3, %c0_4, %c0_5] : memref<4x320x25xbf16, #tpu.memory_space<vmem>>, vector<1x320x25xbf16>
    %3 = vector.shape_cast %2 : vector<1x320x25xbf16> to vector<320x25xbf16>
    %cst = arith.constant dense<0.000000e+00> : vector<320x16xf32>
    %4 = tpu.matmul %3, %0, %cst {dimension_numbers = #tpu.dot_dimension_numbers<[1], [0], [0], [1], [0, 0, 1, 1], [], []>} : vector<320x25xbf16>, vector<25x16xbf16>, vector<320x16xf32> -> vector<320x16xf32>
    %5 = vector.broadcast %1 : vector<1x16xf32> to vector<320x16xf32>
    %6 = arith.addf %4, %5 : vector<320x16xf32>
    %cst_6 = arith.constant 0.000000e+00 : f32
    %7 = vector.broadcast %cst_6 : f32 to vector<320x16xf32>
    %8 = arith.maximumf %6, %7 : vector<320x16xf32>
    %c1 = arith.constant 1 : index
    %c0_7 = arith.constant 0 : index
    %c0_8 = arith.constant 0 : index
    %9 = vector.load %arg1[%c1, %c0_7, %c0_8] : memref<4x320x25xbf16, #tpu.memory_space<vmem>>, vector<1x320x25xbf16>
    %10 = vector.shape_cast %9 : vector<1x320x25xbf16> to vector<320x25xbf16>
    %cst_9 = arith.constant dense<0.000000e+00> : vector<320x16xf32>
    %11 = tpu.matmul %10, %0, %cst_9 {dimension_numbers = #tpu.dot_dimension_numbers<[1], [0], [0], [1], [0, 0, 1, 1], [], []>} : vector<320x25xbf16>, vector<25x16xbf16>, vector<320x16xf32> -> vector<320x16xf32>
    %12 = vector.broadcast %1 : vector<1x16xf32> to vector<320x16xf32>
    %13 = arith.addf %11, %12 : vector<320x16xf32>
    %cst_10 = arith.constant 0.000000e+00 : f32
    %14 = vector.broadcast %cst_10 : f32 to vector<320x16xf32>
    %15 = arith.maximumf %13, %14 : vector<320x16xf32>
    %16 = arith.maximumf %8, %15 : vector<320x16xf32>
    %c2 = arith.constant 2 : index
    %c0_11 = arith.constant 0 : index
    %c0_12 = arith.constant 0 : index
    %17 = vector.load %arg1[%c2, %c0_11, %c0_12] : memref<4x320x25xbf16, #tpu.memory_space<vmem>>, vector<1x320x25xbf16>
    %18 = vector.shape_cast %17 : vector<1x320x25xbf16> to vector<320x25xbf16>
    %cst_13 = arith.constant dense<0.000000e+00> : vector<320x16xf32>
    %19 = tpu.matmul %18, %0, %cst_13 {dimension_numbers = #tpu.dot_dimension_numbers<[1], [0], [0], [1], [0, 0, 1, 1], [], []>} : vector<320x25xbf16>, vector<25x16xbf16>, vector<320x16xf32> -> vector<320x16xf32>
    %20 = vector.broadcast %1 : vector<1x16xf32> to vector<320x16xf32>
    %21 = arith.addf %19, %20 : vector<320x16xf32>
    %cst_14 = arith.constant 0.000000e+00 : f32
    %22 = vector.broadcast %cst_14 : f32 to vector<320x16xf32>
    %23 = arith.maximumf %21, %22 : vector<320x16xf32>
    %24 = arith.maximumf %16, %23 : vector<320x16xf32>
    %c3 = arith.constant 3 : index
    %c0_15 = arith.constant 0 : index
    %c0_16 = arith.constant 0 : index
    %25 = vector.load %arg1[%c3, %c0_15, %c0_16] : memref<4x320x25xbf16, #tpu.memory_space<vmem>>, vector<1x320x25xbf16>
    %26 = vector.shape_cast %25 : vector<1x320x25xbf16> to vector<320x25xbf16>
    %cst_17 = arith.constant dense<0.000000e+00> : vector<320x16xf32>
    %27 = tpu.matmul %26, %0, %cst_17 {dimension_numbers = #tpu.dot_dimension_numbers<[1], [0], [0], [1], [0, 0, 1, 1], [], []>} : vector<320x25xbf16>, vector<25x16xbf16>, vector<320x16xf32> -> vector<320x16xf32>
    %28 = vector.broadcast %1 : vector<1x16xf32> to vector<320x16xf32>
    %29 = arith.addf %27, %28 : vector<320x16xf32>
    %cst_18 = arith.constant 0.000000e+00 : f32
    %30 = vector.broadcast %cst_18 : f32 to vector<320x16xf32>
    %31 = arith.maximumf %29, %30 : vector<320x16xf32>
    %32 = arith.maximumf %24, %31 : vector<320x16xf32>
    %c0_19 = arith.constant 0 : index
    %c0_20 = arith.constant 0 : index
    %33 = vector.load %arg4[%c0_19, %c0_20] : memref<320x16xf32, #tpu.memory_space<vmem>>, vector<320x16xf32>
    tpu.vector_store %arg4[%c0_19, %c0_20], %32 {strides = array<i32>} : memref<320x16xf32, #tpu.memory_space<vmem>>, vector<320x16xf32>,
    return
  }
  func.func @transform_0(%arg0: i32) -> (i32, i32, i32) {
    %c0_i32 = arith.constant 0 : i32
    %c0_i32_0 = arith.constant 0 : i32
    %c0_i32_1 = arith.constant 0 : i32
    %c0_i32_2 = arith.constant 0 : i32
    return %c0_i32, %c0_i32_0, %c0_i32_1 : i32, i32, i32
  }
  func.func @transform_1(%arg0: i32) -> (i32, i32) {
    %c0_i32 = arith.constant 0 : i32
    %c0_i32_0 = arith.constant 0 : i32
    %c0_i32_1 = arith.constant 0 : i32
    return %c0_i32, %c0_i32_0 : i32, i32
  }
  func.func @transform_2(%arg0: i32) -> (i32, i32) {
    %c0_i32 = arith.constant 0 : i32
    %c0_i32_0 = arith.constant 0 : i32
    %c0_i32_1 = arith.constant 0 : i32
    return %c0_i32, %c0_i32_0 : i32, i32
  }
  func.func @transform_3(%arg0: i32) -> (i32, i32) {
    %c0_i32 = arith.constant 0 : i32
    %c0_i32_0 = arith.constant 0 : i32
    %c0_i32_1 = arith.constant 0 : i32
    return %c0_i32, %c0_i32_0 : i32, i32
  }
}

module attributes {stable_mosaic.version = 11 : i64} {
  func.func @_conv_pool_kernel(%arg0: i32, %arg1: memref<4x16x400xbf16, #tpu.memory_space<vmem>>, %arg2: memref<400x32xbf16, #tpu.memory_space<vmem>>, %arg3: memref<1x32xf32, #tpu.memory_space<vmem>>, %arg4: memref<16x32xf32, #tpu.memory_space<vmem>>) attributes {dimension_semantics = [#tpu.dimension_semantics<arbitrary>], iteration_bounds = array<i64: 1>, scalar_prefetch = 0 : i64, scratch_operands = 0 : i64, tpu.core_type = #tpu.core_type<tc>, window_params = [{pipeline_mode = #tpu.pipeline_mode<synchronous>, transform_indices = @transform_0, window_bounds = array<i64: 4, 16, 400>}, {pipeline_mode = #tpu.pipeline_mode<synchronous>, transform_indices = @transform_1, window_bounds = array<i64: 400, 32>}, {pipeline_mode = #tpu.pipeline_mode<synchronous>, transform_indices = @transform_2, window_bounds = array<i64: 1, 32>}, {pipeline_mode = #tpu.pipeline_mode<synchronous>, transform_indices = @transform_3, window_bounds = array<i64: 16, 32>}]} {
    %c0 = arith.constant 0 : index
    %c0_0 = arith.constant 0 : index
    %0 = vector.load %arg2[%c0, %c0_0] : memref<400x32xbf16, #tpu.memory_space<vmem>>, vector<400x32xbf16>
    %c0_1 = arith.constant 0 : index
    %c0_2 = arith.constant 0 : index
    %1 = vector.load %arg3[%c0_1, %c0_2] : memref<1x32xf32, #tpu.memory_space<vmem>>, vector<1x32xf32>
    %c0_3 = arith.constant 0 : index
    %c0_4 = arith.constant 0 : index
    %c0_5 = arith.constant 0 : index
    %2 = vector.load %arg1[%c0_3, %c0_4, %c0_5] : memref<4x16x400xbf16, #tpu.memory_space<vmem>>, vector<1x16x400xbf16>
    %3 = vector.shape_cast %2 : vector<1x16x400xbf16> to vector<16x400xbf16>
    %cst = arith.constant dense<0.000000e+00> : vector<16x32xf32>
    %4 = tpu.matmul %3, %0, %cst {dimension_numbers = #tpu.dot_dimension_numbers<[1], [0], [0], [1], [0, 0, 1, 1], [], []>} : vector<16x400xbf16>, vector<400x32xbf16>, vector<16x32xf32> -> vector<16x32xf32>
    %5 = vector.broadcast %1 : vector<1x32xf32> to vector<16x32xf32>
    %6 = arith.addf %4, %5 : vector<16x32xf32>
    %cst_6 = arith.constant 0.000000e+00 : f32
    %7 = vector.broadcast %cst_6 : f32 to vector<16x32xf32>
    %8 = arith.maximumf %6, %7 : vector<16x32xf32>
    %c1 = arith.constant 1 : index
    %c0_7 = arith.constant 0 : index
    %c0_8 = arith.constant 0 : index
    %9 = vector.load %arg1[%c1, %c0_7, %c0_8] : memref<4x16x400xbf16, #tpu.memory_space<vmem>>, vector<1x16x400xbf16>
    %10 = vector.shape_cast %9 : vector<1x16x400xbf16> to vector<16x400xbf16>
    %cst_9 = arith.constant dense<0.000000e+00> : vector<16x32xf32>
    %11 = tpu.matmul %10, %0, %cst_9 {dimension_numbers = #tpu.dot_dimension_numbers<[1], [0], [0], [1], [0, 0, 1, 1], [], []>} : vector<16x400xbf16>, vector<400x32xbf16>, vector<16x32xf32> -> vector<16x32xf32>
    %12 = vector.broadcast %1 : vector<1x32xf32> to vector<16x32xf32>
    %13 = arith.addf %11, %12 : vector<16x32xf32>
    %cst_10 = arith.constant 0.000000e+00 : f32
    %14 = vector.broadcast %cst_10 : f32 to vector<16x32xf32>
    %15 = arith.maximumf %13, %14 : vector<16x32xf32>
    %16 = arith.maximumf %8, %15 : vector<16x32xf32>
    %c2 = arith.constant 2 : index
    %c0_11 = arith.constant 0 : index
    %c0_12 = arith.constant 0 : index
    %17 = vector.load %arg1[%c2, %c0_11, %c0_12] : memref<4x16x400xbf16, #tpu.memory_space<vmem>>, vector<1x16x400xbf16>
    %18 = vector.shape_cast %17 : vector<1x16x400xbf16> to vector<16x400xbf16>
    %cst_13 = arith.constant dense<0.000000e+00> : vector<16x32xf32>
    %19 = tpu.matmul %18, %0, %cst_13 {dimension_numbers = #tpu.dot_dimension_numbers<[1], [0], [0], [1], [0, 0, 1, 1], [], []>} : vector<16x400xbf16>, vector<400x32xbf16>, vector<16x32xf32> -> vector<16x32xf32>
    %20 = vector.broadcast %1 : vector<1x32xf32> to vector<16x32xf32>
    %21 = arith.addf %19, %20 : vector<16x32xf32>
    %cst_14 = arith.constant 0.000000e+00 : f32
    %22 = vector.broadcast %cst_14 : f32 to vector<16x32xf32>
    %23 = arith.maximumf %21, %22 : vector<16x32xf32>
    %24 = arith.maximumf %16, %23 : vector<16x32xf32>
    %c3 = arith.constant 3 : index
    %c0_15 = arith.constant 0 : index
    %c0_16 = arith.constant 0 : index
    %25 = vector.load %arg1[%c3, %c0_15, %c0_16] : memref<4x16x400xbf16, #tpu.memory_space<vmem>>, vector<1x16x400xbf16>
    %26 = vector.shape_cast %25 : vector<1x16x400xbf16> to vector<16x400xbf16>
    %cst_17 = arith.constant dense<0.000000e+00> : vector<16x32xf32>
    %27 = tpu.matmul %26, %0, %cst_17 {dimension_numbers = #tpu.dot_dimension_numbers<[1], [0], [0], [1], [0, 0, 1, 1], [], []>} : vector<16x400xbf16>, vector<400x32xbf16>, vector<16x32xf32> -> vector<16x32xf32>
    %28 = vector.broadcast %1 : vector<1x32xf32> to vector<16x32xf32>
    %29 = arith.addf %27, %28 : vector<16x32xf32>
    %cst_18 = arith.constant 0.000000e+00 : f32
    %30 = vector.broadcast %cst_18 : f32 to vector<16x32xf32>
    %31 = arith.maximumf %29, %30 : vector<16x32xf32>
    %32 = arith.maximumf %24, %31 : vector<16x32xf32>
    %c0_19 = arith.constant 0 : index
    %c0_20 = arith.constant 0 : index
    %33 = vector.load %arg4[%c0_19, %c0_20] : memref<16x32xf32, #tpu.memory_space<vmem>>, vector<16x32xf32>
    tpu.vector_store %arg4[%c0_19, %c0_20], %32 {strides = array<i32>} : memref<16x32xf32, #tpu.memory_space<vmem>>, vector<16x32xf32>,
    return
  }
  func.func @transform_0(%arg0: i32) -> (i32, i32, i32) {
    %c0_i32 = arith.constant 0 : i32
    %c0_i32_0 = arith.constant 0 : i32
    %c0_i32_1 = arith.constant 0 : i32
    %c0_i32_2 = arith.constant 0 : i32
    return %c0_i32, %c0_i32_0, %c0_i32_1 : i32, i32, i32
  }
  func.func @transform_1(%arg0: i32) -> (i32, i32) {
    %c0_i32 = arith.constant 0 : i32
    %c0_i32_0 = arith.constant 0 : i32
    %c0_i32_1 = arith.constant 0 : i32
    return %c0_i32, %c0_i32_0 : i32, i32
  }
  func.func @transform_2(%arg0: i32) -> (i32, i32) {
    %c0_i32 = arith.constant 0 : i32
    %c0_i32_0 = arith.constant 0 : i32
    %c0_i32_1 = arith.constant 0 : i32
    return %c0_i32, %c0_i32_0 : i32, i32
  }
  func.func @transform_3(%arg0: i32) -> (i32, i32) {
    %c0_i32 = arith.constant 0 : i32
    %c0_i32_0 = arith.constant 0 : i32
    %c0_i32_1 = arith.constant 0 : i32
    return %c0_i32, %c0_i32_0 : i32, i32
  }
}

module attributes {stable_mosaic.version = 11 : i64} {
  func.func @_conv_pool_kernel(%arg0: i32, %arg1: memref<4x4x288xbf16, #tpu.memory_space<vmem>>, %arg2: memref<288x64xbf16, #tpu.memory_space<vmem>>, %arg3: memref<1x64xf32, #tpu.memory_space<vmem>>, %arg4: memref<4x64xf32, #tpu.memory_space<vmem>>) attributes {dimension_semantics = [#tpu.dimension_semantics<arbitrary>], iteration_bounds = array<i64: 1>, scalar_prefetch = 0 : i64, scratch_operands = 0 : i64, tpu.core_type = #tpu.core_type<tc>, window_params = [{pipeline_mode = #tpu.pipeline_mode<synchronous>, transform_indices = @transform_0, window_bounds = array<i64: 4, 4, 288>}, {pipeline_mode = #tpu.pipeline_mode<synchronous>, transform_indices = @transform_1, window_bounds = array<i64: 288, 64>}, {pipeline_mode = #tpu.pipeline_mode<synchronous>, transform_indices = @transform_2, window_bounds = array<i64: 1, 64>}, {pipeline_mode = #tpu.pipeline_mode<synchronous>, transform_indices = @transform_3, window_bounds = array<i64: 4, 64>}]} {
    %c0 = arith.constant 0 : index
    %c0_0 = arith.constant 0 : index
    %0 = vector.load %arg2[%c0, %c0_0] : memref<288x64xbf16, #tpu.memory_space<vmem>>, vector<288x64xbf16>
    %c0_1 = arith.constant 0 : index
    %c0_2 = arith.constant 0 : index
    %1 = vector.load %arg3[%c0_1, %c0_2] : memref<1x64xf32, #tpu.memory_space<vmem>>, vector<1x64xf32>
    %c0_3 = arith.constant 0 : index
    %c0_4 = arith.constant 0 : index
    %c0_5 = arith.constant 0 : index
    %2 = vector.load %arg1[%c0_3, %c0_4, %c0_5] : memref<4x4x288xbf16, #tpu.memory_space<vmem>>, vector<1x4x288xbf16>
    %3 = vector.shape_cast %2 : vector<1x4x288xbf16> to vector<4x288xbf16>
    %cst = arith.constant dense<0.000000e+00> : vector<4x64xf32>
    %4 = tpu.matmul %3, %0, %cst {dimension_numbers = #tpu.dot_dimension_numbers<[1], [0], [0], [1], [0, 0, 1, 1], [], []>} : vector<4x288xbf16>, vector<288x64xbf16>, vector<4x64xf32> -> vector<4x64xf32>
    %5 = vector.broadcast %1 : vector<1x64xf32> to vector<4x64xf32>
    %6 = arith.addf %4, %5 : vector<4x64xf32>
    %cst_6 = arith.constant 0.000000e+00 : f32
    %7 = vector.broadcast %cst_6 : f32 to vector<4x64xf32>
    %8 = arith.maximumf %6, %7 : vector<4x64xf32>
    %c1 = arith.constant 1 : index
    %c0_7 = arith.constant 0 : index
    %c0_8 = arith.constant 0 : index
    %9 = vector.load %arg1[%c1, %c0_7, %c0_8] : memref<4x4x288xbf16, #tpu.memory_space<vmem>>, vector<1x4x288xbf16>
    %10 = vector.shape_cast %9 : vector<1x4x288xbf16> to vector<4x288xbf16>
    %cst_9 = arith.constant dense<0.000000e+00> : vector<4x64xf32>
    %11 = tpu.matmul %10, %0, %cst_9 {dimension_numbers = #tpu.dot_dimension_numbers<[1], [0], [0], [1], [0, 0, 1, 1], [], []>} : vector<4x288xbf16>, vector<288x64xbf16>, vector<4x64xf32> -> vector<4x64xf32>
    %12 = vector.broadcast %1 : vector<1x64xf32> to vector<4x64xf32>
    %13 = arith.addf %11, %12 : vector<4x64xf32>
    %cst_10 = arith.constant 0.000000e+00 : f32
    %14 = vector.broadcast %cst_10 : f32 to vector<4x64xf32>
    %15 = arith.maximumf %13, %14 : vector<4x64xf32>
    %16 = arith.maximumf %8, %15 : vector<4x64xf32>
    %c2 = arith.constant 2 : index
    %c0_11 = arith.constant 0 : index
    %c0_12 = arith.constant 0 : index
    %17 = vector.load %arg1[%c2, %c0_11, %c0_12] : memref<4x4x288xbf16, #tpu.memory_space<vmem>>, vector<1x4x288xbf16>
    %18 = vector.shape_cast %17 : vector<1x4x288xbf16> to vector<4x288xbf16>
    %cst_13 = arith.constant dense<0.000000e+00> : vector<4x64xf32>
    %19 = tpu.matmul %18, %0, %cst_13 {dimension_numbers = #tpu.dot_dimension_numbers<[1], [0], [0], [1], [0, 0, 1, 1], [], []>} : vector<4x288xbf16>, vector<288x64xbf16>, vector<4x64xf32> -> vector<4x64xf32>
    %20 = vector.broadcast %1 : vector<1x64xf32> to vector<4x64xf32>
    %21 = arith.addf %19, %20 : vector<4x64xf32>
    %cst_14 = arith.constant 0.000000e+00 : f32
    %22 = vector.broadcast %cst_14 : f32 to vector<4x64xf32>
    %23 = arith.maximumf %21, %22 : vector<4x64xf32>
    %24 = arith.maximumf %16, %23 : vector<4x64xf32>
    %c3 = arith.constant 3 : index
    %c0_15 = arith.constant 0 : index
    %c0_16 = arith.constant 0 : index
    %25 = vector.load %arg1[%c3, %c0_15, %c0_16] : memref<4x4x288xbf16, #tpu.memory_space<vmem>>, vector<1x4x288xbf16>
    %26 = vector.shape_cast %25 : vector<1x4x288xbf16> to vector<4x288xbf16>
    %cst_17 = arith.constant dense<0.000000e+00> : vector<4x64xf32>
    %27 = tpu.matmul %26, %0, %cst_17 {dimension_numbers = #tpu.dot_dimension_numbers<[1], [0], [0], [1], [0, 0, 1, 1], [], []>} : vector<4x288xbf16>, vector<288x64xbf16>, vector<4x64xf32> -> vector<4x64xf32>
    %28 = vector.broadcast %1 : vector<1x64xf32> to vector<4x64xf32>
    %29 = arith.addf %27, %28 : vector<4x64xf32>
    %cst_18 = arith.constant 0.000000e+00 : f32
    %30 = vector.broadcast %cst_18 : f32 to vector<4x64xf32>
    %31 = arith.maximumf %29, %30 : vector<4x64xf32>
    %32 = arith.maximumf %24, %31 : vector<4x64xf32>
    %c0_19 = arith.constant 0 : index
    %c0_20 = arith.constant 0 : index
    %33 = vector.load %arg4[%c0_19, %c0_20] : memref<4x64xf32, #tpu.memory_space<vmem>>, vector<4x64xf32>
    tpu.vector_store %arg4[%c0_19, %c0_20], %32 {strides = array<i32>} : memref<4x64xf32, #tpu.memory_space<vmem>>, vector<4x64xf32>,
    return
  }
  func.func @transform_0(%arg0: i32) -> (i32, i32, i32) {
    %c0_i32 = arith.constant 0 : i32
    %c0_i32_0 = arith.constant 0 : i32
    %c0_i32_1 = arith.constant 0 : i32
    %c0_i32_2 = arith.constant 0 : i32
    return %c0_i32, %c0_i32_0, %c0_i32_1 : i32, i32, i32
  }
  func.func @transform_1(%arg0: i32) -> (i32, i32) {
    %c0_i32 = arith.constant 0 : i32
    %c0_i32_0 = arith.constant 0 : i32
    %c0_i32_1 = arith.constant 0 : i32
    return %c0_i32, %c0_i32_0 : i32, i32
  }
  func.func @transform_2(%arg0: i32) -> (i32, i32) {
    %c0_i32 = arith.constant 0 : i32
    %c0_i32_0 = arith.constant 0 : i32
    %c0_i32_1 = arith.constant 0 : i32
    return %c0_i32, %c0_i32_0 : i32, i32
  }
  func.func @transform_3(%arg0: i32) -> (i32, i32) {
    %c0_i32 = arith.constant 0 : i32
    %c0_i32_0 = arith.constant 0 : i32
    %c0_i32_1 = arith.constant 0 : i32
    return %c0_i32, %c0_i32_0 : i32, i32
  }
}

module attributes {stable_mosaic.version = 11 : i64} {
  func.func @_actor_head_kernel(%arg0: i32, %arg1: memref<8x140xbf16, #tpu.memory_space<vmem>>, %arg2: memref<8x128xbf16, #tpu.memory_space<vmem>>, %arg3: memref<8x128xf32, #tpu.memory_space<vmem>>, %arg4: memref<140x512xbf16, #tpu.memory_space<vmem>>, %arg5: memref<128x512xbf16, #tpu.memory_space<vmem>>, %arg6: memref<1x512xf32, #tpu.memory_space<vmem>>, %arg7: memref<4x128x128xbf16, #tpu.memory_space<vmem>>, %arg8: memref<4x128xf32, #tpu.memory_space<vmem>>, %arg9: memref<8x128xf32, #tpu.memory_space<vmem>>) attributes {dimension_semantics = [#tpu.dimension_semantics<arbitrary>], iteration_bounds = array<i64: 1>, scalar_prefetch = 0 : i64, scratch_operands = 0 : i64, tpu.core_type = #tpu.core_type<tc>, window_params = [{pipeline_mode = #tpu.pipeline_mode<synchronous>, transform_indices = @transform_0, window_bounds = array<i64: 8, 140>}, {pipeline_mode = #tpu.pipeline_mode<synchronous>, transform_indices = @transform_1, window_bounds = array<i64: 8, 128>}, {pipeline_mode = #tpu.pipeline_mode<synchronous>, transform_indices = @transform_2, window_bounds = array<i64: 8, 128>}, {pipeline_mode = #tpu.pipeline_mode<synchronous>, transform_indices = @transform_3, window_bounds = array<i64: 140, 512>}, {pipeline_mode = #tpu.pipeline_mode<synchronous>, transform_indices = @transform_4, window_bounds = array<i64: 128, 512>}, {pipeline_mode = #tpu.pipeline_mode<synchronous>, transform_indices = @transform_5, window_bounds = array<i64: 1, 512>}, {pipeline_mode = #tpu.pipeline_mode<synchronous>, transform_indices = @transform_6, window_bounds = array<i64: 4, 128, 128>}, {pipeline_mode = #tpu.pipeline_mode<synchronous>, transform_indices = @transform_7, window_bounds = array<i64: 4, 128>}, {pipeline_mode = #tpu.pipeline_mode<synchronous>, transform_indices = @transform_8, window_bounds = array<i64: 8, 128>}]} {
    %c0 = arith.constant 0 : index
    %c0_0 = arith.constant 0 : index
    %0 = vector.load %arg1[%c0, %c0_0] : memref<8x140xbf16, #tpu.memory_space<vmem>>, vector<8x140xbf16>
    %c0_1 = arith.constant 0 : index
    %c0_2 = arith.constant 0 : index
    %1 = vector.load %arg4[%c0_1, %c0_2] : memref<140x512xbf16, #tpu.memory_space<vmem>>, vector<140x512xbf16>
    %c0_3 = arith.constant 0 : index
    %c0_4 = arith.constant 0 : index
    %2 = vector.load %arg2[%c0_3, %c0_4] : memref<8x128xbf16, #tpu.memory_space<vmem>>, vector<8x128xbf16>
    %c0_5 = arith.constant 0 : index
    %c0_6 = arith.constant 0 : index
    %3 = vector.load %arg5[%c0_5, %c0_6] : memref<128x512xbf16, #tpu.memory_space<vmem>>, vector<128x512xbf16>
    %c0_7 = arith.constant 0 : index
    %c0_8 = arith.constant 0 : index
    %4 = vector.load %arg6[%c0_7, %c0_8] : memref<1x512xf32, #tpu.memory_space<vmem>>, vector<1x512xf32>
    %cst = arith.constant dense<0.000000e+00> : vector<8x512xf32>
    %5 = tpu.matmul %0, %1, %cst {dimension_numbers = #tpu.dot_dimension_numbers<[1], [0], [0], [1], [0, 0, 1, 1], [], []>} : vector<8x140xbf16>, vector<140x512xbf16>, vector<8x512xf32> -> vector<8x512xf32>
    %cst_9 = arith.constant dense<0.000000e+00> : vector<8x512xf32>
    %6 = tpu.matmul %2, %3, %cst_9 {dimension_numbers = #tpu.dot_dimension_numbers<[1], [0], [0], [1], [0, 0, 1, 1], [], []>} : vector<8x128xbf16>, vector<128x512xbf16>, vector<8x512xf32> -> vector<8x512xf32>
    %7 = arith.addf %5, %6 : vector<8x512xf32>
    %8 = vector.broadcast %4 : vector<1x512xf32> to vector<8x512xf32>
    %9 = arith.addf %7, %8 : vector<8x512xf32>
    %10 = vector.extract_strided_slice %9 {offsets = [0, 0], sizes = [8, 128], strides = [1, 1]} : vector<8x512xf32> to vector<8x128xf32>
    %11 = arith.negf %10 : vector<8x128xf32>
    %12 = math.exp %11 : vector<8x128xf32>
    %cst_10 = arith.constant 1.000000e+00 : f32
    %13 = vector.broadcast %cst_10 : f32 to vector<8x128xf32>
    %14 = arith.addf %13, %12 : vector<8x128xf32>
    %15 = arith.divf %13, %14 : vector<8x128xf32>
    %16 = vector.extract_strided_slice %9 {offsets = [0, 128], sizes = [8, 128], strides = [1, 1]} : vector<8x512xf32> to vector<8x128xf32>
    %17 = arith.negf %16 : vector<8x128xf32>
    %18 = math.exp %17 : vector<8x128xf32>
    %cst_11 = arith.constant 1.000000e+00 : f32
    %19 = vector.broadcast %cst_11 : f32 to vector<8x128xf32>
    %20 = arith.addf %19, %18 : vector<8x128xf32>
    %21 = arith.divf %19, %20 : vector<8x128xf32>
    %22 = vector.extract_strided_slice %9 {offsets = [0, 256], sizes = [8, 128], strides = [1, 1]} : vector<8x512xf32> to vector<8x128xf32>
    %23 = math.tanh %22 : vector<8x128xf32>
    %24 = vector.extract_strided_slice %9 {offsets = [0, 384], sizes = [8, 128], strides = [1, 1]} : vector<8x512xf32> to vector<8x128xf32>
    %25 = arith.negf %24 : vector<8x128xf32>
    %26 = math.exp %25 : vector<8x128xf32>
    %cst_12 = arith.constant 1.000000e+00 : f32
    %27 = vector.broadcast %cst_12 : f32 to vector<8x128xf32>
    %28 = arith.addf %27, %26 : vector<8x128xf32>
    %29 = arith.divf %27, %28 : vector<8x128xf32>
    %c0_13 = arith.constant 0 : index
    %c0_14 = arith.constant 0 : index
    %30 = vector.load %arg3[%c0_13, %c0_14] : memref<8x128xf32, #tpu.memory_space<vmem>>, vector<8x128xf32>
    %31 = arith.mulf %21, %30 : vector<8x128xf32>
    %32 = arith.mulf %15, %23 : vector<8x128xf32>
    %33 = arith.addf %31, %32 : vector<8x128xf32>
    %34 = math.tanh %33 : vector<8x128xf32>
    %35 = arith.mulf %29, %34 : vector<8x128xf32>
    %36 = arith.truncf %35 : vector<8x128xf32> to vector<8x128xbf16>
    %c0_15 = arith.constant 0 : index
    %c0_16 = arith.constant 0 : index
    %c0_17 = arith.constant 0 : index
    %37 = vector.load %arg7[%c0_15, %c0_16, %c0_17] : memref<4x128x128xbf16, #tpu.memory_space<vmem>>, vector<1x128x128xbf16>
    %38 = vector.shape_cast %37 : vector<1x128x128xbf16> to vector<128x128xbf16>
    %cst_18 = arith.constant dense<0.000000e+00> : vector<8x128xf32>
    %39 = tpu.matmul %36, %38, %cst_18 {dimension_numbers = #tpu.dot_dimension_numbers<[1], [0], [0], [1], [0, 0, 1, 1], [], []>} : vector<8x128xbf16>, vector<128x128xbf16>, vector<8x128xf32> -> vector<8x128xf32>
    %c0_19 = arith.constant 0 : index
    %c0_20 = arith.constant 0 : index
    %40 = vector.load %arg8[%c0_19, %c0_20] : memref<4x128xf32, #tpu.memory_space<vmem>>, vector<1x128xf32>
    %41 = vector.shape_cast %40 : vector<1x128xf32> to vector<128xf32>
    %42 = vector.shape_cast %41 : vector<128xf32> to vector<1x128xf32>
    %43 = vector.broadcast %42 : vector<1x128xf32> to vector<8x128xf32>
    %44 = arith.addf %39, %43 : vector<8x128xf32>
    %cst_21 = arith.constant 0.000000e+00 : f32
    %45 = vector.broadcast %cst_21 : f32 to vector<8x128xf32>
    %46 = arith.cmpf ogt, %44, %45 : vector<8x128xf32>
    %cst_22 = arith.constant 0.000000e+00 : f32
    %47 = vector.broadcast %cst_22 : f32 to vector<8x128xf32>
    %48 = arith.minimumf %44, %47 : vector<8x128xf32>
    %49 = math.exp %48 : vector<8x128xf32>
    %cst_23 = arith.constant 1.000000e+00 : f32
    %50 = vector.broadcast %cst_23 : f32 to vector<8x128xf32>
    %51 = arith.subf %49, %50 : vector<8x128xf32>
    %52 = arith.select %46, %44, %51 : vector<8x128xi1>, vector<8x128xf32>
    %53 = arith.truncf %52 : vector<8x128xf32> to vector<8x128xbf16>
    %c1 = arith.constant 1 : index
    %c0_24 = arith.constant 0 : index
    %c0_25 = arith.constant 0 : index
    %54 = vector.load %arg7[%c1, %c0_24, %c0_25] : memref<4x128x128xbf16, #tpu.memory_space<vmem>>, vector<1x128x128xbf16>
    %55 = vector.shape_cast %54 : vector<1x128x128xbf16> to vector<128x128xbf16>
    %cst_26 = arith.constant dense<0.000000e+00> : vector<8x128xf32>
    %56 = tpu.matmul %53, %55, %cst_26 {dimension_numbers = #tpu.dot_dimension_numbers<[1], [0], [0], [1], [0, 0, 1, 1], [], []>} : vector<8x128xbf16>, vector<128x128xbf16>, vector<8x128xf32> -> vector<8x128xf32>
    %c1_27 = arith.constant 1 : index
    %c0_28 = arith.constant 0 : index
    %57 = vector.load %arg8[%c1_27, %c0_28] : memref<4x128xf32, #tpu.memory_space<vmem>>, vector<1x128xf32>
    %58 = vector.shape_cast %57 : vector<1x128xf32> to vector<128xf32>
    %59 = vector.shape_cast %58 : vector<128xf32> to vector<1x128xf32>
    %60 = vector.broadcast %59 : vector<1x128xf32> to vector<8x128xf32>
    %61 = arith.addf %56, %60 : vector<8x128xf32>
    %cst_29 = arith.constant 0.000000e+00 : f32
    %62 = vector.broadcast %cst_29 : f32 to vector<8x128xf32>
    %63 = arith.cmpf ogt, %61, %62 : vector<8x128xf32>
    %cst_30 = arith.constant 0.000000e+00 : f32
    %64 = vector.broadcast %cst_30 : f32 to vector<8x128xf32>
    %65 = arith.minimumf %61, %64 : vector<8x128xf32>
    %66 = math.exp %65 : vector<8x128xf32>
    %cst_31 = arith.constant 1.000000e+00 : f32
    %67 = vector.broadcast %cst_31 : f32 to vector<8x128xf32>
    %68 = arith.subf %66, %67 : vector<8x128xf32>
    %69 = arith.select %63, %61, %68 : vector<8x128xi1>, vector<8x128xf32>
    %70 = arith.truncf %69 : vector<8x128xf32> to vector<8x128xbf16>
    %c2 = arith.constant 2 : index
    %c0_32 = arith.constant 0 : index
    %c0_33 = arith.constant 0 : index
    %71 = vector.load %arg7[%c2, %c0_32, %c0_33] : memref<4x128x128xbf16, #tpu.memory_space<vmem>>, vector<1x128x128xbf16>
    %72 = vector.shape_cast %71 : vector<1x128x128xbf16> to vector<128x128xbf16>
    %cst_34 = arith.constant dense<0.000000e+00> : vector<8x128xf32>
    %73 = tpu.matmul %70, %72, %cst_34 {dimension_numbers = #tpu.dot_dimension_numbers<[1], [0], [0], [1], [0, 0, 1, 1], [], []>} : vector<8x128xbf16>, vector<128x128xbf16>, vector<8x128xf32> -> vector<8x128xf32>
    %c2_35 = arith.constant 2 : index
    %c0_36 = arith.constant 0 : index
    %74 = vector.load %arg8[%c2_35, %c0_36] : memref<4x128xf32, #tpu.memory_space<vmem>>, vector<1x128xf32>
    %75 = vector.shape_cast %74 : vector<1x128xf32> to vector<128xf32>
    %76 = vector.shape_cast %75 : vector<128xf32> to vector<1x128xf32>
    %77 = vector.broadcast %76 : vector<1x128xf32> to vector<8x128xf32>
    %78 = arith.addf %73, %77 : vector<8x128xf32>
    %cst_37 = arith.constant 0.000000e+00 : f32
    %79 = vector.broadcast %cst_37 : f32 to vector<8x128xf32>
    %80 = arith.cmpf ogt, %78, %79 : vector<8x128xf32>
    %cst_38 = arith.constant 0.000000e+00 : f32
    %81 = vector.broadcast %cst_38 : f32 to vector<8x128xf32>
    %82 = arith.minimumf %78, %81 : vector<8x128xf32>
    %83 = math.exp %82 : vector<8x128xf32>
    %cst_39 = arith.constant 1.000000e+00 : f32
    %84 = vector.broadcast %cst_39 : f32 to vector<8x128xf32>
    %85 = arith.subf %83, %84 : vector<8x128xf32>
    %86 = arith.select %80, %78, %85 : vector<8x128xi1>, vector<8x128xf32>
    %87 = arith.truncf %86 : vector<8x128xf32> to vector<8x128xbf16>
    %c3 = arith.constant 3 : index
    %c0_40 = arith.constant 0 : index
    %c0_41 = arith.constant 0 : index
    %88 = vector.load %arg7[%c3, %c0_40, %c0_41] : memref<4x128x128xbf16, #tpu.memory_space<vmem>>, vector<1x128x128xbf16>
    %89 = vector.shape_cast %88 : vector<1x128x128xbf16> to vector<128x128xbf16>
    %cst_42 = arith.constant dense<0.000000e+00> : vector<8x128xf32>
    %90 = tpu.matmul %87, %89, %cst_42 {dimension_numbers = #tpu.dot_dimension_numbers<[1], [0], [0], [1], [0, 0, 1, 1], [], []>} : vector<8x128xbf16>, vector<128x128xbf16>, vector<8x128xf32> -> vector<8x128xf32>
    %c3_43 = arith.constant 3 : index
    %c0_44 = arith.constant 0 : index
    %91 = vector.load %arg8[%c3_43, %c0_44] : memref<4x128xf32, #tpu.memory_space<vmem>>, vector<1x128xf32>
    %92 = vector.shape_cast %91 : vector<1x128xf32> to vector<128xf32>
    %93 = vector.shape_cast %92 : vector<128xf32> to vector<1x128xf32>
    %94 = vector.broadcast %93 : vector<1x128xf32> to vector<8x128xf32>
    %95 = arith.addf %90, %94 : vector<8x128xf32>
    %c0_45 = arith.constant 0 : index
    %c0_46 = arith.constant 0 : index
    %96 = vector.load %arg9[%c0_45, %c0_46] : memref<8x128xf32, #tpu.memory_space<vmem>>, vector<8x128xf32>
    tpu.vector_store %arg9[%c0_45, %c0_46], %95 {strides = array<i32>} : memref<8x128xf32, #tpu.memory_space<vmem>>, vector<8x128xf32>,
    return
  }
  func.func @transform_0(%arg0: i32) -> (i32, i32) {
    %c0_i32 = arith.constant 0 : i32
    %c0_i32_0 = arith.constant 0 : i32
    %c0_i32_1 = arith.constant 0 : i32
    return %c0_i32, %c0_i32_0 : i32, i32
  }
  func.func @transform_1(%arg0: i32) -> (i32, i32) {
    %c0_i32 = arith.constant 0 : i32
    %c0_i32_0 = arith.constant 0 : i32
    %c0_i32_1 = arith.constant 0 : i32
    return %c0_i32, %c0_i32_0 : i32, i32
  }
  func.func @transform_2(%arg0: i32) -> (i32, i32) {
    %c0_i32 = arith.constant 0 : i32
    %c0_i32_0 = arith.constant 0 : i32
    %c0_i32_1 = arith.constant 0 : i32
    return %c0_i32, %c0_i32_0 : i32, i32
  }
  func.func @transform_3(%arg0: i32) -> (i32, i32) {
    %c0_i32 = arith.constant 0 : i32
    %c0_i32_0 = arith.constant 0 : i32
    %c0_i32_1 = arith.constant 0 : i32
    return %c0_i32, %c0_i32_0 : i32, i32
  }
  func.func @transform_4(%arg0: i32) -> (i32, i32) {
    %c0_i32 = arith.constant 0 : i32
    %c0_i32_0 = arith.constant 0 : i32
    %c0_i32_1 = arith.constant 0 : i32
    return %c0_i32, %c0_i32_0 : i32, i32
  }
  func.func @transform_5(%arg0: i32) -> (i32, i32) {
    %c0_i32 = arith.constant 0 : i32
    %c0_i32_0 = arith.constant 0 : i32
    %c0_i32_1 = arith.constant 0 : i32
    return %c0_i32, %c0_i32_0 : i32, i32
  }
  func.func @transform_6(%arg0: i32) -> (i32, i32, i32) {
    %c0_i32 = arith.constant 0 : i32
    %c0_i32_0 = arith.constant 0 : i32
    %c0_i32_1 = arith.constant 0 : i32
    %c0_i32_2 = arith.constant 0 : i32
    return %c0_i32, %c0_i32_0, %c0_i32_1 : i32, i32, i32
  }
  func.func @transform_7(%arg0: i32) -> (i32, i32) {
    %c0_i32 = arith.constant 0 : i32
    %c0_i32_0 = arith.constant 0 : i32
    %c0_i32_1 = arith.constant 0 : i32
    return %c0_i32, %c0_i32_0 : i32, i32
  }
  func.func @transform_8(%arg0: i32) -> (i32, i32) {
    %c0_i32 = arith.constant 0 : i32
    %c0_i32_0 = arith.constant 0 : i32
    %c0_i32_1 = arith.constant 0 : i32
    return %c0_i32, %c0_i32_0 : i32, i32
  }
}

</mosaic_0001>

<bundles_post_ra>
// kernel: _lambda_.4
= control target key start
LH: loop header
LB: loop body
LE: loop exit
PB: predicated region body
PF: predicated region fallthrough
CT: control target
= control target key end

     0   :  { %vm235_vm0 = vcmask 1043456   ;;  %vm236_vm1 = vcmask 1044480   ;;  %v2219_v2 = vmov 65535   ;;  %vm174_vm2 = vcmask 203776   ;;  %s2899_s1 = inlined_call_operand.vmem [shape: bf16[25,16], index: 1, kind: input, shape index: {}]   ;;  %s2900_s2 = inlined_call_operand.vmem [shape: f32[1,16], index: 2, kind: input, shape index: {}]   ;;  %s2901_s0 = inlined_call_operand.vmem [shape: bf16[4,320,25], index: 0, kind: input, shape index: {}]   ;;  %s2902_s3 = inlined_call_operand.vmem [shape: f32[320,16], index: 3, kind: output, shape index: {}]  }
   0x1   :  { %v1692_v0 = vld [vmem:[%s2899_s1 + $0x8] sm:$0xf]  ;;  %v2135_v1 = vld [vmem:[%s2899_s1 + $0x8] sm:$0x10]  ;;  %v237_v3 = vsel %vm235_vm0, 4294967295, %v2219_v2  ;;  %v2134_v7 = vld [vmem:[%s2899_s1] sm:$0xff] }
   0x2   :  { %v1693_v4 = vor.u32 %v2135_v1, %v1692_v0  ;;  %v238_v5 = vsel %vm236_vm1, %v237_v3, 0  ;;  %v2136_v8 = vld [vmem:[%s2901_s0] sm:$0xff]  ;;  %v2137_v12 = vld [vmem:[%s2901_s0 + $0x8] sm:$0xff]  ;;  %v2138_v16 = vld [vmem:[%s2901_s0 + $0x10] sm:$0xff]  ;;  %vm1561_vm3 = vcmask 130048  }
   0x3   :  { %v2156_v9 = vld [vmem:[%s2901_s0 + $0xa0] sm:$0xff]  ;;  %v2157_v13 = vld [vmem:[%s2901_s0 + $0xa8] sm:$0xff]  ;;  %v2158_v17 = vld [vmem:[%s2901_s0 + $0xb0] sm:$0xff] }
   0x4   :  { %v240_v6 = vand.u32 %v1693_v4, %v238_v5  ;;  %v2176_v10 = vld [vmem:[%s2901_s0 + $0x140] sm:$0xff]  ;;  %v2177_v14 = vld [vmem:[%s2901_s0 + $0x148] sm:$0xff]  ;;  %v2178_v18 = vld [vmem:[%s2901_s0 + $0x150] sm:$0xff] }
   0x5   :  { %v2196_v11 = vld [vmem:[%s2901_s0 + $0x1e0] sm:$0xff]  ;;  %v2197_v15 = vld [vmem:[%s2901_s0 + $0x1e8] sm:$0xff]  ;;  %v2198_v19 = vld [vmem:[%s2901_s0 + $0x1f0] sm:$0xff] }
   0x6   :  { %248 = vmatpush.bf16.msra.mxu0 %v240_v6  ;;  %598 = vmatpush.bf16.msra.mxu1 %v240_v6  ;;  %v2139_v20 = vld [vmem:[%s2901_s0 + $0x18] sm:$0xff]  ;;  %v2140_v24 = vld [vmem:[%s2901_s0 + $0x20] sm:$0xff]  ;;  %v2141_v28 = vld [vmem:[%s2901_s0 + $0x28] sm:$0xff] }
   0x7   :  { %988 = vmatpush.bf16.msra.mxu2 %v240_v6  ;;  %1378 = vmatpush.bf16.msra.mxu3 %v240_v6  ;;  %v2159_v21 = vld [vmem:[%s2901_s0 + $0xb8] sm:$0xff]  ;;  %v2160_v25 = vld [vmem:[%s2901_s0 + $0xc0] sm:$0xff]  ;;  %v2161_v29 = vld [vmem:[%s2901_s0 + $0xc8] sm:$0xff] }
   0x8   :  { %v2179_v22 = vld [vmem:[%s2901_s0 + $0x158] sm:$0xff]  ;;  %v2180_v26 = vld [vmem:[%s2901_s0 + $0x160] sm:$0xff]  ;;  %v2181_v30 = vld [vmem:[%s2901_s0 + $0x168] sm:$0xff] }
   0x9   :  { %v2199_v23 = vld [vmem:[%s2901_s0 + $0x1f8] sm:$0xff]  ;;  %v2200_v27 = vld [vmem:[%s2901_s0 + $0x200] sm:$0xff]  ;;  %v2201_v31 = vld [vmem:[%s2901_s0 + $0x208] sm:$0xff] }
   0xa   :  { %249 = vmatpush.bf16.msra.mxu0 %v2134_v7  ;;  %599 = vmatpush.bf16.msra.mxu1 %v2134_v7  ;;  %v2142_v32 = vld [vmem:[%s2901_s0 + $0x30] sm:$0xff]  ;;  %v2143_v36 = vld [vmem:[%s2901_s0 + $0x38] sm:$0xff]  ;;  %v2380_v40 = vld [vmem:[%s2900_s2] ss:$0 sm:$0xff] }
   0xb   :  { %989 = vmatpush.bf16.msra.mxu2 %v2134_v7  ;;  %1379 = vmatpush.bf16.msra.mxu3 %v2134_v7  ;;  %v2162_v33 = vld [vmem:[%s2901_s0 + $0xd0] sm:$0xff]  ;;  %v2163_v37 = vld [vmem:[%s2901_s0 + $0xd8] sm:$0xff]  ;;  %v2144_v41 = vld [vmem:[%s2901_s0 + $0x40] sm:$0xff] }
   0xc   :  { %v2182_v34 = vld [vmem:[%s2901_s0 + $0x170] sm:$0xff]  ;;  %v2183_v38 = vld [vmem:[%s2901_s0 + $0x178] sm:$0xff]  ;;  %v2164_v42 = vld [vmem:[%s2901_s0 + $0xe0] sm:$0xff] }
   0xd   :  { %1694 = vmatmul.msk.bf16.vlgmr.msra.gmra.mxu0 %vm174_vm2, %v2136_v8  ;;  %1834 = vmatmul.msk.bf16.vlgmr.msra.gmra.mxu1 %vm174_vm2, %v2156_v9  ;;  %v2202_v35 = vld [vmem:[%s2901_s0 + $0x210] sm:$0xff]  ;;  %v2203_v39 = vld [vmem:[%s2901_s0 + $0x218] sm:$0xff]  ;;  %v2184_v45 = vld [vmem:[%s2901_s0 + $0x180] sm:$0xff] }
   0xe   :  { %1974 = vmatmul.msk.bf16.vlgmr.msra.gmra.mxu2 %vm174_vm2, %v2176_v10  ;;  %2114 = vmatmul.msk.bf16.vlgmr.msra.gmra.mxu3 %vm174_vm2, %v2196_v11  ;;  %v2204_v46 = vld [vmem:[%s2901_s0 + $0x220] sm:$0xff]  ;;  %v2145_v4 = vld [vmem:[%s2901_s0 + $0x48] sm:$0xff] }
   0xf   :  { %v2165_v5 = vld [vmem:[%s2901_s0 + $0xe8] sm:$0xff] }
  0x10   :  { %v2185_v10 = vld [vmem:[%s2901_s0 + $0x188] sm:$0xff] }
  0x11   :  { %v2205_v11 = vld [vmem:[%s2901_s0 + $0x228] sm:$0xff] }
  0x1d   :  { %1695 = vmatmul.msk.bf16.gmra.mxu0 %vm174_vm2, %v2137_v12  ;;  %1835 = vmatmul.msk.bf16.gmra.mxu1 %vm174_vm2, %v2157_v13 }
  0x1e   :  { %1975 = vmatmul.msk.bf16.gmra.mxu2 %vm174_vm2, %v2177_v14  ;;  %2115 = vmatmul.msk.bf16.gmra.mxu3 %vm174_vm2, %v2197_v15 }
  0x2d   :  { %1696 = vmatmul.msk.bf16.gmra.mxu0 %vm174_vm2, %v2138_v16  ;;  %1836 = vmatmul.msk.bf16.gmra.mxu1 %vm174_vm2, %v2158_v17 }
  0x2e   :  { %1976 = vmatmul.msk.bf16.gmra.mxu2 %vm174_vm2, %v2178_v18  ;;  %2116 = vmatmul.msk.bf16.gmra.mxu3 %vm174_vm2, %v2198_v19 }
  0x3d   :  { %1697 = vmatmul.msk.bf16.gmra.mxu0 %vm174_vm2, %v2139_v20  ;;  %1837 = vmatmul.msk.bf16.gmra.mxu1 %vm174_vm2, %v2159_v21 }
  0x3e   :  { %1977 = vmatmul.msk.bf16.gmra.mxu2 %vm174_vm2, %v2179_v22  ;;  %2117 = vmatmul.msk.bf16.gmra.mxu3 %vm174_vm2, %v2199_v23 }
  0x4d   :  { %1698 = vmatmul.msk.bf16.gmra.mxu0 %vm174_vm2, %v2140_v24  ;;  %1838 = vmatmul.msk.bf16.gmra.mxu1 %vm174_vm2, %v2160_v25 }
  0x4e   :  { %1978 = vmatmul.msk.bf16.gmra.mxu2 %vm174_vm2, %v2180_v26  ;;  %2118 = vmatmul.msk.bf16.gmra.mxu3 %vm174_vm2, %v2200_v27 }
  0x5d   :  { %1699 = vmatmul.msk.bf16.gmra.mxu0 %vm174_vm2, %v2141_v28  ;;  %1839 = vmatmul.msk.bf16.gmra.mxu1 %vm174_vm2, %v2161_v29 }
  0x5e   :  { %1979 = vmatmul.msk.bf16.gmra.mxu2 %vm174_vm2, %v2181_v30  ;;  %2119 = vmatmul.msk.bf16.gmra.mxu3 %vm174_vm2, %v2201_v31 }
  0x6d   :  { %1700 = vmatmul.msk.bf16.gmra.mxu0 %vm174_vm2, %v2142_v32  ;;  %1840 = vmatmul.msk.bf16.gmra.mxu1 %vm174_vm2, %v2162_v33 }
  0x6e   :  { %1980 = vmatmul.msk.bf16.gmra.mxu2 %vm174_vm2, %v2182_v34  ;;  %2120 = vmatmul.msk.bf16.gmra.mxu3 %vm174_vm2, %v2202_v35 }
  0x7d   :  { %1701 = vmatmul.msk.bf16.gmra.mxu0 %vm174_vm2, %v2143_v36  ;;  %1841 = vmatmul.msk.bf16.gmra.mxu1 %vm174_vm2, %v2163_v37 }
  0x7e   :  { %1981 = vmatmul.msk.bf16.gmra.mxu2 %vm174_vm2, %v2183_v38  ;;  %2121 = vmatmul.msk.bf16.gmra.mxu3 %vm174_vm2, %v2203_v39  ;;  %v2146_v38 = vld [vmem:[%s2901_s0 + $0x50] sm:$0xff] }
  0x7f   :  { %v2166_v39 = vld [vmem:[%s2901_s0 + $0xf0] sm:$0xff] }
  0x8a   :  { %v251_v43 = vpop.f32.mrf.mxu0  ;;  %v601_v44 = vpop.f32.mrf.mxu1 }
  0x8b   :  { %v252_v47 = vadd.f32 %v2380_v40, %v251_v43  ;;  %v602_v48 = vadd.f32 %v2380_v40, %v601_v44 }
  0x8d   :  { %1702 = vmatmul.msk.bf16.gmra.mxu0 %vm174_vm2, %v2144_v41  ;;  %1842 = vmatmul.msk.bf16.gmra.mxu1 %vm174_vm2, %v2164_v42  ;;  %v351_v49 = vmax.f32 %v252_v47, 0.0  ;;  %v701_v50 = vmax.f32 %v602_v48, 0.0 }
  0x8e   :  { %1982 = vmatmul.msk.bf16.gmra.mxu2 %vm174_vm2, %v2184_v45  ;;  %2122 = vmatmul.msk.bf16.gmra.mxu3 %vm174_vm2, %v2204_v46  ;;  %v2186_v45 = vld [vmem:[%s2901_s0 + $0x190] sm:$0xff] }
  0x8f   :  { %v741_v53 = vmax.f32 %v351_v49, %v701_v50  ;;  %v2206_v46 = vld [vmem:[%s2901_s0 + $0x230] sm:$0xff] }
  0x91   :  { %v991_v51 = vpop.f32.mrf.mxu2  ;;  %v1381_v52 = vpop.f32.mrf.mxu3 }
  0x92   :  { %v992_v54 = vadd.f32 %v2380_v40, %v991_v51  ;;  %v1382_v55 = vadd.f32 %v2380_v40, %v1381_v52  ;;  %v253_v56 = vpop.f32.mrf.mxu0  ;;  %v603_v57 = vpop.f32.mrf.mxu1 }
  0x93   :  { %v254_v60 = vadd.f32 %v2380_v40, %v253_v56  ;;  %v604_v61 = vadd.f32 %v2380_v40, %v603_v57 }
  0x94   :  { %v1091_v58 = vmax.f32 %v992_v54, 0.0  ;;  %v1481_v59 = vmax.f32 %v1382_v55, 0.0 }
  0x95   :  { %v352_v0 = vmax.f32 %v254_v60, 0.0  ;;  %v702_v1 = vmax.f32 %v604_v61, 0.0 }
  0x96   :  { %v1131_v62 = vmax.f32 %v741_v53, %v1091_v58 }
  0x97   :  { %v742_v14 = vmax.f32 %v352_v0, %v702_v1 }
  0x98   :  { %v1521_v63 = vmax.f32 %v1131_v62, %v1481_v59 }
  0x99   :  { %v993_v2 = vpop.f32.mrf.mxu2  ;;  %v1383_v3 = vpop.f32.mrf.mxu3 }
  0x9a   :  { %1562 = vst.msk [vmem:[%s2902_s3] sm:$0xff] %vm1561_vm3, %v1521_v63  ;;  %v994_v6 = vadd.f32 %v2380_v40, %v993_v2  ;;  %v1384_v7 = vadd.f32 %v2380_v40, %v1383_v3  ;;  %v256_v8 = vpop.f32.mrf.mxu0  ;;  %v606_v9 = vpop.f32.mrf.mxu1 }
  0x9b   :  { %v257_v12 = vadd.f32 %v2380_v40, %v256_v8  ;;  %v607_v13 = vadd.f32 %v2380_v40, %v606_v9  ;;  %v2147_v9 = vld [vmem:[%s2901_s0 + $0x58] sm:$0xff] }
  0x9c   :  { %v1092_v15 = vmax.f32 %v994_v6, 0.0  ;;  %v1482_v17 = vmax.f32 %v1384_v7, 0.0 }
  0x9d   :  { %1703 = vmatmul.msk.bf16.gmra.mxu0 %vm174_vm2, %v2145_v4  ;;  %1843 = vmatmul.msk.bf16.gmra.mxu1 %vm174_vm2, %v2165_v5  ;;  %v353_v18 = vmax.f32 %v257_v12, 0.0  ;;  %v703_v19 = vmax.f32 %v607_v13, 0.0 }
  0x9e   :  { %v1132_v16 = vmax.f32 %v742_v14, %v1092_v15  ;;  %1983 = vmatmul.msk.bf16.gmra.mxu2 %vm174_vm2, %v2185_v10  ;;  %2123 = vmatmul.msk.bf16.gmra.mxu3 %vm174_vm2, %v2205_v11  ;;  %v2167_v10 = vld [vmem:[%s2901_s0 + $0xf8] sm:$0xff] }
  0x9f   :  { %v743_v23 = vmax.f32 %v353_v18, %v703_v19  ;;  %v2187_v15 = vld [vmem:[%s2901_s0 + $0x198] sm:$0xff] }
  0xa0   :  { %v1522_v20 = vmax.f32 %v1132_v16, %v1482_v17  ;;  %v2207_v16 = vld [vmem:[%s2901_s0 + $0x238] sm:$0xff] }
  0xa1   :  { %v996_v21 = vpop.f32.mrf.mxu2  ;;  %v1386_v22 = vpop.f32.mrf.mxu3 }
  0xa2   :  { %1563 = vst.msk [vmem:[%s2902_s3 + $0x8] sm:$0xff] %vm1561_vm3, %v1522_v20  ;;  %v997_v24 = vadd.f32 %v2380_v40, %v996_v21  ;;  %v1387_v25 = vadd.f32 %v2380_v40, %v1386_v22  ;;  %v258_v26 = vpop.f32.mrf.mxu0  ;;  %v608_v27 = vpop.f32.mrf.mxu1 }
  0xa3   :  { %v259_v30 = vadd.f32 %v2380_v40, %v258_v26  ;;  %v609_v31 = vadd.f32 %v2380_v40, %v608_v27 }
  0xa4   :  { %v1093_v28 = vmax.f32 %v997_v24, 0.0  ;;  %v1483_v29 = vmax.f32 %v1387_v25, 0.0 }
  0xa5   :  { %v354_v34 = vmax.f32 %v259_v30, 0.0  ;;  %v704_v35 = vmax.f32 %v609_v31, 0.0 }
  0xa6   :  { %v1133_v32 = vmax.f32 %v743_v23, %v1093_v28 }
  0xa7   :  { %v744_v49 = vmax.f32 %v354_v34, %v704_v35 }
  0xa8   :  { %v1523_v33 = vmax.f32 %v1133_v32, %v1483_v29 }
  0xa9   :  { %v998_v36 = vpop.f32.mrf.mxu2  ;;  %v1388_v37 = vpop.f32.mrf.mxu3 }
  0xaa   :  { %1564 = vst.msk [vmem:[%s2902_s3 + $0x10] sm:$0xff] %vm1561_vm3, %v1523_v33  ;;  %v999_v41 = vadd.f32 %v2380_v40, %v998_v36  ;;  %v1389_v42 = vadd.f32 %v2380_v40, %v1388_v37  ;;  %v261_v43 = vpop.f32.mrf.mxu0  ;;  %v611_v44 = vpop.f32.mrf.mxu1 }
  0xab   :  { %v262_v47 = vadd.f32 %v2380_v40, %v261_v43  ;;  %v612_v48 = vadd.f32 %v2380_v40, %v611_v44  ;;  %v2148_v44 = vld [vmem:[%s2901_s0 + $0x60] sm:$0xff] }
  0xac   :  { %v1094_v50 = vmax.f32 %v999_v41, 0.0  ;;  %v1484_v52 = vmax.f32 %v1389_v42, 0.0 }
  0xad   :  { %1704 = vmatmul.msk.bf16.gmra.mxu0 %vm174_vm2, %v2146_v38  ;;  %1844 = vmatmul.msk.bf16.gmra.mxu1 %vm174_vm2, %v2166_v39  ;;  %v355_v53 = vmax.f32 %v262_v47, 0.0  ;;  %v705_v54 = vmax.f32 %v612_v48, 0.0 }
  0xae   :  { %v1134_v51 = vmax.f32 %v744_v49, %v1094_v50  ;;  %1984 = vmatmul.msk.bf16.gmra.mxu2 %vm174_vm2, %v2186_v45  ;;  %2124 = vmatmul.msk.bf16.gmra.mxu3 %vm174_vm2, %v2206_v46  ;;  %v2168_v45 = vld [vmem:[%s2901_s0 + $0x100] sm:$0xff] }
  0xaf   :  { %v745_v58 = vmax.f32 %v355_v53, %v705_v54  ;;  %v2188_v50 = vld [vmem:[%s2901_s0 + $0x1a0] sm:$0xff] }
  0xb0   :  { %v1524_v55 = vmax.f32 %v1134_v51, %v1484_v52  ;;  %v2208_v51 = vld [vmem:[%s2901_s0 + $0x240] sm:$0xff] }
  0xb1   :  { %v1001_v56 = vpop.f32.mrf.mxu2  ;;  %v1391_v57 = vpop.f32.mrf.mxu3 }
  0xb2   :  { %1565 = vst.msk [vmem:[%s2902_s3 + $0x18] sm:$0xff] %vm1561_vm3, %v1524_v55  ;;  %v1002_v59 = vadd.f32 %v2380_v40, %v1001_v56  ;;  %v1392_v60 = vadd.f32 %v2380_v40, %v1391_v57  ;;  %v263_v61 = vpop.f32.mrf.mxu0  ;;  %v613_v62 = vpop.f32.mrf.mxu1 }
  0xb3   :  { %v264_v1 = vadd.f32 %v2380_v40, %v263_v61  ;;  %v614_v2 = vadd.f32 %v2380_v40, %v613_v62 }
  0xb4   :  { %v1095_v63 = vmax.f32 %v1002_v59, 0.0  ;;  %v1485_v0 = vmax.f32 %v1392_v60, 0.0 }
  0xb5   :  { %v356_v5 = vmax.f32 %v264_v1, 0.0  ;;  %v706_v6 = vmax.f32 %v614_v2, 0.0 }
  0xb6   :  { %v1135_v3 = vmax.f32 %v745_v58, %v1095_v63 }
  0xb7   :  { %v746_v19 = vmax.f32 %v356_v5, %v706_v6 }
  0xb8   :  { %v1525_v4 = vmax.f32 %v1135_v3, %v1485_v0 }
  0xb9   :  { %v1003_v7 = vpop.f32.mrf.mxu2  ;;  %v1393_v8 = vpop.f32.mrf.mxu3 }
  0xba   :  { %1566 = vst.msk [vmem:[%s2902_s3 + $0x20] sm:$0xff] %vm1561_vm3, %v1525_v4  ;;  %v1004_v11 = vadd.f32 %v2380_v40, %v1003_v7  ;;  %v1394_v12 = vadd.f32 %v2380_v40, %v1393_v8  ;;  %v266_v13 = vpop.f32.mrf.mxu0  ;;  %v616_v14 = vpop.f32.mrf.mxu1 }
  0xbb   :  { %v267_v17 = vadd.f32 %v2380_v40, %v266_v13  ;;  %v617_v18 = vadd.f32 %v2380_v40, %v616_v14  ;;  %v2149_v14 = vld [vmem:[%s2901_s0 + $0x68] sm:$0xff] }
  0xbc   :  { %v1096_v20 = vmax.f32 %v1004_v11, 0.0  ;;  %v1486_v22 = vmax.f32 %v1394_v12, 0.0 }
  0xbd   :  { %1705 = vmatmul.msk.bf16.gmra.mxu0 %vm174_vm2, %v2147_v9  ;;  %1845 = vmatmul.msk.bf16.gmra.mxu1 %vm174_vm2, %v2167_v10  ;;  %v357_v23 = vmax.f32 %v267_v17, 0.0  ;;  %v707_v24 = vmax.f32 %v617_v18, 0.0 }
  0xbe   :  { %v1136_v21 = vmax.f32 %v746_v19, %v1096_v20  ;;  %1985 = vmatmul.msk.bf16.gmra.mxu2 %vm174_vm2, %v2187_v15  ;;  %2125 = vmatmul.msk.bf16.gmra.mxu3 %vm174_vm2, %v2207_v16  ;;  %v2169_v15 = vld [vmem:[%s2901_s0 + $0x108] sm:$0xff] }
  0xbf   :  { %v747_v28 = vmax.f32 %v357_v23, %v707_v24  ;;  %v2189_v20 = vld [vmem:[%s2901_s0 + $0x1a8] sm:$0xff] }
  0xc0   :  { %v1526_v25 = vmax.f32 %v1136_v21, %v1486_v22  ;;  %v2209_v21 = vld [vmem:[%s2901_s0 + $0x248] sm:$0xff] }
  0xc1   :  { %v1006_v26 = vpop.f32.mrf.mxu2  ;;  %v1396_v27 = vpop.f32.mrf.mxu3 }
  0xc2   :  { %1567 = vst.msk [vmem:[%s2902_s3 + $0x28] sm:$0xff] %vm1561_vm3, %v1526_v25  ;;  %v1007_v29 = vadd.f32 %v2380_v40, %v1006_v26  ;;  %v1397_v30 = vadd.f32 %v2380_v40, %v1396_v27  ;;  %v268_v31 = vpop.f32.mrf.mxu0  ;;  %v618_v32 = vpop.f32.mrf.mxu1 }
  0xc3   :  { %v269_v35 = vadd.f32 %v2380_v40, %v268_v31  ;;  %v619_v36 = vadd.f32 %v2380_v40, %v618_v32 }
  0xc4   :  { %v1097_v33 = vmax.f32 %v1007_v29, 0.0  ;;  %v1487_v34 = vmax.f32 %v1397_v30, 0.0 }
  0xc5   :  { %v358_v39 = vmax.f32 %v269_v35, 0.0  ;;  %v708_v41 = vmax.f32 %v619_v36, 0.0 }
  0xc6   :  { %v1137_v37 = vmax.f32 %v747_v28, %v1097_v33 }
  0xc7   :  { %v748_v54 = vmax.f32 %v358_v39, %v708_v41 }
  0xc8   :  { %v1527_v38 = vmax.f32 %v1137_v37, %v1487_v34 }
  0xc9   :  { %v1008_v42 = vpop.f32.mrf.mxu2  ;;  %v1398_v43 = vpop.f32.mrf.mxu3 }
  0xca   :  { %1568 = vst.msk [vmem:[%s2902_s3 + $0x30] sm:$0xff] %vm1561_vm3, %v1527_v38  ;;  %v1009_v46 = vadd.f32 %v2380_v40, %v1008_v42  ;;  %v1399_v47 = vadd.f32 %v2380_v40, %v1398_v43  ;;  %v271_v48 = vpop.f32.mrf.mxu0  ;;  %v621_v49 = vpop.f32.mrf.mxu1 }
  0xcb   :  { %v272_v52 = vadd.f32 %v2380_v40, %v271_v48  ;;  %v622_v53 = vadd.f32 %v2380_v40, %v621_v49  ;;  %v2150_v49 = vld [vmem:[%s2901_s0 + $0x70] sm:$0xff] }
  0xcc   :  { %v1098_v55 = vmax.f32 %v1009_v46, 0.0  ;;  %v1488_v57 = vmax.f32 %v1399_v47, 0.0 }
  0xcd   :  { %1706 = vmatmul.msk.bf16.gmra.mxu0 %vm174_vm2, %v2148_v44  ;;  %1846 = vmatmul.msk.bf16.gmra.mxu1 %vm174_vm2, %v2168_v45  ;;  %v359_v58 = vmax.f32 %v272_v52, 0.0  ;;  %v709_v59 = vmax.f32 %v622_v53, 0.0 }
  0xce   :  { %v1138_v56 = vmax.f32 %v748_v54, %v1098_v55  ;;  %1986 = vmatmul.msk.bf16.gmra.mxu2 %vm174_vm2, %v2188_v50  ;;  %2126 = vmatmul.msk.bf16.gmra.mxu3 %vm174_vm2, %v2208_v51  ;;  %v2170_v50 = vld [vmem:[%s2901_s0 + $0x110] sm:$0xff] }
  0xcf   :  { %v749_v63 = vmax.f32 %v359_v58, %v709_v59  ;;  %v2190_v55 = vld [vmem:[%s2901_s0 + $0x1b0] sm:$0xff] }
  0xd0   :  { %v1528_v60 = vmax.f32 %v1138_v56, %v1488_v57  ;;  %v2210_v56 = vld [vmem:[%s2901_s0 + $0x250] sm:$0xff] }
  0xd1   :  { %v1011_v61 = vpop.f32.mrf.mxu2  ;;  %v1401_v62 = vpop.f32.mrf.mxu3 }
  0xd2   :  { %1569 = vst.msk [vmem:[%s2902_s3 + $0x38] sm:$0xff] %vm1561_vm3, %v1528_v60  ;;  %v1012_v0 = vadd.f32 %v2380_v40, %v1011_v61  ;;  %v1402_v1 = vadd.f32 %v2380_v40, %v1401_v62  ;;  %v273_v2 = vpop.f32.mrf.mxu0  ;;  %v623_v3 = vpop.f32.mrf.mxu1 }
  0xd3   :  { %v274_v6 = vadd.f32 %v2380_v40, %v273_v2  ;;  %v624_v7 = vadd.f32 %v2380_v40, %v623_v3 }
  0xd4   :  { %v1099_v4 = vmax.f32 %v1012_v0, 0.0  ;;  %v1489_v5 = vmax.f32 %v1402_v1, 0.0 }
  0xd5   :  { %v360_v10 = vmax.f32 %v274_v6, 0.0  ;;  %v710_v11 = vmax.f32 %v624_v7, 0.0 }
  0xd6   :  { %v1139_v8 = vmax.f32 %v749_v63, %v1099_v4 }
  0xd7   :  { %v750_v24 = vmax.f32 %v360_v10, %v710_v11 }
  0xd8   :  { %v1529_v9 = vmax.f32 %v1139_v8, %v1489_v5 }
  0xd9   :  { %v1013_v12 = vpop.f32.mrf.mxu2  ;;  %v1403_v13 = vpop.f32.mrf.mxu3 }
  0xda   :  { %1570 = vst.msk [vmem:[%s2902_s3 + $0x40] sm:$0xff] %vm1561_vm3, %v1529_v9  ;;  %v1014_v16 = vadd.f32 %v2380_v40, %v1013_v12  ;;  %v1404_v17 = vadd.f32 %v2380_v40, %v1403_v13  ;;  %v276_v18 = vpop.f32.mrf.mxu0  ;;  %v626_v19 = vpop.f32.mrf.mxu1 }
  0xdb   :  { %v277_v22 = vadd.f32 %v2380_v40, %v276_v18  ;;  %v627_v23 = vadd.f32 %v2380_v40, %v626_v19  ;;  %v2151_v19 = vld [vmem:[%s2901_s0 + $0x78] sm:$0xff] }
  0xdc   :  { %v1100_v25 = vmax.f32 %v1014_v16, 0.0  ;;  %v1490_v27 = vmax.f32 %v1404_v17, 0.0 }
  0xdd   :  { %1707 = vmatmul.msk.bf16.gmra.mxu0 %vm174_vm2, %v2149_v14  ;;  %1847 = vmatmul.msk.bf16.gmra.mxu1 %vm174_vm2, %v2169_v15  ;;  %v361_v28 = vmax.f32 %v277_v22, 0.0  ;;  %v711_v29 = vmax.f32 %v627_v23, 0.0 }
  0xde   :  { %v1140_v26 = vmax.f32 %v750_v24, %v1100_v25  ;;  %1987 = vmatmul.msk.bf16.gmra.mxu2 %vm174_vm2, %v2189_v20  ;;  %2127 = vmatmul.msk.bf16.gmra.mxu3 %vm174_vm2, %v2209_v21  ;;  %v2171_v20 = vld [vmem:[%s2901_s0 + $0x118] sm:$0xff] }
  0xdf   :  { %v751_v33 = vmax.f32 %v361_v28, %v711_v29  ;;  %v2191_v25 = vld [vmem:[%s2901_s0 + $0x1b8] sm:$0xff] }
  0xe0   :  { %v1530_v30 = vmax.f32 %v1140_v26, %v1490_v27  ;;  %v2211_v26 = vld [vmem:[%s2901_s0 + $0x258] sm:$0xff] }
  0xe1   :  { %v1016_v31 = vpop.f32.mrf.mxu2  ;;  %v1406_v32 = vpop.f32.mrf.mxu3 }
  0xe2   :  { %1571 = vst.msk [vmem:[%s2902_s3 + $0x48] sm:$0xff] %vm1561_vm3, %v1530_v30  ;;  %v1017_v34 = vadd.f32 %v2380_v40, %v1016_v31  ;;  %v1407_v35 = vadd.f32 %v2380_v40, %v1406_v32  ;;  %v278_v36 = vpop.f32.mrf.mxu0  ;;  %v628_v37 = vpop.f32.mrf.mxu1 }
  0xe3   :  { %v279_v41 = vadd.f32 %v2380_v40, %v278_v36  ;;  %v629_v42 = vadd.f32 %v2380_v40, %v628_v37 }
  0xe4   :  { %v1101_v38 = vmax.f32 %v1017_v34, 0.0  ;;  %v1491_v39 = vmax.f32 %v1407_v35, 0.0 }
  0xe5   :  { %v362_v45 = vmax.f32 %v279_v41, 0.0  ;;  %v712_v46 = vmax.f32 %v629_v42, 0.0 }
  0xe6   :  { %v1141_v43 = vmax.f32 %v751_v33, %v1101_v38 }
  0xe7   :  { %v752_v59 = vmax.f32 %v362_v45, %v712_v46 }
  0xe8   :  { %v1531_v44 = vmax.f32 %v1141_v43, %v1491_v39 }
  0xe9   :  { %v1018_v47 = vpop.f32.mrf.mxu2  ;;  %v1408_v48 = vpop.f32.mrf.mxu3 }
  0xea   :  { %1572 = vst.msk [vmem:[%s2902_s3 + $0x50] sm:$0xff] %vm1561_vm3, %v1531_v44  ;;  %v1019_v51 = vadd.f32 %v2380_v40, %v1018_v47  ;;  %v1409_v52 = vadd.f32 %v2380_v40, %v1408_v48  ;;  %v281_v53 = vpop.f32.mrf.mxu0  ;;  %v631_v54 = vpop.f32.mrf.mxu1 }
  0xeb   :  { %v282_v57 = vadd.f32 %v2380_v40, %v281_v53  ;;  %v632_v58 = vadd.f32 %v2380_v40, %v631_v54  ;;  %v2152_v54 = vld [vmem:[%s2901_s0 + $0x80] sm:$0xff] }
  0xec   :  { %v1102_v60 = vmax.f32 %v1019_v51, 0.0  ;;  %v1492_v62 = vmax.f32 %v1409_v52, 0.0 }
  0xed   :  { %1708 = vmatmul.msk.bf16.gmra.mxu0 %vm174_vm2, %v2150_v49  ;;  %1848 = vmatmul.msk.bf16.gmra.mxu1 %vm174_vm2, %v2170_v50  ;;  %v363_v63 = vmax.f32 %v282_v57, 0.0  ;;  %v713_v0 = vmax.f32 %v632_v58, 0.0 }
  0xee   :  { %v1142_v61 = vmax.f32 %v752_v59, %v1102_v60  ;;  %1988 = vmatmul.msk.bf16.gmra.mxu2 %vm174_vm2, %v2190_v55  ;;  %2128 = vmatmul.msk.bf16.gmra.mxu3 %vm174_vm2, %v2210_v56  ;;  %v2172_v55 = vld [vmem:[%s2901_s0 + $0x120] sm:$0xff] }
  0xef   :  { %v753_v4 = vmax.f32 %v363_v63, %v713_v0  ;;  %v2192_v60 = vld [vmem:[%s2901_s0 + $0x1c0] sm:$0xff] }
  0xf0   :  { %v1532_v1 = vmax.f32 %v1142_v61, %v1492_v62  ;;  %v2212_v61 = vld [vmem:[%s2901_s0 + $0x260] sm:$0xff] }
  0xf1   :  { %v1021_v2 = vpop.f32.mrf.mxu2  ;;  %v1411_v3 = vpop.f32.mrf.mxu3 }
  0xf2   :  { %1573 = vst.msk [vmem:[%s2902_s3 + $0x58] sm:$0xff] %vm1561_vm3, %v1532_v1  ;;  %v1022_v5 = vadd.f32 %v2380_v40, %v1021_v2  ;;  %v1412_v6 = vadd.f32 %v2380_v40, %v1411_v3  ;;  %v283_v7 = vpop.f32.mrf.mxu0  ;;  %v633_v8 = vpop.f32.mrf.mxu1 }
  0xf3   :  { %v284_v11 = vadd.f32 %v2380_v40, %v283_v7  ;;  %v634_v12 = vadd.f32 %v2380_v40, %v633_v8 }
  0xf4   :  { %v1103_v9 = vmax.f32 %v1022_v5, 0.0  ;;  %v1493_v10 = vmax.f32 %v1412_v6, 0.0 }
  0xf5   :  { %v364_v15 = vmax.f32 %v284_v11, 0.0  ;;  %v714_v16 = vmax.f32 %v634_v12, 0.0 }
  0xf6   :  { %v1143_v13 = vmax.f32 %v753_v4, %v1103_v9 }
  0xf7   :  { %v754_v29 = vmax.f32 %v364_v15, %v714_v16 }
  0xf8   :  { %v1533_v14 = vmax.f32 %v1143_v13, %v1493_v10 }
  0xf9   :  { %v1023_v17 = vpop.f32.mrf.mxu2  ;;  %v1413_v18 = vpop.f32.mrf.mxu3 }
  0xfa   :  { %1574 = vst.msk [vmem:[%s2902_s3 + $0x60] sm:$0xff] %vm1561_vm3, %v1533_v14  ;;  %v1024_v21 = vadd.f32 %v2380_v40, %v1023_v17  ;;  %v1414_v22 = vadd.f32 %v2380_v40, %v1413_v18  ;;  %v286_v23 = vpop.f32.mrf.mxu0  ;;  %v636_v24 = vpop.f32.mrf.mxu1 }
  0xfb   :  { %v287_v27 = vadd.f32 %v2380_v40, %v286_v23  ;;  %v637_v28 = vadd.f32 %v2380_v40, %v636_v24  ;;  %v2153_v24 = vld [vmem:[%s2901_s0 + $0x88] sm:$0xff] }
  0xfc   :  { %v1104_v30 = vmax.f32 %v1024_v21, 0.0  ;;  %v1494_v32 = vmax.f32 %v1414_v22, 0.0 }
  0xfd   :  { %1709 = vmatmul.msk.bf16.gmra.mxu0 %vm174_vm2, %v2151_v19  ;;  %1849 = vmatmul.msk.bf16.gmra.mxu1 %vm174_vm2, %v2171_v20  ;;  %v365_v33 = vmax.f32 %v287_v27, 0.0  ;;  %v715_v34 = vmax.f32 %v637_v28, 0.0 }
  0xfe   :  { %v1144_v31 = vmax.f32 %v754_v29, %v1104_v30  ;;  %1989 = vmatmul.msk.bf16.gmra.mxu2 %vm174_vm2, %v2191_v25  ;;  %2129 = vmatmul.msk.bf16.gmra.mxu3 %vm174_vm2, %v2211_v26  ;;  %v2173_v25 = vld [vmem:[%s2901_s0 + $0x128] sm:$0xff] }
  0xff   :  { %v755_v38 = vmax.f32 %v365_v33, %v715_v34  ;;  %v2193_v30 = vld [vmem:[%s2901_s0 + $0x1c8] sm:$0xff] }
 0x100   :  { %v1534_v35 = vmax.f32 %v1144_v31, %v1494_v32  ;;  %v2213_v31 = vld [vmem:[%s2901_s0 + $0x268] sm:$0xff] }
 0x101   :  { %v1026_v36 = vpop.f32.mrf.mxu2  ;;  %v1416_v37 = vpop.f32.mrf.mxu3 }
 0x102   :  { %1575 = vst.msk [vmem:[%s2902_s3 + $0x68] sm:$0xff] %vm1561_vm3, %v1534_v35  ;;  %v1027_v39 = vadd.f32 %v2380_v40, %v1026_v36  ;;  %v1417_v41 = vadd.f32 %v2380_v40, %v1416_v37  ;;  %v288_v42 = vpop.f32.mrf.mxu0  ;;  %v638_v43 = vpop.f32.mrf.mxu1 }
 0x103   :  { %v289_v46 = vadd.f32 %v2380_v40, %v288_v42  ;;  %v639_v47 = vadd.f32 %v2380_v40, %v638_v43 }
 0x104   :  { %v1105_v44 = vmax.f32 %v1027_v39, 0.0  ;;  %v1495_v45 = vmax.f32 %v1417_v41, 0.0 }
 0x105   :  { %v366_v50 = vmax.f32 %v289_v46, 0.0  ;;  %v716_v51 = vmax.f32 %v639_v47, 0.0 }
 0x106   :  { %v1145_v48 = vmax.f32 %v755_v38, %v1105_v44 }
 0x107   :  { %v756_v0 = vmax.f32 %v366_v50, %v716_v51 }
 0x108   :  { %v1535_v49 = vmax.f32 %v1145_v48, %v1495_v45 }
 0x109   :  { %v1028_v52 = vpop.f32.mrf.mxu2  ;;  %v1418_v53 = vpop.f32.mrf.mxu3 }
 0x10a   :  { %1576 = vst.msk [vmem:[%s2902_s3 + $0x70] sm:$0xff] %vm1561_vm3, %v1535_v49  ;;  %v1029_v56 = vadd.f32 %v2380_v40, %v1028_v52  ;;  %v1419_v57 = vadd.f32 %v2380_v40, %v1418_v53  ;;  %v291_v58 = vpop.f32.mrf.mxu0  ;;  %v641_v59 = vpop.f32.mrf.mxu1 }
 0x10b   :  { %v292_v62 = vadd.f32 %v2380_v40, %v291_v58  ;;  %v642_v63 = vadd.f32 %v2380_v40, %v641_v59  ;;  %v2154_v59 = vld [vmem:[%s2901_s0 + $0x90] sm:$0xff] }
 0x10c   :  { %v1106_v1 = vmax.f32 %v1029_v56, 0.0  ;;  %v1496_v3 = vmax.f32 %v1419_v57, 0.0 }
 0x10d   :  { %1710 = vmatmul.msk.bf16.gmra.mxu0 %vm174_vm2, %v2152_v54  ;;  %1850 = vmatmul.msk.bf16.gmra.mxu1 %vm174_vm2, %v2172_v55  ;;  %v367_v4 = vmax.f32 %v292_v62, 0.0  ;;  %v717_v5 = vmax.f32 %v642_v63, 0.0 }
 0x10e   :  { %v1146_v2 = vmax.f32 %v756_v0, %v1106_v1  ;;  %1990 = vmatmul.msk.bf16.gmra.mxu2 %vm174_vm2, %v2192_v60  ;;  %2130 = vmatmul.msk.bf16.gmra.mxu3 %vm174_vm2, %v2212_v61  ;;  %v2174_v60 = vld [vmem:[%s2901_s0 + $0x130] sm:$0xff] }
 0x10f   :  { %v757_v9 = vmax.f32 %v367_v4, %v717_v5  ;;  %v2194_v1 = vld [vmem:[%s2901_s0 + $0x1d0] sm:$0xff] }
 0x110   :  { %v1536_v6 = vmax.f32 %v1146_v2, %v1496_v3  ;;  %v2214_v2 = vld [vmem:[%s2901_s0 + $0x270] sm:$0xff] }
 0x111   :  { %v1031_v7 = vpop.f32.mrf.mxu2  ;;  %v1421_v8 = vpop.f32.mrf.mxu3 }
 0x112   :  { %1577 = vst.msk [vmem:[%s2902_s3 + $0x78] sm:$0xff] %vm1561_vm3, %v1536_v6  ;;  %v1032_v10 = vadd.f32 %v2380_v40, %v1031_v7  ;;  %v1422_v11 = vadd.f32 %v2380_v40, %v1421_v8  ;;  %v293_v12 = vpop.f32.mrf.mxu0  ;;  %v643_v13 = vpop.f32.mrf.mxu1 }
 0x113   :  { %v294_v16 = vadd.f32 %v2380_v40, %v293_v12  ;;  %v644_v17 = vadd.f32 %v2380_v40, %v643_v13 }
 0x114   :  { %v1107_v14 = vmax.f32 %v1032_v10, 0.0  ;;  %v1497_v15 = vmax.f32 %v1422_v11, 0.0 }
 0x115   :  { %v368_v20 = vmax.f32 %v294_v16, 0.0  ;;  %v718_v21 = vmax.f32 %v644_v17, 0.0 }
 0x116   :  { %v1147_v18 = vmax.f32 %v757_v9, %v1107_v14 }
 0x117   :  { %v758_v34 = vmax.f32 %v368_v20, %v718_v21 }
 0x118   :  { %v1537_v19 = vmax.f32 %v1147_v18, %v1497_v15 }
 0x119   :  { %v1033_v22 = vpop.f32.mrf.mxu2  ;;  %v1423_v23 = vpop.f32.mrf.mxu3 }
 0x11a   :  { %1578 = vst.msk [vmem:[%s2902_s3 + $0x80] sm:$0xff] %vm1561_vm3, %v1537_v19  ;;  %v1034_v26 = vadd.f32 %v2380_v40, %v1033_v22  ;;  %v1424_v27 = vadd.f32 %v2380_v40, %v1423_v23  ;;  %v296_v28 = vpop.f32.mrf.mxu0  ;;  %v646_v29 = vpop.f32.mrf.mxu1 }
 0x11b   :  { %v297_v32 = vadd.f32 %v2380_v40, %v296_v28  ;;  %v647_v33 = vadd.f32 %v2380_v40, %v646_v29  ;;  %v2155_v29 = vld [vmem:[%s2901_s0 + $0x98] sm:$0xff] }
 0x11c   :  { %v1108_v35 = vmax.f32 %v1034_v26, 0.0  ;;  %v1498_v37 = vmax.f32 %v1424_v27, 0.0 }
 0x11d   :  { %1711 = vmatmul.msk.bf16.gmra.mxu0 %vm174_vm2, %v2153_v24  ;;  %1851 = vmatmul.msk.bf16.gmra.mxu1 %vm174_vm2, %v2173_v25  ;;  %v369_v38 = vmax.f32 %v297_v32, 0.0  ;;  %v719_v39 = vmax.f32 %v647_v33, 0.0 }
 0x11e   :  { %v1148_v36 = vmax.f32 %v758_v34, %v1108_v35  ;;  %1991 = vmatmul.msk.bf16.gmra.mxu2 %vm174_vm2, %v2193_v30  ;;  %2131 = vmatmul.msk.bf16.gmra.mxu3 %vm174_vm2, %v2213_v31  ;;  %v2175_v30 = vld [vmem:[%s2901_s0 + $0x138] sm:$0xff] }
 0x11f   :  { %v759_v44 = vmax.f32 %v369_v38, %v719_v39  ;;  %v2195_v35 = vld [vmem:[%s2901_s0 + $0x1d8] sm:$0xff] }
 0x120   :  { %v1538_v41 = vmax.f32 %v1148_v36, %v1498_v37  ;;  %v2215_v36 = vld [vmem:[%s2901_s0 + $0x278] sm:$0xff] }
 0x121   :  { %v1036_v42 = vpop.f32.mrf.mxu2  ;;  %v1426_v43 = vpop.f32.mrf.mxu3 }
 0x122   :  { %1579 = vst.msk [vmem:[%s2902_s3 + $0x88] sm:$0xff] %vm1561_vm3, %v1538_v41  ;;  %v1037_v45 = vadd.f32 %v2380_v40, %v1036_v42  ;;  %v1427_v46 = vadd.f32 %v2380_v40, %v1426_v43  ;;  %v298_v47 = vpop.f32.mrf.mxu0  ;;  %v648_v48 = vpop.f32.mrf.mxu1 }
 0x123   :  { %v299_v51 = vadd.f32 %v2380_v40, %v298_v47  ;;  %v649_v52 = vadd.f32 %v2380_v40, %v648_v48 }
 0x124   :  { %v1109_v49 = vmax.f32 %v1037_v45, 0.0  ;;  %v1499_v50 = vmax.f32 %v1427_v46, 0.0 }
 0x125   :  { %v370_v55 = vmax.f32 %v299_v51, 0.0  ;;  %v720_v56 = vmax.f32 %v649_v52, 0.0 }
 0x126   :  { %v1149_v53 = vmax.f32 %v759_v44, %v1109_v49 }
 0x127   :  { %v760_v5 = vmax.f32 %v370_v55, %v720_v56 }
 0x128   :  { %v1539_v54 = vmax.f32 %v1149_v53, %v1499_v50 }
 0x129   :  { %v1038_v57 = vpop.f32.mrf.mxu2  ;;  %v1428_v58 = vpop.f32.mrf.mxu3 }
 0x12a   :  { %1580 = vst.msk [vmem:[%s2902_s3 + $0x90] sm:$0xff] %vm1561_vm3, %v1539_v54  ;;  %v1039_v61 = vadd.f32 %v2380_v40, %v1038_v57  ;;  %v1429_v62 = vadd.f32 %v2380_v40, %v1428_v58  ;;  %v301_v63 = vpop.f32.mrf.mxu0  ;;  %v651_v0 = vpop.f32.mrf.mxu1 }
 0x12b   :  { %v302_v3 = vadd.f32 %v2380_v40, %v301_v63  ;;  %v652_v4 = vadd.f32 %v2380_v40, %v651_v0 }
 0x12c   :  { %v1110_v6 = vmax.f32 %v1039_v61, 0.0  ;;  %v1500_v8 = vmax.f32 %v1429_v62, 0.0 }
 0x12d   :  { %1712 = vmatmul.msk.bf16.gmra.mxu0 %vm174_vm2, %v2154_v59  ;;  %1852 = vmatmul.msk.bf16.gmra.mxu1 %vm174_vm2, %v2174_v60  ;;  %v371_v9 = vmax.f32 %v302_v3, 0.0  ;;  %v721_v10 = vmax.f32 %v652_v4, 0.0 }
 0x12e   :  { %v1150_v7 = vmax.f32 %v760_v5, %v1110_v6  ;;  %1992 = vmatmul.msk.bf16.gmra.mxu2 %vm174_vm2, %v2194_v1  ;;  %2132 = vmatmul.msk.bf16.gmra.mxu3 %vm174_vm2, %v2214_v2 }
 0x12f   :  { %v761_v14 = vmax.f32 %v371_v9, %v721_v10 }
 0x130   :  { %v1540_v11 = vmax.f32 %v1150_v7, %v1500_v8 }
 0x131   :  { %v1041_v12 = vpop.f32.mrf.mxu2  ;;  %v1431_v13 = vpop.f32.mrf.mxu3 }
 0x132   :  { %1581 = vst.msk [vmem:[%s2902_s3 + $0x98] sm:$0xff] %vm1561_vm3, %v1540_v11  ;;  %v1042_v15 = vadd.f32 %v2380_v40, %v1041_v12  ;;  %v1432_v16 = vadd.f32 %v2380_v40, %v1431_v13  ;;  %v303_v17 = vpop.f32.mrf.mxu0  ;;  %v653_v18 = vpop.f32.mrf.mxu1 }
 0x133   :  { %v304_v21 = vadd.f32 %v2380_v40, %v303_v17  ;;  %v654_v22 = vadd.f32 %v2380_v40, %v653_v18 }
 0x134   :  { %v1111_v19 = vmax.f32 %v1042_v15, 0.0  ;;  %v1501_v20 = vmax.f32 %v1432_v16, 0.0 }
 0x135   :  { %v372_v25 = vmax.f32 %v304_v21, 0.0  ;;  %v722_v26 = vmax.f32 %v654_v22, 0.0 }
 0x136   :  { %v1151_v23 = vmax.f32 %v761_v14, %v1111_v19 }
 0x137   :  { %v762_v39 = vmax.f32 %v372_v25, %v722_v26 }
 0x138   :  { %v1541_v24 = vmax.f32 %v1151_v23, %v1501_v20 }
 0x139   :  { %v1043_v27 = vpop.f32.mrf.mxu2  ;;  %v1433_v28 = vpop.f32.mrf.mxu3 }
 0x13a   :  { %1582 = vst.msk [vmem:[%s2902_s3 + $0xa0] sm:$0xff] %vm1561_vm3, %v1541_v24  ;;  %v1044_v31 = vadd.f32 %v2380_v40, %v1043_v27  ;;  %v1434_v32 = vadd.f32 %v2380_v40, %v1433_v28  ;;  %v306_v33 = vpop.f32.mrf.mxu0  ;;  %v656_v34 = vpop.f32.mrf.mxu1 }
 0x13b   :  { %v307_v37 = vadd.f32 %v2380_v40, %v306_v33  ;;  %v657_v38 = vadd.f32 %v2380_v40, %v656_v34 }
 0x13c   :  { %v1112_v41 = vmax.f32 %v1044_v31, 0.0  ;;  %v1502_v43 = vmax.f32 %v1434_v32, 0.0 }
 0x13d   :  { %1713 = vmatmul.msk.bf16.gmra.mxu0 %vm174_vm2, %v2155_v29  ;;  %1853 = vmatmul.msk.bf16.gmra.mxu1 %vm174_vm2, %v2175_v30  ;;  %v373_v44 = vmax.f32 %v307_v37, 0.0  ;;  %v723_v45 = vmax.f32 %v657_v38, 0.0 }
 0x13e   :  { %v1152_v42 = vmax.f32 %v762_v39, %v1112_v41  ;;  %1993 = vmatmul.msk.bf16.gmra.mxu2 %vm174_vm2, %v2195_v35  ;;  %2133 = vmatmul.msk.bf16.gmra.mxu3 %vm174_vm2, %v2215_v36  ;;  %v2782_v35 = vld [vmem:[%s2900_s2] ss:$0 sm:$0xff] }
 0x13f   :  { %v763_v49 = vmax.f32 %v373_v44, %v723_v45 }
 0x140   :  { %v1542_v46 = vmax.f32 %v1152_v42, %v1502_v43 }
 0x141   :  { %v1046_v47 = vpop.f32.mrf.mxu2  ;;  %v1436_v48 = vpop.f32.mrf.mxu3 }
 0x142   :  { %1583 = vst.msk [vmem:[%s2902_s3 + $0xa8] sm:$0xff] %vm1561_vm3, %v1542_v46  ;;  %v1047_v50 = vadd.f32 %v2380_v40, %v1046_v47  ;;  %v1437_v51 = vadd.f32 %v2380_v40, %v1436_v48  ;;  %v308_v52 = vpop.f32.mrf.mxu0  ;;  %v658_v53 = vpop.f32.mrf.mxu1 }
 0x143   :  { %v309_v56 = vadd.f32 %v2380_v40, %v308_v52  ;;  %v659_v57 = vadd.f32 %v2380_v40, %v658_v53 }
 0x144   :  { %v1113_v54 = vmax.f32 %v1047_v50, 0.0  ;;  %v1503_v55 = vmax.f32 %v1437_v51, 0.0 }
 0x145   :  { %v374_v60 = vmax.f32 %v309_v56, 0.0  ;;  %v724_v61 = vmax.f32 %v659_v57, 0.0 }
 0x146   :  { %v1153_v58 = vmax.f32 %v763_v49, %v1113_v54 }
 0x147   :  { %v764_v6 = vmax.f32 %v374_v60, %v724_v61 }
 0x148   :  { %v1543_v59 = vmax.f32 %v1153_v58, %v1503_v55 }
 0x149   :  { %v1048_v62 = vpop.f32.mrf.mxu2  ;;  %v1438_v63 = vpop.f32.mrf.mxu3 }
 0x14a   :  { %1584 = vst.msk [vmem:[%s2902_s3 + $0xb0] sm:$0xff] %vm1561_vm3, %v1543_v59  ;;  %v1049_v0 = vadd.f32 %v2380_v40, %v1048_v62  ;;  %v1439_v1 = vadd.f32 %v2380_v40, %v1438_v63  ;;  %v311_v2 = vpop.f32.mrf.mxu0  ;;  %v661_v3 = vpop.f32.mrf.mxu1 }
 0x14b   :  { %v312_v4 = vadd.f32 %v2380_v40, %v311_v2  ;;  %v662_v5 = vadd.f32 %v2380_v40, %v661_v3 }
 0x14c   :  { %v1114_v7 = vmax.f32 %v1049_v0, 0.0  ;;  %v1504_v9 = vmax.f32 %v1439_v1, 0.0 }
 0x14d   :  { %v375_v10 = vmax.f32 %v312_v4, 0.0  ;;  %v725_v11 = vmax.f32 %v662_v5, 0.0 }
 0x14e   :  { %v1154_v8 = vmax.f32 %v764_v6, %v1114_v7 }
 0x14f   :  { %v765_v15 = vmax.f32 %v375_v10, %v725_v11 }
 0x150   :  { %v1544_v12 = vmax.f32 %v1154_v8, %v1504_v9 }
 0x151   :  { %v1051_v13 = vpop.f32.mrf.mxu2  ;;  %v1441_v14 = vpop.f32.mrf.mxu3 }
 0x152   :  { %1585 = vst.msk [vmem:[%s2902_s3 + $0xb8] sm:$0xff] %vm1561_vm3, %v1544_v12  ;;  %v1052_v16 = vadd.f32 %v2380_v40, %v1051_v13  ;;  %v1442_v17 = vadd.f32 %v2380_v40, %v1441_v14  ;;  %v313_v18 = vpop.f32.mrf.mxu0  ;;  %v663_v19 = vpop.f32.mrf.mxu1 }
 0x153   :  { %v314_v22 = vadd.f32 %v2380_v40, %v313_v18  ;;  %v664_v23 = vadd.f32 %v2380_v40, %v663_v19 }
 0x154   :  { %v1115_v20 = vmax.f32 %v1052_v16, 0.0  ;;  %v1505_v21 = vmax.f32 %v1442_v17, 0.0 }
 0x155   :  { %v376_v26 = vmax.f32 %v314_v22, 0.0  ;;  %v726_v27 = vmax.f32 %v664_v23, 0.0 }
 0x156   :  { %v1155_v24 = vmax.f32 %v765_v15, %v1115_v20 }
 0x157   :  { %v766_v37 = vmax.f32 %v376_v26, %v726_v27 }
 0x158   :  { %v1545_v25 = vmax.f32 %v1155_v24, %v1505_v21 }
 0x159   :  { %v1053_v28 = vpop.f32.mrf.mxu2  ;;  %v1443_v29 = vpop.f32.mrf.mxu3 }
 0x15a   :  { %1586 = vst.msk [vmem:[%s2902_s3 + $0xc0] sm:$0xff] %vm1561_vm3, %v1545_v25  ;;  %v1054_v30 = vadd.f32 %v2380_v40, %v1053_v28  ;;  %v1444_v31 = vadd.f32 %v2380_v40, %v1443_v29  ;;  %v316_v32 = vpop.f32.mrf.mxu0  ;;  %v666_v33 = vpop.f32.mrf.mxu1 }
 0x15b   :  { %v317_v34 = vadd.f32 %v2380_v40, %v316_v32  ;;  %v667_v36 = vadd.f32 %v2782_v35, %v666_v33 }
 0x15c   :  { %v1116_v38 = vmax.f32 %v1054_v30, 0.0  ;;  %v1506_v41 = vmax.f32 %v1444_v31, 0.0 }
 0x15d   :  { %v377_v42 = vmax.f32 %v317_v34, 0.0  ;;  %v727_v43 = vmax.f32 %v667_v36, 0.0 }
 0x15e   :  { %v1156_v39 = vmax.f32 %v766_v37, %v1116_v38 }
 0x15f   :  { %v767_v40 = vmax.f32 %v377_v42, %v727_v43 }
 0x160   :  { %v1546_v44 = vmax.f32 %v1156_v39, %v1506_v41 }
 0x161   :  { %v1056_v45 = vpop.f32.mrf.mxu2  ;;  %v1446_v46 = vpop.f32.mrf.mxu3 }
 0x162   :  { %1587 = vst.msk [vmem:[%s2902_s3 + $0xc8] sm:$0xff] %vm1561_vm3, %v1546_v44  ;;  %v1057_v47 = vadd.f32 %v2782_v35, %v1056_v45  ;;  %v1447_v48 = vadd.f32 %v2782_v35, %v1446_v46  ;;  %v318_v49 = vpop.f32.mrf.mxu0  ;;  %v668_v50 = vpop.f32.mrf.mxu1 }
 0x163   :  { %v319_v53 = vadd.f32 %v2782_v35, %v318_v49  ;;  %v669_v54 = vadd.f32 %v2782_v35, %v668_v50 }
 0x164   :  { %v1117_v51 = vmax.f32 %v1057_v47, 0.0  ;;  %v1507_v52 = vmax.f32 %v1447_v48, 0.0 }
 0x165   :  { %v378_v57 = vmax.f32 %v319_v53, 0.0  ;;  %v728_v58 = vmax.f32 %v669_v54, 0.0 }
 0x166   :  { %v1157_v55 = vmax.f32 %v767_v40, %v1117_v51 }
 0x167   :  { %v768_v3 = vmax.f32 %v378_v57, %v728_v58 }
 0x168   :  { %v1547_v56 = vmax.f32 %v1157_v55, %v1507_v52 }
 0x169   :  { %v1058_v59 = vpop.f32.mrf.mxu2  ;;  %v1448_v60 = vpop.f32.mrf.mxu3 }
 0x16a   :  { %1588 = vst.msk [vmem:[%s2902_s3 + $0xd0] sm:$0xff] %vm1561_vm3, %v1547_v56  ;;  %v1059_v61 = vadd.f32 %v2782_v35, %v1058_v59  ;;  %v1449_v62 = vadd.f32 %v2782_v35, %v1448_v60  ;;  %v321_v63 = vpop.f32.mrf.mxu0  ;;  %v671_v0 = vpop.f32.mrf.mxu1 }
 0x16b   :  { %v322_v1 = vadd.f32 %v2782_v35, %v321_v63  ;;  %v672_v2 = vadd.f32 %v2782_v35, %v671_v0 }
 0x16c   :  { %v1118_v4 = vmax.f32 %v1059_v61, 0.0  ;;  %v1508_v6 = vmax.f32 %v1449_v62, 0.0 }
 0x16d   :  { %v379_v7 = vmax.f32 %v322_v1, 0.0  ;;  %v729_v8 = vmax.f32 %v672_v2, 0.0 }
 0x16e   :  { %v1158_v5 = vmax.f32 %v768_v3, %v1118_v4 }
 0x16f   :  { %v769_v12 = vmax.f32 %v379_v7, %v729_v8 }
 0x170   :  { %v1548_v9 = vmax.f32 %v1158_v5, %v1508_v6 }
 0x171   :  { %v1061_v10 = vpop.f32.mrf.mxu2  ;;  %v1451_v11 = vpop.f32.mrf.mxu3 }
 0x172   :  { %1589 = vst.msk [vmem:[%s2902_s3 + $0xd8] sm:$0xff] %vm1561_vm3, %v1548_v9  ;;  %v1062_v13 = vadd.f32 %v2782_v35, %v1061_v10  ;;  %v1452_v14 = vadd.f32 %v2782_v35, %v1451_v11  ;;  %v323_v15 = vpop.f32.mrf.mxu0  ;;  %v673_v16 = vpop.f32.mrf.mxu1 }
 0x173   :  { %v324_v19 = vadd.f32 %v2782_v35, %v323_v15  ;;  %v674_v20 = vadd.f32 %v2782_v35, %v673_v16 }
 0x174   :  { %v1119_v17 = vmax.f32 %v1062_v13, 0.0  ;;  %v1509_v18 = vmax.f32 %v1452_v14, 0.0 }
 0x175   :  { %v380_v23 = vmax.f32 %v324_v19, 0.0  ;;  %v730_v24 = vmax.f32 %v674_v20, 0.0 }
 0x176   :  { %v1159_v21 = vmax.f32 %v769_v12, %v1119_v17 }
 0x177   :  { %v770_v33 = vmax.f32 %v380_v23, %v730_v24 }
 0x178   :  { %v1549_v22 = vmax.f32 %v1159_v21, %v1509_v18 }
 0x179   :  { %v1063_v25 = vpop.f32.mrf.mxu2  ;;  %v1453_v26 = vpop.f32.mrf.mxu3 }
 0x17a   :  { %1590 = vst.msk [vmem:[%s2902_s3 + $0xe0] sm:$0xff] %vm1561_vm3, %v1549_v22  ;;  %v1064_v27 = vadd.f32 %v2782_v35, %v1063_v25  ;;  %v1454_v28 = vadd.f32 %v2782_v35, %v1453_v26  ;;  %v326_v29 = vpop.f32.mrf.mxu0  ;;  %v676_v30 = vpop.f32.mrf.mxu1 }
 0x17b   :  { %v327_v31 = vadd.f32 %v2782_v35, %v326_v29  ;;  %v677_v32 = vadd.f32 %v2782_v35, %v676_v30 }
 0x17c   :  { %v1120_v34 = vmax.f32 %v1064_v27, 0.0  ;;  %v1510_v37 = vmax.f32 %v1454_v28, 0.0 }
 0x17d   :  { %v381_v38 = vmax.f32 %v327_v31, 0.0  ;;  %v731_v39 = vmax.f32 %v677_v32, 0.0 }
 0x17e   :  { %v1160_v36 = vmax.f32 %v770_v33, %v1120_v34 }
 0x17f   :  { %v771_v44 = vmax.f32 %v381_v38, %v731_v39 }
 0x180   :  { %v1550_v41 = vmax.f32 %v1160_v36, %v1510_v37 }
 0x181   :  { %v1066_v42 = vpop.f32.mrf.mxu2  ;;  %v1456_v43 = vpop.f32.mrf.mxu3 }
 0x182   :  { %1591 = vst.msk [vmem:[%s2902_s3 + $0xe8] sm:$0xff] %vm1561_vm3, %v1550_v41  ;;  %v1067_v45 = vadd.f32 %v2782_v35, %v1066_v42  ;;  %v1457_v46 = vadd.f32 %v2782_v35, %v1456_v43  ;;  %v328_v40 = vpop.f32.mrf.mxu0  ;;  %v678_v47 = vpop.f32.mrf.mxu1 }
 0x183   :  { %v329_v50 = vadd.f32 %v2782_v35, %v328_v40  ;;  %v679_v51 = vadd.f32 %v2782_v35, %v678_v47 }
 0x184   :  { %v1121_v48 = vmax.f32 %v1067_v45, 0.0  ;;  %v1511_v49 = vmax.f32 %v1457_v46, 0.0 }
 0x185   :  { %v382_v54 = vmax.f32 %v329_v50, 0.0  ;;  %v732_v55 = vmax.f32 %v679_v51, 0.0 }
 0x186   :  { %v1161_v52 = vmax.f32 %v771_v44, %v1121_v48 }
 0x187   :  { %v772_v0 = vmax.f32 %v382_v54, %v732_v55 }
 0x188   :  { %v1551_v53 = vmax.f32 %v1161_v52, %v1511_v49 }
 0x189   :  { %v1068_v56 = vpop.f32.mrf.mxu2  ;;  %v1458_v57 = vpop.f32.mrf.mxu3 }
 0x18a   :  { %1592 = vst.msk [vmem:[%s2902_s3 + $0xf0] sm:$0xff] %vm1561_vm3, %v1551_v53  ;;  %v1069_v58 = vadd.f32 %v2782_v35, %v1068_v56  ;;  %v1459_v59 = vadd.f32 %v2782_v35, %v1458_v57  ;;  %v331_v60 = vpop.f32.mrf.mxu0  ;;  %v681_v61 = vpop.f32.mrf.mxu1 }
 0x18b   :  { %v332_v62 = vadd.f32 %v2782_v35, %v331_v60  ;;  %v682_v63 = vadd.f32 %v2782_v35, %v681_v61 }
 0x18c   :  { %v1122_v1 = vmax.f32 %v1069_v58, 0.0  ;;  %v1512_v3 = vmax.f32 %v1459_v59, 0.0 }
 0x18d   :  { %v383_v4 = vmax.f32 %v332_v62, 0.0  ;;  %v733_v5 = vmax.f32 %v682_v63, 0.0 }
 0x18e   :  { %v1162_v2 = vmax.f32 %v772_v0, %v1122_v1 }
 0x18f   :  { %v773_v9 = vmax.f32 %v383_v4, %v733_v5 }
 0x190   :  { %v1552_v6 = vmax.f32 %v1162_v2, %v1512_v3 }
 0x191   :  { %v1071_v7 = vpop.f32.mrf.mxu2  ;;  %v1461_v8 = vpop.f32.mrf.mxu3 }
 0x192   :  { %1593 = vst.msk [vmem:[%s2902_s3 + $0xf8] sm:$0xff] %vm1561_vm3, %v1552_v6  ;;  %v1072_v10 = vadd.f32 %v2782_v35, %v1071_v7  ;;  %v1462_v11 = vadd.f32 %v2782_v35, %v1461_v8  ;;  %v333_v12 = vpop.f32.mrf.mxu0  ;;  %v683_v13 = vpop.f32.mrf.mxu1 }
 0x193   :  { %v334_v16 = vadd.f32 %v2782_v35, %v333_v12  ;;  %v684_v17 = vadd.f32 %v2782_v35, %v683_v13 }
 0x194   :  { %v1123_v14 = vmax.f32 %v1072_v10, 0.0  ;;  %v1513_v15 = vmax.f32 %v1462_v11, 0.0 }
 0x195   :  { %v384_v20 = vmax.f32 %v334_v16, 0.0  ;;  %v734_v21 = vmax.f32 %v684_v17, 0.0 }
 0x196   :  { %v1163_v18 = vmax.f32 %v773_v9, %v1123_v14 }
 0x197   :  { %v774_v30 = vmax.f32 %v384_v20, %v734_v21 }
 0x198   :  { %v1553_v19 = vmax.f32 %v1163_v18, %v1513_v15 }
 0x199   :  { %v1073_v22 = vpop.f32.mrf.mxu2  ;;  %v1463_v23 = vpop.f32.mrf.mxu3 }
 0x19a   :  { %1594 = vst.msk [vmem:[%s2902_s3 + $0x100] sm:$0xff] %vm1561_vm3, %v1553_v19  ;;  %v1074_v24 = vadd.f32 %v2782_v35, %v1073_v22  ;;  %v1464_v25 = vadd.f32 %v2782_v35, %v1463_v23  ;;  %v336_v26 = vpop.f32.mrf.mxu0  ;;  %v686_v27 = vpop.f32.mrf.mxu1 }
 0x19b   :  { %v337_v28 = vadd.f32 %v2782_v35, %v336_v26  ;;  %v687_v29 = vadd.f32 %v2782_v35, %v686_v27 }
 0x19c   :  { %v1124_v31 = vmax.f32 %v1074_v24, 0.0  ;;  %v1514_v33 = vmax.f32 %v1464_v25, 0.0 }
 0x19d   :  { %v385_v34 = vmax.f32 %v337_v28, 0.0  ;;  %v735_v36 = vmax.f32 %v687_v29, 0.0 }
 0x19e   :  { %v1164_v32 = vmax.f32 %v774_v30, %v1124_v31 }
 0x19f   :  { %v775_v41 = vmax.f32 %v385_v34, %v735_v36 }
 0x1a0   :  { %v1554_v37 = vmax.f32 %v1164_v32, %v1514_v33 }
 0x1a1   :  { %v1076_v38 = vpop.f32.mrf.mxu2  ;;  %v1466_v39 = vpop.f32.mrf.mxu3 }
 0x1a2   :  { %1595 = vst.msk [vmem:[%s2902_s3 + $0x108] sm:$0xff] %vm1561_vm3, %v1554_v37  ;;  %v1077_v42 = vadd.f32 %v2782_v35, %v1076_v38  ;;  %v1467_v43 = vadd.f32 %v2782_v35, %v1466_v39  ;;  %v338_v44 = vpop.f32.mrf.mxu0  ;;  %v688_v45 = vpop.f32.mrf.mxu1 }
 0x1a3   :  { %v339_v47 = vadd.f32 %v2782_v35, %v338_v44  ;;  %v689_v48 = vadd.f32 %v2782_v35, %v688_v45 }
 0x1a4   :  { %v1125_v46 = vmax.f32 %v1077_v42, 0.0  ;;  %v1515_v40 = vmax.f32 %v1467_v43, 0.0 }
 0x1a5   :  { %v386_v51 = vmax.f32 %v339_v47, 0.0  ;;  %v736_v52 = vmax.f32 %v689_v48, 0.0 }
 0x1a6   :  { %v1165_v49 = vmax.f32 %v775_v41, %v1125_v46 }
 0x1a7   :  { %v776_v61 = vmax.f32 %v386_v51, %v736_v52 }
 0x1a8   :  { %v1555_v50 = vmax.f32 %v1165_v49, %v1515_v40 }
 0x1a9   :  { %v1078_v53 = vpop.f32.mrf.mxu2  ;;  %v1468_v54 = vpop.f32.mrf.mxu3 }
 0x1aa   :  { %1596 = vst.msk [vmem:[%s2902_s3 + $0x110] sm:$0xff] %vm1561_vm3, %v1555_v50  ;;  %v1079_v55 = vadd.f32 %v2782_v35, %v1078_v53  ;;  %v1469_v56 = vadd.f32 %v2782_v35, %v1468_v54  ;;  %v341_v57 = vpop.f32.mrf.mxu0  ;;  %v691_v58 = vpop.f32.mrf.mxu1 }
 0x1ab   :  { %v342_v59 = vadd.f32 %v2782_v35, %v341_v57  ;;  %v692_v60 = vadd.f32 %v2782_v35, %v691_v58 }
 0x1ac   :  { %v1126_v62 = vmax.f32 %v1079_v55, 0.0  ;;  %v1516_v0 = vmax.f32 %v1469_v56, 0.0 }
 0x1ad   :  { %v387_v1 = vmax.f32 %v342_v59, 0.0  ;;  %v737_v2 = vmax.f32 %v692_v60, 0.0 }
 0x1ae   :  { %v1166_v63 = vmax.f32 %v776_v61, %v1126_v62 }
 0x1af   :  { %v777_v6 = vmax.f32 %v387_v1, %v737_v2 }
 0x1b0   :  { %v1556_v3 = vmax.f32 %v1166_v63, %v1516_v0 }
 0x1b1   :  { %v1081_v4 = vpop.f32.mrf.mxu2  ;;  %v1471_v5 = vpop.f32.mrf.mxu3 }
 0x1b2   :  { %1597 = vst.msk [vmem:[%s2902_s3 + $0x118] sm:$0xff] %vm1561_vm3, %v1556_v3  ;;  %v1082_v7 = vadd.f32 %v2782_v35, %v1081_v4  ;;  %v1472_v8 = vadd.f32 %v2782_v35, %v1471_v5  ;;  %v343_v9 = vpop.f32.mrf.mxu0  ;;  %v693_v10 = vpop.f32.mrf.mxu1 }
 0x1b3   :  { %v344_v13 = vadd.f32 %v2782_v35, %v343_v9  ;;  %v694_v14 = vadd.f32 %v2782_v35, %v693_v10 }
 0x1b4   :  { %v1127_v11 = vmax.f32 %v1082_v7, 0.0  ;;  %v1517_v12 = vmax.f32 %v1472_v8, 0.0 }
 0x1b5   :  { %v388_v17 = vmax.f32 %v344_v13, 0.0  ;;  %v738_v18 = vmax.f32 %v694_v14, 0.0 }
 0x1b6   :  { %v1167_v15 = vmax.f32 %v777_v6, %v1127_v11 }
 0x1b7   :  { %v778_v27 = vmax.f32 %v388_v17, %v738_v18 }
 0x1b8   :  { %v1557_v16 = vmax.f32 %v1167_v15, %v1517_v12 }
 0x1b9   :  { %v1083_v19 = vpop.f32.mrf.mxu2  ;;  %v1473_v20 = vpop.f32.mrf.mxu3 }
 0x1ba   :  { %1598 = vst.msk [vmem:[%s2902_s3 + $0x120] sm:$0xff] %vm1561_vm3, %v1557_v16  ;;  %v1084_v21 = vadd.f32 %v2782_v35, %v1083_v19  ;;  %v1474_v22 = vadd.f32 %v2782_v35, %v1473_v20  ;;  %v346_v23 = vpop.f32.mrf.mxu0  ;;  %v696_v24 = vpop.f32.mrf.mxu1 }
 0x1bb   :  { %v347_v25 = vadd.f32 %v2782_v35, %v346_v23  ;;  %v697_v26 = vadd.f32 %v2782_v35, %v696_v24 }
 0x1bc   :  { %v1128_v28 = vmax.f32 %v1084_v21, 0.0  ;;  %v1518_v30 = vmax.f32 %v1474_v22, 0.0 }
 0x1bd   :  { %v389_v31 = vmax.f32 %v347_v25, 0.0  ;;  %v739_v32 = vmax.f32 %v697_v26, 0.0 }
 0x1be   :  { %v1168_v29 = vmax.f32 %v778_v27, %v1128_v28 }
 0x1bf   :  { %v779_v37 = vmax.f32 %v389_v31, %v739_v32 }
 0x1c0   :  { %v1558_v33 = vmax.f32 %v1168_v29, %v1518_v30 }
 0x1c1   :  { %v1086_v34 = vpop.f32.mrf.mxu2  ;;  %v1476_v36 = vpop.f32.mrf.mxu3 }
 0x1c2   :  { %1599 = vst.msk [vmem:[%s2902_s3 + $0x128] sm:$0xff] %vm1561_vm3, %v1558_v33  ;;  %v1087_v38 = vadd.f32 %v2782_v35, %v1086_v34  ;;  %v1477_v39 = vadd.f32 %v2782_v35, %v1476_v36  ;;  %v348_v41 = vpop.f32.mrf.mxu0  ;;  %v698_v42 = vpop.f32.mrf.mxu1 }
 0x1c3   :  { %v349_v45 = vadd.f32 %v2782_v35, %v348_v41  ;;  %v699_v46 = vadd.f32 %v2782_v35, %v698_v42 }
 0x1c4   :  { %v1129_v43 = vmax.f32 %v1087_v38, 0.0  ;;  %v1519_v44 = vmax.f32 %v1477_v39, 0.0 }
 0x1c5   :  { %v390_v48 = vmax.f32 %v349_v45, 0.0  ;;  %v740_v49 = vmax.f32 %v699_v46, 0.0 }
 0x1c6   :  { %v1169_v40 = vmax.f32 %v779_v37, %v1129_v43 }
 0x1c7   :  { %v780_v54 = vmax.f32 %v390_v48, %v740_v49 }
 0x1c8   :  { %v1559_v47 = vmax.f32 %v1169_v40, %v1519_v44 }
 0x1c9   :  { %v1088_v50 = vpop.f32.mrf.mxu2  ;;  %v1478_v51 = vpop.f32.mrf.mxu3 }
 0x1ca   :  { %1600 = vst.msk [vmem:[%s2902_s3 + $0x130] sm:$0xff] %vm1561_vm3, %v1559_v47  ;;  %v1089_v52 = vadd.f32 %v2782_v35, %v1088_v50  ;;  %v1479_v53 = vadd.f32 %v2782_v35, %v1478_v51 }
 0x1cc   :  { %v1130_v55 = vmax.f32 %v1089_v52, 0.0  ;;  %v1520_v57 = vmax.f32 %v1479_v53, 0.0 }
 0x1ce   :  { %v1170_v56 = vmax.f32 %v780_v54, %v1130_v55 }
 0x1d0   :  { %v1560_v58 = vmax.f32 %v1170_v56, %v1520_v57 }
 0x1d2   :  { %1601 = vst.msk [vmem:[%s2902_s3 + $0x138] sm:$0xff] %vm1561_vm3, %v1560_v58 }

// kernel: _lambda_.5
= control target key start
LH: loop header
LB: loop body
LE: loop exit
PB: predicated region body
PF: predicated region fallthrough
CT: control target
= control target key end

     0   :  { %vm242_vm0 = vcmask 130048   ;;  %vm565_vm1 = vcmask 261120   ;;  %s1148_s1 = inlined_call_operand.vmem [shape: bf16[400,32], index: 1, kind: input, shape index: {}]   ;;  %s1149_s0 = inlined_call_operand.vmem [shape: bf16[4,16,400], index: 0, kind: input, shape index: {}]   ;;  %s1150_s2 = inlined_call_operand.vmem [shape: f32[1,32], index: 2, kind: input, shape index: {}]   ;;  %s1151_s3 = inlined_call_operand.vmem [shape: f32[16,32], index: 3, kind: output, shape index: {}]  }
   0x1   :  { %v817_v0 = vld [vmem:[%s1148_s1 + $0x38] sm:$0xff]  ;;  %v827_v2 = vld [vmem:[%s1148_s1 + $0xc0] sm:$0xff]  ;;  %v839_v4 = vld [vmem:[%s1148_s1 + $0x30] sm:$0xff] }
   0x2   :  { %v822_v1 = vld [vmem:[%s1148_s1 + $0xb8] sm:$0xff]  ;;  %246 = vmatpush.bf16.msra.mxu0 %v817_v0  ;;  %v844_v5 = vld [vmem:[%s1148_s1 + $0xb0] sm:$0xff]  ;;  %295 = vmatpush.bf16.msra.mxu3 %v827_v2  ;;  %v859_v7 = vld [vmem:[%s1148_s1 + $0x28] sm:$0xff] }
   0x3   :  { %v832_v3 = vld [vmem:[%s1148_s1 + $0x78] sm:$0xff]  ;;  %274 = vmatpush.bf16.msra.mxu2 %v822_v1  ;;  %v851_v6 = vld [vmem:[%s1148_s1 + $0x70] sm:$0xff]  ;;  %v864_v8 = vld [vmem:[%s1148_s1 + $0xa8] sm:$0xff] }
   0x4   :  { %260 = vmatpush.bf16.msra.mxu1 %v832_v3  ;;  %v870_v9 = vld [vmem:[%s1148_s1 + $0x68] sm:$0xff]  ;;  %v584_v11 = vld [vmem:[%s1149_s0 + $0x18] sm:$0xf0]  ;;  %v884_v13 = vld [vmem:[%s1148_s1 + $0x20] sm:$0xff] }
   0x5   :  { %v778_v10 = vld [vmem:[%s1149_s0 + $0xc] sm:$0xf]  ;;  %v889_v14 = vld [vmem:[%s1148_s1 + $0xa0] sm:$0xff]  ;;  %v904_v16 = vld [vmem:[%s1148_s1 + $0x18] sm:$0xff] }
   0x6   :  { %331 = vmatpush.bf16.msrb.mxu3 %v817_v0  ;;  %247 = vmatpush.bf16.msra.mxu0 %v839_v4  ;;  %v587_v12 = vor.u32 %v778_v10, %v584_v11  ;;  %v895_v15 = vld [vmem:[%s1148_s1 + $0x60] sm:$0xff]  ;;  %v909_v17 = vld [vmem:[%s1148_s1 + $0x98] sm:$0xff]  ;;  %v923_v19 = vld [vmem:[%s1148_s1 + $0x10] sm:$0xff] }
   0x7   :  { %275 = vmatpush.bf16.msra.mxu2 %v844_v5  ;;  %v915_v18 = vld [vmem:[%s1148_s1 + $0x58] sm:$0xff]  ;;  %v928_v20 = vld [vmem:[%s1148_s1 + $0x90] sm:$0xff]  ;;  %v942_v22 = vld [vmem:[%s1148_s1 + $0x8] sm:$0xff] }
   0x8   :  { %261 = vmatpush.bf16.msra.mxu1 %v851_v6  ;;  %688 = vmatmul.msk.bf16.vlgmr.msra.gmra.mxu3 %vm242_vm0, %v587_v12  ;;  %v934_v21 = vld [vmem:[%s1148_s1 + $0x50] sm:$0xff]  ;;  %v947_v23 = vld [vmem:[%s1148_s1 + $0x88] sm:$0xff]  ;;  %v959_v25 = vld [vmem:[%s1148_s1] sm:$0xff] }
   0x9   :  { %v953_v24 = vld [vmem:[%s1148_s1 + $0x48] sm:$0xff]  ;;  %v966_v26 = vld [vmem:[%s1148_s1 + $0x80] sm:$0xff]  ;;  %v780_v28 = vld [vmem:[%s1149_s0 + $0x14] sm:$0xf0] }
   0xa   :  { %332 = vmatpush.bf16.msrb.mxu3 %v839_v4  ;;  %248 = vmatpush.bf16.msra.mxu0 %v859_v7  ;;  %v582_v27 = vld [vmem:[%s1149_s0 + $0x8] sm:$0xf]  ;;  %v978_v29 = vld [vmem:[%s1148_s1 + $0x40] sm:$0xff]  ;;  %v779_v31 = vld [vmem:[%s1149_s0 + $0xc] sm:$0xf0] }
   0xb   :  { %276 = vmatpush.bf16.msra.mxu2 %v864_v8  ;;  %v574_v30 = vld [vmem:[%s1149_s0] sm:$0xf]  ;;  %v583_v32 = vor.u32 %v780_v28, %v582_v27  ;;  %v783_v34 = vld [vmem:[%s1149_s0 + $0x2c] sm:$0xf0]  ;;  %v777_v36 = vld [vmem:[%s1149_s0 + $0x4] sm:$0xf] }
   0xc   :  { %262 = vmatpush.bf16.msra.mxu1 %v870_v9  ;;  %v695_v33 = vld [vmem:[%s1149_s0 + $0x20] sm:$0xf]  ;;  %v575_v35 = vor.u32 %v779_v31, %v574_v30  ;;  %v576_v37 = vld [vmem:[%s1149_s0 + $0x10] sm:$0xf0]  ;;  %v782_v40 = vld [vmem:[%s1149_s0 + $0x2c] sm:$0xf] }
   0xd   :  { %v696_v38 = vor.u32 %v783_v34, %v695_v33  ;;  %v579_v39 = vor.u32 %v777_v36, %v576_v37  ;;  %v705_v41 = vld [vmem:[%s1149_s0 + $0x38] sm:$0xf0]  ;;  %v781_v43 = vld [vmem:[%s1149_s0 + $0x24] sm:$0xf]  ;;  %v697_v44 = vld [vmem:[%s1149_s0 + $0x30] sm:$0xf0] }
   0xe   :  { %333 = vmatpush.bf16.msrb.mxu3 %v859_v7  ;;  %249 = vmatpush.bf16.msra.mxu0 %v884_v13  ;;  %v708_v42 = vor.u32 %v782_v40, %v705_v41  ;;  %v703_v45 = vld [vmem:[%s1149_s0 + $0x28] sm:$0xf]  ;;  %v784_v46 = vld [vmem:[%s1149_s0 + $0x34] sm:$0xf0]  ;;  %v700_v47 = vor.u32 %v781_v43, %v697_v44  ;;  %v716_v48 = vld [vmem:[%s1149_s0 + $0x40] sm:$0xf] }
   0xf   :  { %277 = vmatpush.bf16.msra.mxu2 %v889_v14  ;;  %v787_v49 = vld [vmem:[%s1149_s0 + $0x4c] sm:$0xf0]  ;;  %v704_v50 = vor.u32 %v784_v46, %v703_v45  ;;  %v785_v51 = vld [vmem:[%s1149_s0 + $0x44] sm:$0xf]  ;;  %v718_v52 = vld [vmem:[%s1149_s0 + $0x50] sm:$0xf0] }
  0x10   :  { %263 = vmatpush.bf16.msra.mxu1 %v895_v15  ;;  %v717_v53 = vor.u32 %v787_v49, %v716_v48  ;;  %v721_v54 = vor.u32 %v785_v51, %v718_v52  ;;  %v786_v55 = vld [vmem:[%s1149_s0 + $0x4c] sm:$0xf]  ;;  %v726_v56 = vld [vmem:[%s1149_s0 + $0x58] sm:$0xf0]  ;;  %v724_v58 = vld [vmem:[%s1149_s0 + $0x48] sm:$0xf] }
  0x11   :  { %v729_v57 = vor.u32 %v786_v55, %v726_v56  ;;  %v788_v59 = vld [vmem:[%s1149_s0 + $0x54] sm:$0xf0]  ;;  %v737_v60 = vld [vmem:[%s1149_s0 + $0x60] sm:$0xf]  ;;  %v791_v61 = vld [vmem:[%s1149_s0 + $0x6c] sm:$0xf0] }
  0x12   :  { %334 = vmatpush.bf16.msrb.mxu3 %v884_v13  ;;  %250 = vmatpush.bf16.msra.mxu0 %v904_v16  ;;  %v725_v62 = vor.u32 %v788_v59, %v724_v58  ;;  %v745_v63 = vld [vmem:[%s1149_s0 + $0x68] sm:$0xf]  ;;  %v793_v28 = vld [vmem:[%s1150_s2] ss:$0 sm:$0xff] }
  0x13   :  { %278 = vmatpush.bf16.msra.mxu2 %v909_v17 }
  0x14   :  { %264 = vmatpush.bf16.msra.mxu1 %v915_v18 }
  0x16   :  { %335 = vmatpush.bf16.msrb.mxu3 %v904_v16  ;;  %251 = vmatpush.bf16.msra.mxu0 %v923_v19 }
  0x17   :  { %279 = vmatpush.bf16.msra.mxu2 %v928_v20 }
  0x18   :  { %265 = vmatpush.bf16.msra.mxu1 %v934_v21 }
  0x1a   :  { %336 = vmatpush.bf16.msrb.mxu3 %v923_v19  ;;  %252 = vmatpush.bf16.msra.mxu0 %v942_v22 }
  0x1b   :  { %280 = vmatpush.bf16.msra.mxu2 %v947_v23 }
  0x1c   :  { %266 = vmatpush.bf16.msra.mxu1 %v953_v24 }
  0x1e   :  { %337 = vmatpush.bf16.msrb.mxu3 %v942_v22  ;;  %253 = vmatpush.bf16.msra.mxu0 %v959_v25 }
  0x1f   :  { %281 = vmatpush.bf16.msra.mxu2 %v966_v26 }
  0x20   :  { %267 = vmatpush.bf16.msra.mxu1 %v978_v29 }
  0x21   :  { %254 = vmatmul.bf16.vlgmr.msra.gmra.mxu0 %v575_v35 }
  0x22   :  { %345 = vmatpush.bf16.msrb.mxu0 %v832_v3  ;;  %338 = vmatpush.bf16.msrb.mxu3 %v959_v25 }
  0x23   :  { %282 = vmatmul.bf16.vlgmr.msra.gmra.mxu2 %v583_v32  ;;  %268 = vmatmul.bf16.vlgmr.msra.gmra.mxu1 %v579_v39 }
  0x24   :  { %359 = vmatpush.bf16.msrb.mxu1 %v822_v1  ;;  %380 = vmatpush.bf16.msrb.mxu2 %v827_v2 }
  0x25   :  { %339 = vmatmul.bf16.vlgmr.msrb.gmra.mxu3 %v696_v38 }
  0x26   :  { %418 = vmatpush.bf16.msra.mxu3 %v817_v0  ;;  %346 = vmatpush.bf16.msrb.mxu0 %v851_v6 }
  0x28   :  { %432 = vmatpush.bf16.msra.mxu2 %v832_v3  ;;  %360 = vmatpush.bf16.msrb.mxu1 %v844_v5 }
  0x2a   :  { %419 = vmatpush.bf16.msra.mxu3 %v839_v4  ;;  %347 = vmatpush.bf16.msrb.mxu0 %v870_v9 }
  0x2c   :  { %433 = vmatpush.bf16.msra.mxu2 %v851_v6  ;;  %361 = vmatpush.bf16.msrb.mxu1 %v864_v8 }
  0x2e   :  { %420 = vmatpush.bf16.msra.mxu3 %v859_v7  ;;  %348 = vmatpush.bf16.msrb.mxu0 %v895_v15 }
  0x30   :  { %434 = vmatpush.bf16.msra.mxu2 %v870_v9  ;;  %362 = vmatpush.bf16.msrb.mxu1 %v889_v14 }
  0x32   :  { %421 = vmatpush.bf16.msra.mxu3 %v884_v13  ;;  %349 = vmatpush.bf16.msrb.mxu0 %v915_v18 }
  0x33   :  { %709 = vmatmul.msk.bf16.vlgmr.msrb.gmra.mxu2 %vm242_vm0, %v708_v42 }
  0x34   :  { %435 = vmatpush.bf16.msra.mxu2 %v895_v15  ;;  %363 = vmatpush.bf16.msrb.mxu1 %v909_v17 }
  0x36   :  { %422 = vmatpush.bf16.msra.mxu3 %v904_v16  ;;  %350 = vmatpush.bf16.msrb.mxu0 %v934_v21 }
  0x38   :  { %436 = vmatpush.bf16.msra.mxu2 %v915_v18  ;;  %364 = vmatpush.bf16.msrb.mxu1 %v928_v20 }
  0x3a   :  { %423 = vmatpush.bf16.msra.mxu3 %v923_v19  ;;  %351 = vmatpush.bf16.msrb.mxu0 %v953_v24 }
  0x3c   :  { %437 = vmatpush.bf16.msra.mxu2 %v934_v21  ;;  %365 = vmatpush.bf16.msrb.mxu1 %v947_v23 }
  0x3e   :  { %424 = vmatpush.bf16.msra.mxu3 %v942_v22  ;;  %352 = vmatpush.bf16.msrb.mxu0 %v978_v29 }
  0x40   :  { %438 = vmatpush.bf16.msra.mxu2 %v953_v24  ;;  %366 = vmatpush.bf16.msrb.mxu1 %v966_v26 }
  0x41   :  { %353 = vmatmul.bf16.vlgmr.msrb.gmra.mxu0 %v700_v47 }
  0x42   :  { %446 = vmatpush.bf16.msra.mxu0 %v822_v1  ;;  %425 = vmatpush.bf16.msra.mxu3 %v959_v25 }
  0x43   :  { %367 = vmatmul.bf16.vlgmr.msrb.gmra.mxu1 %v704_v50 }
  0x44   :  { %467 = vmatpush.bf16.msra.mxu1 %v827_v2  ;;  %439 = vmatpush.bf16.msra.mxu2 %v978_v29 }
  0x45   :  { %426 = vmatmul.bf16.vlgmr.msra.gmra.mxu3 %v717_v53 }
  0x46   :  { %505 = vmatpush.bf16.msrb.mxu3 %v817_v0  ;;  %447 = vmatpush.bf16.msra.mxu0 %v844_v5  ;;  %v792_v0 = vld [vmem:[%s1149_s0 + $0x74] sm:$0xf0] }
  0x47   :  { %440 = vmatmul.bf16.vlgmr.msra.gmra.mxu2 %v721_v54 }
  0x48   :  { %533 = vmatpush.bf16.msrb.mxu2 %v822_v1  ;;  %519 = vmatpush.bf16.msrb.mxu1 %v832_v3  ;;  %v738_v1 = vor.u32 %v791_v61, %v737_v60  ;;  %v789_v3 = vld [vmem:[%s1149_s0 + $0x64] sm:$0xf] }
  0x4a   :  { %506 = vmatpush.bf16.msrb.mxu3 %v839_v4  ;;  %448 = vmatpush.bf16.msra.mxu0 %v864_v8  ;;  %v739_v4 = vld [vmem:[%s1149_s0 + $0x70] sm:$0xf0] }
  0x4c   :  { %534 = vmatpush.bf16.msrb.mxu2 %v844_v5  ;;  %520 = vmatpush.bf16.msrb.mxu1 %v851_v6  ;;  %v746_v5 = vor.u32 %v792_v0, %v745_v63  ;;  %v742_v6 = vor.u32 %v789_v3, %v739_v4 }
  0x4e   :  { %507 = vmatpush.bf16.msrb.mxu3 %v859_v7  ;;  %449 = vmatpush.bf16.msra.mxu0 %v889_v14  ;;  %v747_v7 = vld [vmem:[%s1149_s0 + $0x78] sm:$0xf0] }
  0x50   :  { %535 = vmatpush.bf16.msrb.mxu2 %v864_v8  ;;  %521 = vmatpush.bf16.msrb.mxu1 %v870_v9 }
  0x52   :  { %508 = vmatpush.bf16.msrb.mxu3 %v884_v13  ;;  %450 = vmatpush.bf16.msra.mxu0 %v909_v17 }
  0x53   :  { %730 = vmatmul.msk.bf16.vlgmr.msra.gmra.mxu1 %vm242_vm0, %v729_v57 }
  0x54   :  { %536 = vmatpush.bf16.msrb.mxu2 %v889_v14  ;;  %522 = vmatpush.bf16.msrb.mxu1 %v895_v15 }
  0x56   :  { %509 = vmatpush.bf16.msrb.mxu3 %v904_v16  ;;  %451 = vmatpush.bf16.msra.mxu0 %v928_v20 }
  0x58   :  { %537 = vmatpush.bf16.msrb.mxu2 %v909_v17  ;;  %523 = vmatpush.bf16.msrb.mxu1 %v915_v18 }
  0x5a   :  { %510 = vmatpush.bf16.msrb.mxu3 %v923_v19  ;;  %452 = vmatpush.bf16.msra.mxu0 %v947_v23 }
  0x5c   :  { %538 = vmatpush.bf16.msrb.mxu2 %v928_v20  ;;  %524 = vmatpush.bf16.msrb.mxu1 %v934_v21 }
  0x5e   :  { %511 = vmatpush.bf16.msrb.mxu3 %v942_v22  ;;  %453 = vmatpush.bf16.msra.mxu0 %v966_v26 }
  0x60   :  { %539 = vmatpush.bf16.msrb.mxu2 %v947_v23  ;;  %525 = vmatpush.bf16.msrb.mxu1 %v953_v24 }
  0x61   :  { %454 = vmatmul.bf16.vlgmr.msra.gmra.mxu0 %v725_v62 }
  0x62   :  { %554 = vmatpush.bf16.msrb.mxu0 %v827_v2  ;;  %512 = vmatpush.bf16.msrb.mxu3 %v959_v25  ;;  %v790_v2 = vld [vmem:[%s1149_s0 + $0x6c] sm:$0xf] }
  0x63   :  { %v750_v8 = vor.u32 %v790_v2, %v747_v7 }
  0x64   :  { %540 = vmatpush.bf16.msrb.mxu2 %v966_v26  ;;  %526 = vmatpush.bf16.msrb.mxu1 %v978_v29 }
  0x65   :  { %513 = vmatmul.bf16.vlgmr.msrb.gmra.mxu3 %v738_v1 }
  0x67   :  { %541 = vmatmul.bf16.vlgmr.msrb.gmra.mxu2 %v746_v5  ;;  %527 = vmatmul.bf16.vlgmr.msrb.gmra.mxu1 %v742_v6 }
  0x71   :  { %751 = vmatmul.msk.bf16.vlgmr.msrb.gmra.mxu0 %vm242_vm0, %v750_v8 }
  0x8b   :  { %v297_v9 = vpop.f32.mrf.mxu3 }
  0x93   :  { %v299_v12 = vpop.f32.mrf.mxu3 }
  0x9e   :  { %v255_v13 = vpop.f32.mrf.mxu0 }
  0x9f   :  { %v256_v31 = vadd.f32 %v793_v28, %v255_v13 }
  0xa0   :  { %v269_v10 = vpop.f32.mrf.mxu1 }
  0xa1   :  { %v270_v36 = vadd.f32 %v269_v10, %v256_v31 }
  0xa6   :  { %v283_v11 = vpop.f32.mrf.mxu2  ;;  %v257_v18 = vpop.f32.mrf.mxu0 }
  0xa7   :  { %v258_v41 = vadd.f32 %v793_v28, %v257_v18  ;;  %v284_v42 = vadd.f32 %v283_v11, %v270_v36 }
  0xa8   :  { %v271_v14 = vpop.f32.mrf.mxu1  ;;  %v340_v16 = vpop.f32.mrf.mxu3 }
  0xa9   :  { %v341_v29 = vadd.f32 %v793_v28, %v340_v16  ;;  %v272_v51 = vadd.f32 %v271_v14, %v258_v41  ;;  %v298_v52 = vadd.f32 %v297_v9, %v284_v42 }
  0xab   :  { %v302_v61 = vmax.f32 %v298_v52, 0.0 }
  0xae   :  { %v285_v15 = vpop.f32.mrf.mxu2 }
  0xaf   :  { %v286_v60 = vadd.f32 %v285_v15, %v272_v51 }
  0xb0   :  { %v342_v20 = vpop.f32.mrf.mxu3 }
  0xb1   :  { %v343_v39 = vadd.f32 %v793_v28, %v342_v20  ;;  %v300_v2 = vadd.f32 %v299_v12, %v286_v60 }
  0xb3   :  { %v303_v15 = vmax.f32 %v300_v2, 0.0 }
  0xb6   :  { %v382_v19 = vpop.f32.mrf.mxu2 }
  0xbe   :  { %v354_v22 = vpop.f32.mrf.mxu0  ;;  %v384_v23 = vpop.f32.mrf.mxu2 }
  0xbf   :  { %v355_v34 = vadd.f32 %v354_v22, %v341_v29 }
  0xc0   :  { %v368_v17 = vpop.f32.mrf.mxu1 }
  0xc1   :  { %v369_v38 = vadd.f32 %v368_v17, %v355_v34 }
  0xc3   :  { %v383_v47 = vadd.f32 %v382_v19, %v369_v38 }
  0xc5   :  { %v387_v56 = vmax.f32 %v383_v47, 0.0 }
  0xc6   :  { %v356_v26 = vpop.f32.mrf.mxu0 }
  0xc7   :  { %v357_v48 = vadd.f32 %v356_v26, %v343_v39  ;;  %v389_v3 = vmax.f32 %v302_v61, %v387_v56 }
  0xc8   :  { %v370_v21 = vpop.f32.mrf.mxu1  ;;  %v427_v25 = vpop.f32.mrf.mxu3 }
  0xc9   :  { %v428_v35 = vadd.f32 %v793_v28, %v427_v25  ;;  %v371_v57 = vadd.f32 %v370_v21, %v357_v48 }
  0xca   :  { %v441_v27 = vpop.f32.mrf.mxu2 }
  0xcb   :  { %v442_v40 = vadd.f32 %v441_v27, %v428_v35  ;;  %v385_v4 = vadd.f32 %v384_v23, %v371_v57 }
  0xcd   :  { %v388_v13 = vmax.f32 %v385_v4, 0.0 }
  0xcf   :  { %v390_v20 = vmax.f32 %v303_v15, %v388_v13 }
  0xd0   :  { %v469_v24 = vpop.f32.mrf.mxu1  ;;  %v429_v32 = vpop.f32.mrf.mxu3 }
  0xd1   :  { %v430_v49 = vadd.f32 %v793_v28, %v429_v32 }
  0xd2   :  { %v443_v37 = vpop.f32.mrf.mxu2 }
  0xd3   :  { %v444_v58 = vadd.f32 %v443_v37, %v430_v49 }
  0xd8   :  { %v471_v30 = vpop.f32.mrf.mxu1 }
  0xde   :  { %v455_v33 = vpop.f32.mrf.mxu0 }
  0xdf   :  { %v456_v43 = vadd.f32 %v455_v33, %v442_v40 }
  0xe1   :  { %v470_v53 = vadd.f32 %v469_v24, %v456_v43 }
  0xe3   :  { %v474_v62 = vmax.f32 %v470_v53, 0.0 }
  0xe4   :  { %v528_v44 = vpop.f32.mrf.mxu1 }
  0xe5   :  { %v476_v9 = vmax.f32 %v389_v3, %v474_v62 }
  0xe6   :  { %v457_v46 = vpop.f32.mrf.mxu0 }
  0xe7   :  { %v458_v63 = vadd.f32 %v457_v46, %v444_v58 }
  0xe8   :  { %v514_v45 = vpop.f32.mrf.mxu3 }
  0xe9   :  { %v515_v50 = vadd.f32 %v793_v28, %v514_v45  ;;  %v472_v8 = vadd.f32 %v471_v30, %v458_v63 }
  0xea   :  { %v542_v55 = vpop.f32.mrf.mxu2 }
  0xeb   :  { %v529_v54 = vadd.f32 %v528_v44, %v515_v50  ;;  %v475_v17 = vmax.f32 %v472_v8, 0.0 }
  0xec   :  { %v530_v7 = vpop.f32.mrf.mxu1 }
  0xed   :  { %v543_v59 = vadd.f32 %v542_v55, %v529_v54  ;;  %v477_v12 = vmax.f32 %v390_v20, %v475_v17 }
  0xee   :  { %v556_v1 = vpop.f32.mrf.mxu0 }
  0xef   :  { %v557_v6 = vadd.f32 %v556_v1, %v543_v59 }
  0xf0   :  { %v516_v0 = vpop.f32.mrf.mxu3 }
  0xf1   :  { %v517_v5 = vadd.f32 %v793_v28, %v516_v0  ;;  %v561_v10 = vmax.f32 %v557_v6, 0.0 }
  0xf2   :  { %v544_v16 = vpop.f32.mrf.mxu2 }
  0xf3   :  { %v531_v11 = vadd.f32 %v530_v7, %v517_v5  ;;  %v563_v14 = vmax.f32 %v476_v9, %v561_v10 }
  0xf5   :  { %566 = vst.msk [vmem:[%s1151_s3] sm:$0xff] %vm565_vm1, %v563_v14  ;;  %v545_v18 = vadd.f32 %v544_v16, %v531_v11 }
  0xf6   :  { %v558_v19 = vpop.f32.mrf.mxu0 }
  0xf7   :  { %v559_v21 = vadd.f32 %v558_v19, %v545_v18 }
  0xf9   :  { %v562_v22 = vmax.f32 %v559_v21, 0.0 }
  0xfb   :  { %v564_v23 = vmax.f32 %v477_v12, %v562_v22 }
  0xfd   :  { %567 = vst.msk [vmem:[%s1151_s3 + $0x8] sm:$0xff] %vm565_vm1, %v564_v23 }

// kernel: _lambda_.6
= control target key start
LH: loop header
LB: loop body
LE: loop exit
PB: predicated region body
PF: predicated region fallthrough
CT: control target
= control target key end

     0   :  { %vm171_vm0 = vcmask 261120   ;;  %vm370_vm1 = vcmask 519168   ;;  %s666_s1 = inlined_call_operand.vmem [shape: bf16[288,64], index: 1, kind: input, shape index: {}]   ;;  %s667_s0 = inlined_call_operand.vmem [shape: bf16[4,4,288], index: 0, kind: input, shape index: {}]   ;;  %s668_s2 = inlined_call_operand.vmem [shape: f32[1,64], index: 2, kind: input, shape index: {}]   ;;  %s669_s3 = inlined_call_operand.vmem [shape: f32[4,64], index: 3, kind: output, shape index: {}]  }
   0x1   :  { %v497_v0 = vld [vmem:[%s666_s1 + $0x38] sm:$0xff]  ;;  %v507_v2 = vld [vmem:[%s666_s1 + $0x88] sm:$0xff]  ;;  %v514_v3 = vld [vmem:[%s666_s1 + $0x30] sm:$0xff] }
   0x2   :  { %v502_v1 = vld [vmem:[%s666_s1 + $0x78] sm:$0xff]  ;;  %174 = vmatpush.bf16.msra.mxu0 %v497_v0  ;;  %v519_v4 = vld [vmem:[%s666_s1 + $0x70] sm:$0xff]  ;;  %206 = vmatpush.bf16.msra.mxu3 %v507_v2  ;;  %v526_v5 = vld [vmem:[%s666_s1 + $0x80] sm:$0xff] }
   0x3   :  { %187 = vmatpush.bf16.msra.mxu1 %v502_v1  ;;  %238 = vmatpush.bf16.msra.mxu2 %v502_v1  ;;  %v52_v6 = vld [vmem:[%s667_s0] sm:$0x3f]  ;;  %v536_v7 = vld [vmem:[%s666_s1 + $0x28] sm:$0xff]  ;;  %v569_v15 = vld [vmem:[%s666_s1 + $0x18] sm:$0xff] }
   0x4   :  { %57 = vst [vmem:[#allocation1] ss:$4 sm:$0xff] %v52_v6  ;;  %v541_v8 = vld [vmem:[%s666_s1 + $0x68] sm:$0xff]  ;;  %v551_v9 = vld [vmem:[%s666_s1 + $0x20] sm:$0xff]  ;;  %v574_v16 = vld [vmem:[%s666_s1 + $0x58] sm:$0xff] }
   0x5   :  { %v556_v10 = vld [vmem:[%s666_s1 + $0x60] sm:$0xff]  ;;  %v583_v17 = vld [vmem:[%s666_s1 + $0x10] sm:$0xff]  ;;  %v598_v20 = vld [vmem:[%s666_s1 + $0x8] sm:$0xff] }
   0x6   :  { %175 = vmatpush.bf16.msra.mxu0 %v514_v3  ;;  %207 = vmatpush.bf16.msra.mxu3 %v526_v5  ;;  %v449_v11 = vld [vmem:[%s667_s0 + $0x6] sm:$0x3f]  ;;  %v588_v18 = vld [vmem:[%s666_s1 + $0x50] sm:$0xff]  ;;  %v473_v47 = vld [vmem:[%s668_s2] ss:$0 sm:$0xff] }
   0x7   :  { %188 = vmatpush.bf16.msra.mxu1 %v519_v4  ;;  %239 = vmatpush.bf16.msra.mxu2 %v519_v4  ;;  %v451_v19 = vld [vmem:[%s667_s0 + $0xc] sm:$0x3f]  ;;  %v455_v25 = vld [vmem:[%s666_s1] sm:$0xff]  ;;  %v453_v27 = vld [vmem:[%s667_s0 + $0x12] sm:$0x3f] }
   0x8   :  { %v603_v21 = vld [vmem:[%s666_s1 + $0x48] sm:$0xff]  ;;  %v463_v26 = vld [vmem:[%s666_s1 + $0x40] sm:$0xff] }
   0xa   :  { %225 = vmatpush.bf16.msrb.mxu3 %v497_v0  ;;  %176 = vmatpush.bf16.msra.mxu0 %v536_v7 }
   0xb   :  { %189 = vmatpush.bf16.msra.mxu1 %v541_v8  ;;  %240 = vmatpush.bf16.msra.mxu2 %v541_v8  ;;  %v60_v12 = vld.sshfl [vmem:[#allocation1 + $0x10] sm:$0xff pattern:$0x73625140]  ;;  %v58_v13 = vld.sshfl [vmem:[#allocation1] sm:$0xff pattern:$0x73625140] }
   0xc   :  { %448 = vmatmul.msk.bf16.vlgmr.msra.gmra.mxu3 %vm171_vm0, %v60_v12  ;;  %v59_v14 = vld.sshfl [vmem:[#allocation1 + $0x8] sm:$0xff pattern:$0x73625140] }
   0xd   :  { %217 = vst [vmem:[#allocation1] ss:$4 sm:$0xff] %v449_v11 }
   0xe   :  { %226 = vmatpush.bf16.msrb.mxu3 %v514_v3  ;;  %177 = vmatpush.bf16.msra.mxu0 %v551_v9 }
   0xf   :  { %190 = vmatpush.bf16.msra.mxu1 %v556_v10  ;;  %241 = vmatpush.bf16.msra.mxu2 %v556_v10 }
  0x12   :  { %227 = vmatpush.bf16.msrb.mxu3 %v536_v7  ;;  %178 = vmatpush.bf16.msra.mxu0 %v569_v15 }
  0x13   :  { %191 = vmatpush.bf16.msra.mxu1 %v574_v16  ;;  %242 = vmatpush.bf16.msra.mxu2 %v574_v16 }
  0x14   :  { %v219_v22 = vld.sshfl [vmem:[#allocation1 + $0x8] sm:$0xff pattern:$0x73625140]  ;;  %v218_v23 = vld.sshfl [vmem:[#allocation1] sm:$0xff pattern:$0x73625140] }
  0x15   :  { %v220_v24 = vld.sshfl [vmem:[#allocation1 + $0x10] sm:$0xff pattern:$0x73625140] }
  0x16   :  { %228 = vmatpush.bf16.msrb.mxu3 %v551_v9  ;;  %179 = vmatpush.bf16.msra.mxu0 %v583_v17  ;;  %269 = vst [vmem:[#allocation1] ss:$4 sm:$0xff] %v451_v19 }
  0x17   :  { %192 = vmatpush.bf16.msra.mxu1 %v588_v18  ;;  %243 = vmatpush.bf16.msra.mxu2 %v588_v18 }
  0x1a   :  { %229 = vmatpush.bf16.msrb.mxu3 %v569_v15  ;;  %180 = vmatpush.bf16.msra.mxu0 %v598_v20 }
  0x1b   :  { %193 = vmatpush.bf16.msra.mxu1 %v603_v21  ;;  %244 = vmatpush.bf16.msra.mxu2 %v603_v21 }
  0x1d   :  { %v270_v28 = vld.sshfl [vmem:[#allocation1] sm:$0xff pattern:$0x73625140]  ;;  %v272_v29 = vld.sshfl [vmem:[#allocation1 + $0x10] sm:$0xff pattern:$0x73625140] }
  0x1e   :  { %230 = vmatpush.bf16.msrb.mxu3 %v583_v17  ;;  %181 = vmatpush.bf16.msra.mxu0 %v455_v25  ;;  %v271_v30 = vld.sshfl [vmem:[#allocation1 + $0x8] sm:$0xff pattern:$0x73625140] }
  0x1f   :  { %194 = vmatpush.bf16.msra.mxu1 %v463_v26  ;;  %245 = vmatpush.bf16.msra.mxu2 %v463_v26  ;;  %321 = vst [vmem:[#allocation1] ss:$4 sm:$0xff] %v453_v27 }
  0x21   :  { %182 = vmatmul.bf16.vlgmr.msra.gmra.mxu0 %v58_v13 }
  0x22   :  { %257 = vmatpush.bf16.msrb.mxu0 %v507_v2  ;;  %231 = vmatpush.bf16.msrb.mxu3 %v598_v20 }
  0x23   :  { %277 = vmatpush.bf16.msrb.mxu1 %v497_v0  ;;  %309 = vmatpush.bf16.msrb.mxu2 %v507_v2 }
  0x24   :  { %246 = vmatmul.bf16.vlgmr.msra.gmra.mxu2 %v219_v22  ;;  %195 = vmatmul.bf16.vlgmr.msra.gmra.mxu1 %v59_v14 }
  0x26   :  { %258 = vmatpush.bf16.msrb.mxu0 %v526_v5  ;;  %232 = vmatpush.bf16.msrb.mxu3 %v455_v25  ;;  %v322_v31 = vld.sshfl [vmem:[#allocation1] sm:$0xff pattern:$0x73625140]  ;;  %v323_v32 = vld.sshfl [vmem:[#allocation1 + $0x8] sm:$0xff pattern:$0x73625140] }
  0x27   :  { %278 = vmatpush.bf16.msrb.mxu1 %v514_v3  ;;  %310 = vmatpush.bf16.msrb.mxu2 %v526_v5  ;;  %v324_v33 = vld.sshfl [vmem:[#allocation1 + $0x10] sm:$0xff pattern:$0x73625140] }
  0x29   :  { %233 = vmatmul.bf16.vlgmr.msrb.gmra.mxu3 %v218_v23 }
  0x2a   :  { %290 = vmatpush.bf16.msra.mxu3 %v502_v1  ;;  %329 = vmatpush.bf16.msra.mxu0 %v497_v0 }
  0x2b   :  { %342 = vmatpush.bf16.msra.mxu2 %v502_v1  ;;  %279 = vmatpush.bf16.msrb.mxu1 %v536_v7 }
  0x2e   :  { %291 = vmatpush.bf16.msra.mxu3 %v519_v4  ;;  %330 = vmatpush.bf16.msra.mxu0 %v514_v3 }
  0x2f   :  { %343 = vmatpush.bf16.msra.mxu2 %v519_v4  ;;  %280 = vmatpush.bf16.msrb.mxu1 %v551_v9 }
  0x31   :  { %450 = vmatmul.msk.bf16.vlgmr.msrb.gmra.mxu0 %vm171_vm0, %v220_v24 }
  0x32   :  { %292 = vmatpush.bf16.msra.mxu3 %v541_v8  ;;  %331 = vmatpush.bf16.msra.mxu0 %v536_v7 }
  0x33   :  { %344 = vmatpush.bf16.msra.mxu2 %v541_v8  ;;  %281 = vmatpush.bf16.msrb.mxu1 %v569_v15 }
  0x34   :  { %452 = vmatmul.msk.bf16.vlgmr.msrb.gmra.mxu2 %vm171_vm0, %v272_v29 }
  0x36   :  { %293 = vmatpush.bf16.msra.mxu3 %v556_v10  ;;  %332 = vmatpush.bf16.msra.mxu0 %v551_v9 }
  0x37   :  { %345 = vmatpush.bf16.msra.mxu2 %v556_v10  ;;  %282 = vmatpush.bf16.msrb.mxu1 %v583_v17 }
  0x3a   :  { %294 = vmatpush.bf16.msra.mxu3 %v574_v16  ;;  %333 = vmatpush.bf16.msra.mxu0 %v569_v15 }
  0x3b   :  { %346 = vmatpush.bf16.msra.mxu2 %v574_v16  ;;  %283 = vmatpush.bf16.msrb.mxu1 %v598_v20 }
  0x3e   :  { %295 = vmatpush.bf16.msra.mxu3 %v588_v18  ;;  %334 = vmatpush.bf16.msra.mxu0 %v583_v17 }
  0x3f   :  { %347 = vmatpush.bf16.msra.mxu2 %v588_v18  ;;  %284 = vmatpush.bf16.msrb.mxu1 %v455_v25 }
  0x42   :  { %296 = vmatpush.bf16.msra.mxu3 %v603_v21  ;;  %335 = vmatpush.bf16.msra.mxu0 %v598_v20 }
  0x43   :  { %361 = vmatpush.bf16.msra.mxu1 %v507_v2  ;;  %348 = vmatpush.bf16.msra.mxu2 %v603_v21 }
  0x44   :  { %285 = vmatmul.bf16.vlgmr.msrb.gmra.mxu1 %v270_v28 }
  0x46   :  { %297 = vmatpush.bf16.msra.mxu3 %v463_v26  ;;  %336 = vmatpush.bf16.msra.mxu0 %v455_v25 }
  0x47   :  { %362 = vmatpush.bf16.msra.mxu1 %v526_v5  ;;  %349 = vmatpush.bf16.msra.mxu2 %v463_v26 }
  0x49   :  { %298 = vmatmul.bf16.vlgmr.msra.gmra.mxu3 %v271_v30  ;;  %337 = vmatmul.bf16.vlgmr.msra.gmra.mxu0 %v322_v31 }
  0x4a   :  { %350 = vmatmul.bf16.vlgmr.msra.gmra.mxu2 %v323_v32 }
  0x54   :  { %454 = vmatmul.msk.bf16.vlgmr.msra.gmra.mxu1 %vm171_vm0, %v324_v33 }
  0x8f   :  { %v209_v34 = vpop.f32.mrf.mxu3 }
  0x97   :  { %v211_v35 = vpop.f32.mrf.mxu3 }
  0x9e   :  { %v183_v36 = vpop.f32.mrf.mxu0 }
  0x9f   :  { %v184_v50 = vadd.f32 %v473_v47, %v183_v36 }
  0xa1   :  { %v196_v37 = vpop.f32.mrf.mxu1 }
  0xa2   :  { %v197_v53 = vadd.f32 %v196_v37, %v184_v50 }
  0xa4   :  { %v210_v58 = vadd.f32 %v209_v34, %v197_v53 }
  0xa6   :  { %v185_v39 = vpop.f32.mrf.mxu0  ;;  %v213_v1 = vmax.f32 %v210_v58, 0.0 }
  0xa7   :  { %v247_v38 = vpop.f32.mrf.mxu2 }
  0xa9   :  { %v198_v40 = vpop.f32.mrf.mxu1 }
  0xac   :  { %v234_v41 = vpop.f32.mrf.mxu3 }
  0xad   :  { %v235_v48 = vadd.f32 %v473_v47, %v234_v41 }
  0xae   :  { %v260_v43 = vpop.f32.mrf.mxu0 }
  0xaf   :  { %v249_v42 = vpop.f32.mrf.mxu2  ;;  %v248_v52 = vadd.f32 %v247_v38, %v235_v48 }
  0xb1   :  { %v261_v55 = vadd.f32 %v260_v43, %v248_v52 }
  0xb3   :  { %v264_v61 = vmax.f32 %v261_v55, 0.0 }
  0xb4   :  { %v236_v44 = vpop.f32.mrf.mxu3 }
  0xb5   :  { %v265_v4 = vmax.f32 %v213_v1, %v264_v61 }
  0xb6   :  { %v262_v46 = vpop.f32.mrf.mxu0 }
  0xb7   :  { %v312_v45 = vpop.f32.mrf.mxu2 }
  0xbf   :  { %v314_v51 = vpop.f32.mrf.mxu2 }
  0xc1   :  { %v286_v49 = vpop.f32.mrf.mxu1 }
  0xc2   :  { %v287_v59 = vadd.f32 %v473_v47, %v286_v49 }
  0xc6   :  { %v338_v54 = vpop.f32.mrf.mxu0 }
  0xc7   :  { %v339_v57 = vadd.f32 %v473_v47, %v338_v54 }
  0xc9   :  { %v288_v56 = vpop.f32.mrf.mxu1 }
  0xcc   :  { %v299_v60 = vpop.f32.mrf.mxu3 }
  0xcd   :  { %v300_v62 = vadd.f32 %v299_v60, %v287_v59  ;;  %v351_v63 = vpop.f32.mrf.mxu2 }
  0xce   :  { %v352_v0 = vadd.f32 %v351_v63, %v339_v57  ;;  %v340_v3 = vpop.f32.mrf.mxu0 }
  0xcf   :  { %v313_v2 = vadd.f32 %v312_v45, %v300_v62 }
  0xd1   :  { %v316_v5 = vmax.f32 %v313_v2, 0.0  ;;  %v364_v6 = vpop.f32.mrf.mxu1 }
  0xd2   :  { %v365_v7 = vadd.f32 %v364_v6, %v352_v0 }
  0xd3   :  { %v317_v8 = vmax.f32 %v265_v4, %v316_v5 }
  0xd4   :  { %v368_v9 = vmax.f32 %v365_v7, 0.0  ;;  %v301_v10 = vpop.f32.mrf.mxu3 }
  0xd5   :  { %v353_v11 = vpop.f32.mrf.mxu2 }
  0xd6   :  { %v369_v12 = vmax.f32 %v317_v8, %v368_v9 }
  0xd8   :  { %371 = vst.msk [vmem:[%s669_s3] sm:$0xf] %vm370_vm1, %v369_v12 }
  0xd9   :  { %v366_v13 = vpop.f32.mrf.mxu1 }

// kernel: _lambda_.7
= control target key start
LH: loop header
LB: loop body
LE: loop exit
PB: predicated region body
PF: predicated region fallthrough
CT: control target
= control target key end

     0   :  { %vm499_vm0 = vcmask 1045504   ;;  %vm495_vm1 = vcmask 97280   ;;  %s2239_s4 = inlined_call_operand.vmem [shape: bf16[128,512], index: 4, kind: input, shape index: {}]   ;;  %s2240_s3 = inlined_call_operand.vmem [shape: bf16[140,512], index: 3, kind: input, shape index: {}]   ;;  %s2241_s1 = inlined_call_operand.vmem [shape: bf16[8,128], index: 1, kind: input, shape index: {}]   ;;  %s2242_s0 = inlined_call_operand.vmem [shape: bf16[8,140], index: 0, kind: input, shape index: {}]   ;;  %s2243_s7 = inlined_call_operand.vmem [shape: f32[4,128], index: 7, kind: input, shape index: {}]   ;;  %s2244_s5 = inlined_call_operand.vmem [shape: f32[1,512], index: 5, kind: input, shape index: {}]   ;;  %s2245_s6 = inlined_call_operand.vmem [shape: bf16[4,128,128], index: 6, kind: input, shape index: {}]   ;;  %s2246_s2 = inlined_call_operand.vmem [shape: f32[8,128], index: 2, kind: input, shape index: {}]   ;;  %s2247_s8 = inlined_call_operand.vmem [shape: f32[8,128], index: 8, kind: output, shape index: {}]  }
   0x1   :  { %v1153_v0 = vld [vmem:[%s2239_s4 + $0xe0] sm:$0xf]  ;;  %v1563_v1 = vld [vmem:[%s2239_s4 + $0xec] sm:$0xf0]  ;;  %v1561_v2 = vld [vmem:[%s2239_s4 + $0xe4] sm:$0xf] }
   0x2   :  { %v1154_v3 = vor.u32 %v1563_v1, %v1153_v0  ;;  %v1155_v4 = vld [vmem:[%s2239_s4 + $0xf0] sm:$0xf0]  ;;  %v1161_v5 = vld [vmem:[%s2239_s4 + $0xe8] sm:$0xf]  ;;  %v1564_v6 = vld [vmem:[%s2239_s4 + $0xf4] sm:$0xf0] }
   0x3   :  { %v1158_v7 = vor.u32 %v1561_v2, %v1155_v4  ;;  %v1162_v8 = vor.u32 %v1564_v6, %v1161_v5  ;;  %v1562_v9 = vld [vmem:[%s2239_s4 + $0xec] sm:$0xf]  ;;  %v1163_v10 = vld [vmem:[%s2239_s4 + $0xf8] sm:$0xf0]  ;;  %v1137_v11 = vld [vmem:[%s2239_s4 + $0xc0] sm:$0xf] }
   0x4   :  { %261 = vmatpush.bf16.msra.mxu0 %v1154_v3  ;;  %v1166_v12 = vor.u32 %v1562_v9, %v1163_v10  ;;  %v1559_v13 = vld [vmem:[%s2239_s4 + $0xcc] sm:$0xf0]  ;;  %v1557_v14 = vld [vmem:[%s2239_s4 + $0xc4] sm:$0xf]  ;;  %v1139_v15 = vld [vmem:[%s2239_s4 + $0xd0] sm:$0xf0] }
   0x5   :  { %274 = vmatpush.bf16.msra.mxu1 %v1158_v7  ;;  %287 = vmatpush.bf16.msra.mxu2 %v1162_v8  ;;  %v1138_v16 = vor.u32 %v1559_v13, %v1137_v11  ;;  %v1142_v17 = vor.u32 %v1557_v14, %v1139_v15  ;;  %v1145_v18 = vld [vmem:[%s2239_s4 + $0xc8] sm:$0xf]  ;;  %v1560_v19 = vld [vmem:[%s2239_s4 + $0xd4] sm:$0xf0]  ;;  %v1558_v20 = vld [vmem:[%s2239_s4 + $0xcc] sm:$0xf] }
   0x6   :  { %300 = vmatpush.bf16.msra.mxu3 %v1166_v12  ;;  %v1146_v21 = vor.u32 %v1560_v19, %v1145_v18  ;;  %v1147_v22 = vld [vmem:[%s2239_s4 + $0xd8] sm:$0xf0]  ;;  %v1121_v23 = vld [vmem:[%s2239_s4 + $0xa0] sm:$0xf]  ;;  %v1555_v24 = vld [vmem:[%s2239_s4 + $0xac] sm:$0xf0] }
   0x7   :  { %v1150_v25 = vor.u32 %v1558_v20, %v1147_v22  ;;  %v1553_v26 = vld [vmem:[%s2239_s4 + $0xa4] sm:$0xf]  ;;  %v1123_v27 = vld [vmem:[%s2239_s4 + $0xb0] sm:$0xf0]  ;;  %v1129_v28 = vld [vmem:[%s2239_s4 + $0xa8] sm:$0xf]  ;;  %v1122_v29 = vor.u32 %v1555_v24, %v1121_v23 }
   0x8   :  { %262 = vmatpush.bf16.msra.mxu0 %v1138_v16  ;;  %v1556_v30 = vld [vmem:[%s2239_s4 + $0xb4] sm:$0xf0]  ;;  %v1554_v31 = vld [vmem:[%s2239_s4 + $0xac] sm:$0xf]  ;;  %v1131_v32 = vld [vmem:[%s2239_s4 + $0xb8] sm:$0xf0]  ;;  %v1126_v33 = vor.u32 %v1553_v26, %v1123_v27 }
   0x9   :  { %275 = vmatpush.bf16.msra.mxu1 %v1142_v17  ;;  %288 = vmatpush.bf16.msra.mxu2 %v1146_v21  ;;  %v1130_v34 = vor.u32 %v1556_v30, %v1129_v28  ;;  %v1105_v35 = vld [vmem:[%s2239_s4 + $0x80] sm:$0xf]  ;;  %v1551_v36 = vld [vmem:[%s2239_s4 + $0x8c] sm:$0xf0]  ;;  %v1549_v37 = vld [vmem:[%s2239_s4 + $0x84] sm:$0xf]  ;;  %v1134_v38 = vor.u32 %v1554_v31, %v1131_v32 }
   0xa   :  { %301 = vmatpush.bf16.msra.mxu3 %v1150_v25  ;;  %v1107_v39 = vld [vmem:[%s2239_s4 + $0x90] sm:$0xf0]  ;;  %v1113_v40 = vld [vmem:[%s2239_s4 + $0x88] sm:$0xf]  ;;  %v1552_v41 = vld [vmem:[%s2239_s4 + $0x94] sm:$0xf0]  ;;  %v1106_v44 = vor.u32 %v1551_v36, %v1105_v35 }
   0xb   :  { %v1550_v42 = vld [vmem:[%s2239_s4 + $0x8c] sm:$0xf]  ;;  %v1115_v43 = vld [vmem:[%s2239_s4 + $0x98] sm:$0xf0]  ;;  %v1110_v45 = vor.u32 %v1549_v37, %v1107_v39  ;;  %v1114_v46 = vor.u32 %v1552_v41, %v1113_v40  ;;  %v1089_v47 = vld [vmem:[%s2239_s4 + $0x60] sm:$0xf] }
   0xc   :  { %263 = vmatpush.bf16.msra.mxu0 %v1122_v29  ;;  %v1547_v48 = vld [vmem:[%s2239_s4 + $0x6c] sm:$0xf0]  ;;  %v1545_v49 = vld [vmem:[%s2239_s4 + $0x64] sm:$0xf]  ;;  %v1118_v50 = vor.u32 %v1550_v42, %v1115_v43  ;;  %v1091_v51 = vld [vmem:[%s2239_s4 + $0x70] sm:$0xf0] }
   0xd   :  { %276 = vmatpush.bf16.msra.mxu1 %v1126_v33  ;;  %289 = vmatpush.bf16.msra.mxu2 %v1130_v34  ;;  %v1097_v52 = vld [vmem:[%s2239_s4 + $0x68] sm:$0xf]  ;;  %v1548_v53 = vld [vmem:[%s2239_s4 + $0x74] sm:$0xf0]  ;;  %v1546_v54 = vld [vmem:[%s2239_s4 + $0x6c] sm:$0xf]  ;;  %v1090_v56 = vor.u32 %v1547_v48, %v1089_v47  ;;  %v1094_v57 = vor.u32 %v1545_v49, %v1091_v51 }
   0xe   :  { %302 = vmatpush.bf16.msra.mxu3 %v1134_v38  ;;  %v1099_v55 = vld [vmem:[%s2239_s4 + $0x78] sm:$0xf0]  ;;  %v1098_v58 = vor.u32 %v1548_v53, %v1097_v52  ;;  %v1073_v59 = vld [vmem:[%s2239_s4 + $0x40] sm:$0xf]  ;;  %v1543_v60 = vld [vmem:[%s2239_s4 + $0x4c] sm:$0xf0] }
   0xf   :  { %v1541_v61 = vld [vmem:[%s2239_s4 + $0x44] sm:$0xf]  ;;  %v1102_v62 = vor.u32 %v1546_v54, %v1099_v55  ;;  %v1075_v63 = vld [vmem:[%s2239_s4 + $0x50] sm:$0xf0]  ;;  %v1081_v0 = vld [vmem:[%s2239_s4 + $0x48] sm:$0xf]  ;;  %v1074_v4 = vor.u32 %v1543_v60, %v1073_v59 }
  0x10   :  { %264 = vmatpush.bf16.msra.mxu0 %v1106_v44  ;;  %v1544_v1 = vld [vmem:[%s2239_s4 + $0x54] sm:$0xf0]  ;;  %v1542_v2 = vld [vmem:[%s2239_s4 + $0x4c] sm:$0xf]  ;;  %v1083_v3 = vld [vmem:[%s2239_s4 + $0x58] sm:$0xf0]  ;;  %v1078_v5 = vor.u32 %v1541_v61, %v1075_v63 }
  0x11   :  { %277 = vmatpush.bf16.msra.mxu1 %v1110_v45  ;;  %290 = vmatpush.bf16.msra.mxu2 %v1114_v46  ;;  %v1082_v6 = vor.u32 %v1544_v1, %v1081_v0  ;;  %v1057_v7 = vld [vmem:[%s2239_s4 + $0x20] sm:$0xf]  ;;  %v1539_v8 = vld [vmem:[%s2239_s4 + $0x2c] sm:$0xf0]  ;;  %v1537_v9 = vld [vmem:[%s2239_s4 + $0x24] sm:$0xf]  ;;  %v1086_v10 = vor.u32 %v1542_v2, %v1083_v3 }
  0x12   :  { %303 = vmatpush.bf16.msra.mxu3 %v1118_v50  ;;  %v1059_v11 = vld [vmem:[%s2239_s4 + $0x30] sm:$0xf0]  ;;  %v1065_v12 = vld [vmem:[%s2239_s4 + $0x28] sm:$0xf]  ;;  %v1540_v13 = vld [vmem:[%s2239_s4 + $0x34] sm:$0xf0]  ;;  %v1058_v16 = vor.u32 %v1539_v8, %v1057_v7 }
  0x13   :  { %v1538_v14 = vld [vmem:[%s2239_s4 + $0x2c] sm:$0xf]  ;;  %v1067_v15 = vld [vmem:[%s2239_s4 + $0x38] sm:$0xf0]  ;;  %v1041_v17 = vld [vmem:[%s2239_s4] sm:$0xf]  ;;  %v1062_v20 = vor.u32 %v1537_v9, %v1059_v11  ;;  %v1066_v21 = vor.u32 %v1540_v13, %v1065_v12 }
  0x14   :  { %265 = vmatpush.bf16.msra.mxu0 %v1090_v56  ;;  %v1535_v18 = vld [vmem:[%s2239_s4 + $0xc] sm:$0xf0]  ;;  %v1533_v19 = vld [vmem:[%s2239_s4 + $0x4] sm:$0xf]  ;;  %v1043_v22 = vld [vmem:[%s2239_s4 + $0x10] sm:$0xf0]  ;;  %v1070_v25 = vor.u32 %v1538_v14, %v1067_v15 }
  0x15   :  { %278 = vmatpush.bf16.msra.mxu1 %v1094_v57  ;;  %291 = vmatpush.bf16.msra.mxu2 %v1098_v58  ;;  %v1297_v23 = vld [vmem:[%s2240_s3 + $0x100] sm:$0xf]  ;;  %v1531_v24 = vld [vmem:[%s2240_s3 + $0x10c] sm:$0x30]  ;;  %v1049_v26 = vld [vmem:[%s2239_s4 + $0x8] sm:$0xf]  ;;  %v1042_v32 = vor.u32 %v1535_v18, %v1041_v17  ;;  %v1046_v36 = vor.u32 %v1533_v19, %v1043_v22 }
  0x16   :  { %304 = vmatpush.bf16.msra.mxu3 %v1102_v62  ;;  %v1536_v27 = vld [vmem:[%s2239_s4 + $0x14] sm:$0xf0]  ;;  %v1534_v28 = vld [vmem:[%s2239_s4 + $0xc] sm:$0xf]  ;;  %v1051_v29 = vld [vmem:[%s2239_s4 + $0x18] sm:$0xf0]  ;;  %v1298_v35 = vor.u32 %v1531_v24, %v1297_v23 }
  0x17   :  { %v1281_v30 = vld [vmem:[%s2240_s3 + $0xe0] sm:$0xf]  ;;  %v1527_v31 = vld [vmem:[%s2240_s3 + $0xec] sm:$0xf0]  ;;  %v1525_v33 = vld [vmem:[%s2240_s3 + $0xe4] sm:$0xf]  ;;  %v1050_v37 = vor.u32 %v1536_v27, %v1049_v26  ;;  %v1054_v38 = vor.u32 %v1534_v28, %v1051_v29 }
  0x18   :  { %266 = vmatpush.bf16.msra.mxu0 %v1074_v4  ;;  %v1283_v34 = vld [vmem:[%s2240_s3 + $0xf0] sm:$0xf0]  ;;  %v1282_v39 = vor.u32 %v1527_v31, %v1281_v30  ;;  %v1289_v40 = vld [vmem:[%s2240_s3 + $0xe8] sm:$0xf]  ;;  %v1528_v41 = vld [vmem:[%s2240_s3 + $0xf4] sm:$0xf0] }
  0x19   :  { %279 = vmatpush.bf16.msra.mxu1 %v1078_v5  ;;  %292 = vmatpush.bf16.msra.mxu2 %v1082_v6  ;;  %v1265_v42 = vld [vmem:[%s2240_s3 + $0xc0] sm:$0xf]  ;;  %v1286_v43 = vor.u32 %v1525_v33, %v1283_v34  ;;  %v1523_v44 = vld [vmem:[%s2240_s3 + $0xcc] sm:$0xf0]  ;;  %v1529_v45 = vld [vmem:[%s2240_s3 + $0x104] sm:$0xf]  ;;  %v1290_v52 = vor.u32 %v1528_v41, %v1289_v40 }
  0x1a   :  { %305 = vmatpush.bf16.msra.mxu3 %v1086_v10  ;;  %v1299_v46 = vld [vmem:[%s2240_s3 + $0x110] sm:$0x30]  ;;  %v501_v47 = vsel %vm499_vm0, %v1298_v35, 0  ;;  %v1521_v48 = vld [vmem:[%s2240_s3 + $0xc4] sm:$0xf]  ;;  %v1266_v53 = vor.u32 %v1523_v44, %v1265_v42 }
  0x1b   :  { %v1267_v49 = vld [vmem:[%s2240_s3 + $0xd0] sm:$0xf0]  ;;  %v1302_v50 = vor.u32 %v1529_v45, %v1299_v46  ;;  %v67_v51 = vld [vmem:[%s2241_s1] sm:$0xf]  ;;  %v1273_v54 = vld [vmem:[%s2240_s3 + $0xc8] sm:$0xf] }
  0x1c   :  { %267 = vmatpush.bf16.msra.mxu0 %v1058_v16  ;;  %v1524_v55 = vld [vmem:[%s2240_s3 + $0xd4] sm:$0xf0]  ;;  %v1270_v56 = vor.u32 %v1521_v48, %v1267_v49  ;;  %v1249_v57 = vld [vmem:[%s2240_s3 + $0xa0] sm:$0xf]  ;;  %v1519_v58 = vld [vmem:[%s2240_s3 + $0xac] sm:$0xf0] }
  0x1d   :  { %280 = vmatpush.bf16.msra.mxu1 %v1062_v20  ;;  %293 = vmatpush.bf16.msra.mxu2 %v1066_v21  ;;  %v1517_v59 = vld [vmem:[%s2240_s3 + $0xa4] sm:$0xf]  ;;  %v1251_v60 = vld [vmem:[%s2240_s3 + $0xb0] sm:$0xf0]  ;;  %v504_v61 = vsel %vm499_vm0, %v1302_v50, 0  ;;  %v1274_v62 = vor.u32 %v1524_v55, %v1273_v54  ;;  %v1250_v63 = vor.u32 %v1519_v58, %v1249_v57 }
  0x1e   :  { %306 = vmatpush.bf16.msra.mxu3 %v1070_v25  ;;  %v1257_v0 = vld [vmem:[%s2240_s3 + $0xa8] sm:$0xf]  ;;  %v1520_v1 = vld [vmem:[%s2240_s3 + $0xb4] sm:$0xf0]  ;;  %v1254_v2 = vor.u32 %v1517_v59, %v1251_v60  ;;  %v1233_v3 = vld [vmem:[%s2240_s3 + $0x80] sm:$0xf] }
  0x1f   :  { %v1515_v4 = vld [vmem:[%s2240_s3 + $0x8c] sm:$0xf0]  ;;  %v1513_v5 = vld [vmem:[%s2240_s3 + $0x84] sm:$0xf]  ;;  %v1235_v6 = vld [vmem:[%s2240_s3 + $0x90] sm:$0xf0]  ;;  %v1258_v7 = vor.u32 %v1520_v1, %v1257_v0 }
  0x20   :  { %268 = vmatpush.bf16.msra.mxu0 %v1042_v32  ;;  %v1946_v8 = vld [vmem:[%s2242_s0] sm:$0xff]  ;;  %v1305_v9 = vld [vmem:[%s2240_s3 + $0x108] sm:$0xf]  ;;  %v1234_v10 = vor.u32 %v1515_v4, %v1233_v3  ;;  %v1516_v12 = vld [vmem:[%s2240_s3 + $0x94] sm:$0xf0]  ;;  %v1238_v14 = vor.u32 %v1513_v5, %v1235_v6 }
  0x21   :  { %281 = vmatpush.bf16.msra.mxu1 %v1046_v36  ;;  %294 = vmatpush.bf16.msra.mxu2 %v1050_v37  ;;  %v1241_v11 = vld [vmem:[%s2240_s3 + $0x88] sm:$0xf]  ;;  %v1532_v13 = vld [vmem:[%s2240_s3 + $0x114] sm:$0x30]  ;;  %v1217_v15 = vld [vmem:[%s2240_s3 + $0x60] sm:$0xf]  ;;  %v315_v20 = vunpack.c.h.b16 %v1946_v8  ;;  %v314_v55 = vunpack.c.l.b16 %v1946_v8 }
  0x22   :  { %307 = vmatpush.bf16.msra.mxu3 %v1054_v38  ;;  %v1511_v16 = vld [vmem:[%s2240_s3 + $0x6c] sm:$0xf0]  ;;  %v1306_v17 = vor.u32 %v1532_v13, %v1305_v9  ;;  %v1509_v18 = vld [vmem:[%s2240_s3 + $0x64] sm:$0xf]  ;;  %v1219_v19 = vld [vmem:[%s2240_s3 + $0x70] sm:$0xf0]  ;;  %v1242_v21 = vor.u32 %v1516_v12, %v1241_v11 }
  0x23   :  { %269 = vmatmul.bf16.vlgmr.msra.gmra.mxu0 %v67_v51  ;;  %v1218_v23 = vor.u32 %v1511_v16, %v1217_v15  ;;  %v1225_v24 = vld [vmem:[%s2240_s3 + $0x68] sm:$0xf]  ;;  %v1512_v25 = vld [vmem:[%s2240_s3 + $0x74] sm:$0xf0]  ;;  %v1222_v26 = vor.u32 %v1509_v18, %v1219_v19  ;;  %v1201_v27 = vld [vmem:[%s2240_s3 + $0x40] sm:$0xf]  ;;  %v1986_v29 = vpack.c.b16 %v315_v20, %v315_v20  ;;  %v316_v0 = vpack.c.b16 %v314_v55, %v314_v55 }
  0x24   :  { %512 = vmatpush.bf16.msrb.mxu0 %v1282_v39  ;;  %282 = vmatmul.bf16.vlgmr.msra.gmra.mxu1 %v67_v51  ;;  %v507_v22 = vsel %vm499_vm0, %v1306_v17, 0  ;;  %v1507_v28 = vld [vmem:[%s2240_s3 + $0x4c] sm:$0xf0]  ;;  %v1505_v30 = vld [vmem:[%s2240_s3 + $0x44] sm:$0xf]  ;;  %v1226_v32 = vor.u32 %v1512_v25, %v1225_v24 }
  0x25   :  { %538 = vmatpush.bf16.msrb.mxu2 %v1286_v43  ;;  %532 = vmatpush.bf16.msrb.mxu1 %v501_v47  ;;  %v1203_v31 = vld [vmem:[%s2240_s3 + $0x50] sm:$0xf0]  ;;  %v1202_v33 = vor.u32 %v1507_v28, %v1201_v27  ;;  %v1209_v34 = vld [vmem:[%s2240_s3 + $0x48] sm:$0xf]  ;;  %v1508_v35 = vld [vmem:[%s2240_s3 + $0x54] sm:$0xf0] }
  0x26   :  { %308 = vmatmul.bf16.vlgmr.msra.gmra.mxu3 %v67_v51  ;;  %295 = vmatmul.bf16.vlgmr.msra.gmra.mxu2 %v67_v51  ;;  %v1206_v36 = vor.u32 %v1505_v30, %v1203_v31  ;;  %v1185_v37 = vld [vmem:[%s2240_s3 + $0x20] sm:$0xf]  ;;  %v1503_v38 = vld [vmem:[%s2240_s3 + $0x2c] sm:$0xf0]  ;;  %v1501_v39 = vld [vmem:[%s2240_s3 + $0x24] sm:$0xf]  ;;  %v1210_v41 = vor.u32 %v1508_v35, %v1209_v34 }
  0x27   :  { %558 = vmatpush.bf16.msrb.mxu3 %v504_v61  ;;  %v1187_v40 = vld [vmem:[%s2240_s3 + $0x30] sm:$0xf0]  ;;  %v1193_v42 = vld [vmem:[%s2240_s3 + $0x28] sm:$0xf]  ;;  %v1186_v43 = vor.u32 %v1503_v38, %v1185_v37  ;;  %v1504_v44 = vld [vmem:[%s2240_s3 + $0x34] sm:$0xf0] }
  0x28   :  { %513 = vmatpush.bf16.msrb.mxu0 %v1266_v53  ;;  %v1530_v45 = vld [vmem:[%s2240_s3 + $0x10c] sm:$0xf]  ;;  %v1307_v46 = vld [vmem:[%s2240_s3 + $0x118] sm:$0x30]  ;;  %v1190_v47 = vor.u32 %v1501_v39, %v1187_v40  ;;  %v1169_v48 = vld [vmem:[%s2240_s3] sm:$0xf]  ;;  %v1194_v54 = vor.u32 %v1504_v44, %v1193_v42 }
  0x29   :  { %564 = vmatpush.bf16.msra.mxu1 %v1290_v52  ;;  %539 = vmatpush.bf16.msrb.mxu2 %v1270_v56  ;;  %v1499_v49 = vld [vmem:[%s2240_s3 + $0xc] sm:$0xf0]  ;;  %v1497_v50 = vld [vmem:[%s2240_s3 + $0x4] sm:$0xf]  ;;  %v1171_v51 = vld [vmem:[%s2240_s3 + $0x10] sm:$0xf0]  ;;  %v1310_v56 = vor.u32 %v1530_v45, %v1307_v46 }
  0x2a   :  { %v1526_v52 = vld [vmem:[%s2240_s3 + $0xec] sm:$0xf]  ;;  %v1291_v53 = vld [vmem:[%s2240_s3 + $0xf8] sm:$0xf0]  ;;  %v1170_v57 = vor.u32 %v1499_v49, %v1169_v48  ;;  %v1177_v58 = vld [vmem:[%s2240_s3 + $0x8] sm:$0xf]  ;;  %v1174_v60 = vor.u32 %v1497_v50, %v1171_v51 }
  0x2b   :  { %584 = vmatpush.bf16.msra.mxu3 %v507_v22  ;;  %v1500_v59 = vld [vmem:[%s2240_s3 + $0x14] sm:$0xf0]  ;;  %v1294_v61 = vor.u32 %v1526_v52, %v1291_v53  ;;  %v1518_v4 = vld [vmem:[%s2240_s3 + $0xac] sm:$0xf]  ;;  %v1259_v5 = vld [vmem:[%s2240_s3 + $0xb8] sm:$0xf0] }
  0x2c   :  { %514 = vmatpush.bf16.msrb.mxu0 %v1250_v63  ;;  %v1275_v63 = vld [vmem:[%s2240_s3 + $0xd8] sm:$0xf0]  ;;  %v1178_v1 = vor.u32 %v1500_v59, %v1177_v58  ;;  %v1262_v6 = vor.u32 %v1518_v4, %v1259_v5  ;;  %v1506_v13 = vld [vmem:[%s2240_s3 + $0x4c] sm:$0xf] }
  0x2d   :  { %565 = vmatpush.bf16.msra.mxu1 %v1274_v62  ;;  %540 = vmatpush.bf16.msrb.mxu2 %v1254_v2  ;;  %v1522_v62 = vld [vmem:[%s2240_s3 + $0xcc] sm:$0xf]  ;;  %v510_v2 = vsel %vm499_vm0, %v1310_v56, 0  ;;  %v1243_v8 = vld [vmem:[%s2240_s3 + $0x98] sm:$0xf0] }
  0x2e   :  { %v1278_v3 = vor.u32 %v1522_v62, %v1275_v63  ;;  %v1227_v11 = vld [vmem:[%s2240_s3 + $0x78] sm:$0xf0]  ;;  %v1502_v16 = vld [vmem:[%s2240_s3 + $0x2c] sm:$0xf]  ;;  %v1567_v63 = vld [vmem:[%s2245_s6 + $0x10] sm:$0xff] }
  0x2f   :  { %v1195_v17 = vld [vmem:[%s2240_s3 + $0x38] sm:$0xf0]  ;;  %v1498_v19 = vld [vmem:[%s2240_s3 + $0xc] sm:$0xf] }
  0x30   :  { %515 = vmatpush.bf16.msrb.mxu0 %v1234_v10  ;;  %v1510_v10 = vld [vmem:[%s2240_s3 + $0x6c] sm:$0xf]  ;;  %v1198_v18 = vor.u32 %v1502_v16, %v1195_v17  ;;  %v1179_v20 = vld [vmem:[%s2240_s3 + $0x18] sm:$0xf0] }
  0x31   :  { %566 = vmatpush.bf16.msra.mxu1 %v1258_v7  ;;  %541 = vmatpush.bf16.msrb.mxu2 %v1238_v14  ;;  %v1514_v7 = vld [vmem:[%s2240_s3 + $0x8c] sm:$0xf]  ;;  %v1230_v12 = vor.u32 %v1510_v10, %v1227_v11  ;;  %v1211_v14 = vld [vmem:[%s2240_s3 + $0x58] sm:$0xf0] }
  0x32   :  { %v1246_v9 = vor.u32 %v1514_v7, %v1243_v8  ;;  %v1214_v15 = vor.u32 %v1506_v13, %v1211_v14  ;;  %v1570_v52 = vld [vmem:[%s2245_s6 + $0x28] sm:$0xff]  ;;  %v1568_v59 = vld [vmem:[%s2245_s6 + $0x18] sm:$0xff]  ;;  %v1565_v8 = vld [vmem:[%s2245_s6] sm:$0xff] }
  0x34   :  { %516 = vmatpush.bf16.msrb.mxu0 %v1218_v23  ;;  %1311 = vmatmul.msk.bf16.vlgmr.msrb.gmra.mxu1 %vm495_vm1, %v1986_v29 }
  0x35   :  { %567 = vmatpush.bf16.msra.mxu1 %v1242_v21  ;;  %542 = vmatpush.bf16.msrb.mxu2 %v1222_v26  ;;  %v1182_v21 = vor.u32 %v1498_v19, %v1179_v20  ;;  %v1580_v19 = vld [vmem:[%s2245_s6 + $0x78] sm:$0xff] }
  0x36   :  { %1312 = vmatmul.msk.bf16.vlgmr.msrb.gmra.mxu3 %vm495_vm1, %v1986_v29 }
  0x38   :  { %517 = vmatpush.bf16.msrb.mxu0 %v1202_v33  ;;  %v2105_v33 = vld [vmem:[%s2244_s5] sm:$0xf] }
  0x39   :  { %568 = vmatpush.bf16.msra.mxu1 %v1226_v32  ;;  %543 = vmatpush.bf16.msrb.mxu2 %v1206_v36  ;;  %v617_v36 = vperm.slane %v2105_v33, 0  ;;  %v618_v45 = vperm.slane %v2105_v33, 1  ;;  %v620_v5 = vperm.slane %v2105_v33, 3  ;;  %v619_v17 = vperm.slane %v2105_v33, 2 }
  0x3c   :  { %518 = vmatpush.bf16.msrb.mxu0 %v1186_v43 }
  0x3d   :  { %569 = vmatpush.bf16.msra.mxu1 %v1210_v41  ;;  %544 = vmatpush.bf16.msrb.mxu2 %v1190_v47  ;;  %v1572_v41 = vld [vmem:[%s2245_s6 + $0x38] sm:$0xff]  ;;  %v1571_v47 = vld [vmem:[%s2245_s6 + $0x30] sm:$0xff] }
  0x3e   :  { %760 = vmatpush.bf16.msrb.mxu3 %v1572_v41 }
  0x40   :  { %519 = vmatpush.bf16.msrb.mxu0 %v1170_v57  ;;  %v1569_v57 = vld [vmem:[%s2245_s6 + $0x20] sm:$0xff] }
  0x41   :  { %570 = vmatpush.bf16.msra.mxu1 %v1194_v54  ;;  %545 = vmatpush.bf16.msrb.mxu2 %v1174_v60 }
  0x42   :  { %761 = vmatpush.bf16.msrb.mxu3 %v1571_v47 }
  0x43   :  { %520 = vmatmul.bf16.vlgmr.msrb.gmra.mxu0 %v316_v0 }
  0x44   :  { %590 = vmatpush.bf16.msra.mxu0 %v1294_v61  ;;  %546 = vmatmul.bf16.vlgmr.msrb.gmra.mxu2 %v316_v0 }
  0x45   :  { %610 = vmatpush.bf16.msra.mxu2 %v510_v2  ;;  %571 = vmatpush.bf16.msra.mxu1 %v1178_v1  ;;  %v1566_v1 = vld [vmem:[%s2245_s6 + $0x8] sm:$0xff] }
  0x46   :  { %1313 = vmatmul.msk.bf16.vlgmr.msra.gmra.mxu3 %vm495_vm1, %v1986_v29 }
  0x47   :  { %762 = vmatpush.bf16.msrb.mxu3 %v1570_v52 }
  0x48   :  { %591 = vmatpush.bf16.msra.mxu0 %v1278_v3  ;;  %572 = vmatmul.bf16.vlgmr.msra.gmra.mxu1 %v316_v0 }
  0x49   :  { %847 = vmatpush.bf16.msrb.mxu1 %v1580_v19  ;;  %v1594_v19 = vld [vmem:[%s2245_s6 + $0xe8] sm:$0xff] }
  0x4b   :  { %763 = vmatpush.bf16.msrb.mxu3 %v1569_v57 }
  0x4c   :  { %592 = vmatpush.bf16.msra.mxu0 %v1262_v6 }
  0x4f   :  { %764 = vmatpush.bf16.msrb.mxu3 %v1568_v59  ;;  %v1576_v59 = vld [vmem:[%s2245_s6 + $0x58] sm:$0xff] }
  0x50   :  { %593 = vmatpush.bf16.msra.mxu0 %v1246_v9 }
  0x53   :  { %765 = vmatpush.bf16.msrb.mxu3 %v1567_v63  ;;  %v1588_v63 = vld [vmem:[%s2245_s6 + $0xb8] sm:$0xff] }
  0x54   :  { %594 = vmatpush.bf16.msra.mxu0 %v1230_v12  ;;  %1314 = vmatmul.msk.bf16.vlgmr.msra.gmra.mxu2 %vm495_vm1, %v1986_v29 }
  0x55   :  { %934 = vmatpush.bf16.msrb.mxu2 %v1588_v63 }
  0x57   :  { %766 = vmatpush.bf16.msrb.mxu3 %v1566_v1  ;;  %v1586_v1 = vld [vmem:[%s2245_s6 + $0xa8] sm:$0xff] }
  0x58   :  { %595 = vmatpush.bf16.msra.mxu0 %v1214_v15 }
  0x5b   :  { %767 = vmatpush.bf16.msrb.mxu3 %v1565_v8 }
  0x5c   :  { %596 = vmatpush.bf16.msra.mxu0 %v1198_v18 }
  0x60   :  { %597 = vmatpush.bf16.msra.mxu0 %v1182_v21 }
  0x63   :  { %598 = vmatmul.bf16.vlgmr.msra.gmra.mxu0 %v316_v0 }
  0xa0   :  { %v270_v23 = vpop.f32.mrf.mxu0 }
  0xa1   :  { %v283_v22 = vpop.f32.mrf.mxu1 }
  0xa8   :  { %v272_v27 = vpop.f32.mrf.mxu0 }
  0xa9   :  { %v309_v24 = vpop.f32.mrf.mxu3  ;;  %v285_v25 = vpop.f32.mrf.mxu1 }
  0xaa   :  { %v2100_v26 = vpop.f32.mrf.mxu2 }
  0xb1   :  { %v311_v28 = vpop.f32.mrf.mxu3  ;;  %v534_v29 = vpop.f32.mrf.mxu1 }
  0xb2   :  { %v298_v30 = vpop.f32.mrf.mxu2 }
  0xb3   :  { %v1578_v30 = vld [vmem:[%s2245_s6 + $0x68] sm:$0xff] }
  0xb9   :  { %v560_v31 = vpop.f32.mrf.mxu3  ;;  %v536_v32 = vpop.f32.mrf.mxu1 }
  0xc0   :  { %v521_v34 = vpop.f32.mrf.mxu0 }
  0xc1   :  { %v522_v35 = vadd.f32 %v521_v34, %v270_v23  ;;  %v562_v37 = vpop.f32.mrf.mxu3 }
  0xc3   :  { %v535_v38 = vadd.f32 %v534_v29, %v522_v35 }
  0xc5   :  { %v573_v39 = vpop.f32.mrf.mxu1  ;;  %v625_v40 = vadd.f32 %v617_v36, %v535_v38 }
  0xc6   :  { %v574_v12 = vadd.f32 %v573_v39, %v2100_v26  ;;  %v687_v39 = vld [vmem:[%s2246_s2] sm:$0xff] }
  0xc7   :  { %v1315_v42 = vmul.f32 -1.442695, %v625_v40  ;;  %v547_v43 = vpop.f32.mrf.mxu2 }
  0xc8   :  { %v548_v44 = vadd.f32 %v547_v43, %v283_v22  ;;  %v523_v46 = vpop.f32.mrf.mxu0  ;;  %v1579_v22 = vld [vmem:[%s2245_s6 + $0x70] sm:$0xff] }
  0xc9   :  { %1601 = vpow2.f32 %v1315_v42  ;;  %v586_v49 = vpop.f32.mrf.mxu3  ;;  %848 = vmatpush.bf16.msrb.mxu1 %v1579_v22 }
  0xca   :  { %v561_v48 = vadd.f32 %v560_v31, %v548_v44  ;;  %v587_v16 = vadd.f32 %v586_v49, %v574_v12  ;;  %v1585_v12 = vld [vmem:[%s2245_s6 + $0xa0] sm:$0xff] }
  0xcc   :  { %v626_v51 = vadd.f32 %v618_v45, %v561_v48  ;;  %v627_v25 = vadd.f32 %v619_v17, %v587_v16  ;;  %v1581_v16 = vld [vmem:[%s2245_s6 + $0x80] sm:$0xff]  ;;  %v1596_v17 = vld [vmem:[%s2245_s6 + $0xf8] sm:$0xff] }
  0xcd   :  { %v575_v50 = vpop.f32.mrf.mxu1  ;;  %849 = vmatpush.bf16.msrb.mxu1 %v1578_v30  ;;  %1021 = vmatpush.bf16.msrb.mxu0 %v1596_v17  ;;  %v1593_v30 = vld [vmem:[%s2245_s6 + $0xe0] sm:$0xff] }
  0xce   :  { %v1316_v53 = vmul.f32 -1.442695, %v626_v51 }
  0xcf   :  { %v1602_v54 = vpop.eup %1601  ;;  %v549_v55 = vpop.f32.mrf.mxu2 }
  0xd0   :  { %v2118_v56 = vadd.f32 1.0, %v1602_v54  ;;  %1603 = vpow2.f32 %v1316_v53 }
  0xd1   :  { %v588_v58 = vpop.f32.mrf.mxu3 }
  0xd2   :  { %1605 = vrcp.f32 %v2118_v56  ;;  %v644_v28 = vand.u32 2147483648, %v2118_v56  ;;  %vm638_vm6 = vweird.f32 %v2118_v56  ;;  %v642_v31 = vand.u32 2147483647, %v2118_v56  ;;  %v1577_v58 = vld [vmem:[%s2245_s6 + $0x60] sm:$0xff] }
  0xd3   :  { %850 = vmatpush.bf16.msrb.mxu1 %v1577_v58 }
  0xd4   :  { %v645_v37 = vor.u32 1.1754944e-38, %v644_v28  ;;  %vm643_vm9 = vcmp.eq.f32.partialorder %v642_v31, 8.507059e+37  ;;  %v1592_v31 = vld [vmem:[%s2245_s6 + $0xd8] sm:$0xff] }
  0xd6   :  { %v1604_v60 = vpop.eup %1603 }
  0xd7   :  { %v651_v61 = vadd.f32 1.0, %v1604_v60  ;;  %v612_v62 = vpop.f32.mrf.mxu2  ;;  %851 = vmatpush.bf16.msrb.mxu1 %v1576_v59  ;;  %v1575_v60 = vld [vmem:[%s2245_s6 + $0x50] sm:$0xff] }
  0xd8   :  { %v1606_v0 = vpop.eup %1605 }
  0xd9   :  { %1607 = vrcp.f32 %v651_v61  ;;  %v634_v2 = vmul.f32 %v1606_v0, %v2118_v56  ;;  %vm657_vm3 = vweird.f32 %v651_v61  ;;  %vm639_vm4 = vweird.f32 %v1606_v0 }
  0xda   :  { %v661_v27 = vand.u32 2147483647, %v651_v61  ;;  %vm640_vm7 = vmor %vm638_vm6, %vm639_vm4 }
  0xdb   :  { %v635_v11 = vsub.f32 1.0, %v634_v2  ;;  %852 = vmatpush.bf16.msrb.mxu1 %v1575_v60  ;;  %v1597_v2 = vld [vmem:[%s2243_s7] ss:$0 sm:$0xff] }
  0xdc   :  { %vm662_vm8 = vcmp.eq.f32.partialorder %v661_v27, 8.507059e+37 }
  0xdd   :  { %v636_v20 = vmul.f32 %v1606_v0, %v635_v11 }
  0xdf   :  { %v1608_v6 = vpop.eup %1607  ;;  %v614_v7 = vpop.f32.mrf.mxu2  ;;  %v637_v26 = vadd.f32 %v1606_v0, %v636_v20  ;;  %v1598_v20 = vld [vmem:[%s2243_s7 + $0x1] ss:$0 sm:$0xff] }
  0xe0   :  { %v599_v3 = vpop.f32.mrf.mxu0  ;;  %v653_v9 = vmul.f32 %v1608_v6, %v651_v61  ;;  %vm658_vm2 = vweird.f32 %v1608_v6 }
  0xe1   :  { %v600_v4 = vadd.f32 %v599_v3, %v309_v24  ;;  %v663_v24 = vand.u32 2147483648, %v651_v61  ;;  %vm2147_vm5 = vmor %vm657_vm3, %vm658_vm2  ;;  %v641_v35 = vsel %vm640_vm7, %v1606_v0, %v637_v26  ;;  %v1574_v61 = vld [vmem:[%s2245_s6 + $0x48] sm:$0xff]  ;;  %v1587_v0 = vld [vmem:[%s2245_s6 + $0xb0] sm:$0xff] }
  0xe2   :  { %v654_v13 = vsub.f32 1.0, %v653_v9  ;;  %v646_v40 = vsel %vm643_vm9, %v645_v37, %v641_v35  ;;  %853 = vmatpush.bf16.msrb.mxu1 %v1574_v61  ;;  %935 = vmatpush.bf16.msrb.mxu2 %v1587_v0  ;;  %v1599_v35 = vld [vmem:[%s2243_s7 + $0x2] ss:$0 sm:$0xff] }
  0xe3   :  { %v613_v10 = vadd.f32 %v612_v62, %v600_v4  ;;  %v664_v34 = vor.u32 1.1754944e-38, %v663_v24  ;;  %v1573_v62 = vld [vmem:[%s2245_s6 + $0x40] sm:$0xff] }
  0xe4   :  { %v655_v15 = vmul.f32 %v1608_v6, %v654_v13  ;;  %v1584_v13 = vld [vmem:[%s2245_s6 + $0x98] sm:$0xff] }
  0xe5   :  { %v628_v14 = vadd.f32 %v620_v5, %v613_v10 }
  0xe6   :  { %v656_v23 = vadd.f32 %v1608_v6, %v655_v15  ;;  %854 = vmatpush.bf16.msrb.mxu1 %v1573_v62  ;;  %936 = vmatpush.bf16.msrb.mxu2 %v1586_v1  ;;  %v1582_v15 = vld [vmem:[%s2245_s6 + $0x88] sm:$0xff] }
  0xe7   :  { %v1317_v18 = vmul.f32 -1.442695, %v628_v14  ;;  %v1583_v14 = vld [vmem:[%s2245_s6 + $0x90] sm:$0xff] }
  0xe8   :  { %v601_v21 = vpop.f32.mrf.mxu0  ;;  %v660_v32 = vsel %vm2147_vm5, %v1608_v6, %v656_v23 }
  0xe9   :  { %1609 = vpow2.f32 %v1317_v18  ;;  %v665_v38 = vsel %vm662_vm8, %v664_v34, %v660_v32  ;;  %v1595_v18 = vld [vmem:[%s2245_s6 + $0xf0] sm:$0xff]  ;;  %v1589_v34 = vld [vmem:[%s2245_s6 + $0xc0] sm:$0xff] }
  0xea   :  { %1611 = vtanh.f32 %v627_v25  ;;  %v688_v41 = vmul.f32 %v687_v39, %v665_v38  ;;  %937 = vmatpush.bf16.msrb.mxu2 %v1585_v12  ;;  %1022 = vmatpush.bf16.msrb.mxu0 %v1595_v18  ;;  %v1591_v32 = vld [vmem:[%s2245_s6 + $0xd0] sm:$0xff] }
  0xee   :  { %938 = vmatpush.bf16.msrb.mxu2 %v1584_v13  ;;  %1023 = vmatpush.bf16.msrb.mxu0 %v1594_v19 }
  0xef   :  { %v1610_v33 = vpop.eup %1609 }
  0xf0   :  { %v671_v36 = vadd.f32 1.0, %v1610_v33  ;;  %v1612_v42 = vpop.eup %1611  ;;  %v1590_v33 = vld [vmem:[%s2245_s6 + $0xc8] sm:$0xff] }
  0xf1   :  { %v689_v43 = vmul.f32 %v1612_v42, %v646_v40 }
  0xf2   :  { %1613 = vrcp.f32 %v671_v36  ;;  %v683_v48 = vand.u32 2147483648, %v671_v36  ;;  %v681_v50 = vand.u32 2147483647, %v671_v36  ;;  %vm677_vm11 = vweird.f32 %v671_v36  ;;  %939 = vmatpush.bf16.msrb.mxu2 %v1583_v14  ;;  %1024 = vmatpush.bf16.msrb.mxu0 %v1593_v30 }
  0xf3   :  { %v690_v45 = vadd.f32 %v689_v43, %v688_v41 }
  0xf4   :  { %v684_v52 = vor.u32 1.1754944e-38, %v683_v48  ;;  %vm682_vm13 = vcmp.eq.f32.partialorder %v681_v50, 8.507059e+37 }
  0xf5   :  { %1615 = vtanh.f32 %v690_v45  ;;  %v1600_v45 = vld [vmem:[%s2243_s7 + $0x3] ss:$0 sm:$0xff] }
  0xf6   :  { %940 = vmatpush.bf16.msrb.mxu2 %v1582_v15  ;;  %1025 = vmatpush.bf16.msrb.mxu0 %v1592_v31 }
  0xf8   :  { %v1614_v44 = vpop.eup %1613 }
  0xf9   :  { %v673_v46 = vmul.f32 %v1614_v44, %v671_v36  ;;  %vm678_vm10 = vweird.f32 %v1614_v44 }
  0xfa   :  { %vm679_vm12 = vmor %vm677_vm11, %vm678_vm10  ;;  %941 = vmatpush.bf16.msrb.mxu2 %v1581_v16  ;;  %1026 = vmatpush.bf16.msrb.mxu0 %v1591_v32 }
  0xfb   :  { %v674_v47 = vsub.f32 1.0, %v673_v46  ;;  %v1616_v54 = vpop.eup %1615 }
  0xfd   :  { %v675_v49 = vmul.f32 %v1614_v44, %v674_v47 }
  0xfe   :  { %1027 = vmatpush.bf16.msrb.mxu0 %v1590_v33 }
  0xff   :  { %v676_v51 = vadd.f32 %v1614_v44, %v675_v49 }
 0x101   :  { %v680_v53 = vsel %vm679_vm12, %v1614_v44, %v676_v51 }
 0x102   :  { %v685_v55 = vsel %vm682_vm13, %v684_v52, %v680_v53  ;;  %1028 = vmatpush.bf16.msrb.mxu0 %v1589_v34 }
 0x103   :  { %v692_v56 = vmul.f32 %v1616_v54, %v685_v55 }
 0x105   :  { %v693_v57 = vpack.c.bf16 %v692_v56, %v692_v56 }
 0x107   :  { %768 = vmatmul.bf16.vlgmr.msrb.gmra.mxu3 %v693_v57 }
 0x18a   :  { %v769_v3 = vpop.f32.mrf.mxu3 }
 0x18b   :  { %v770_v4 = vadd.f32 %v1597_v2, %v769_v3 }
 0x18d   :  { %v774_v5 = vmin.f32 %v770_v4, 0.0  ;;  %vm773_vm14 = vcmp.gt.f32.partialorder %v770_v4, 0.0 }
 0x18f   :  { %v775_v6 = vmul.f32 1.442695, %v774_v5 }
 0x191   :  { %1617 = vpow2.f32 %v775_v6 }
 0x192   :  { %v771_v7 = vpop.f32.mrf.mxu3 }
 0x197   :  { %v1618_v8 = vpop.eup %1617 }
 0x198   :  { %v1350_v9 = vadd.f32 -1.0, %v1618_v8 }
 0x19a   :  { %v778_v10 = vsel %vm773_vm14, %v770_v4, %v1350_v9 }
 0x19b   :  { %v779_v11 = vpack.c.bf16 %v778_v10, %v778_v10 }
 0x19d   :  { %855 = vmatmul.bf16.vlgmr.msrb.gmra.mxu1 %v779_v11 }
 0x21a   :  { %v856_v21 = vpop.f32.mrf.mxu1 }
 0x21b   :  { %v857_v22 = vadd.f32 %v1598_v20, %v856_v21 }
 0x21d   :  { %v861_v23 = vmin.f32 %v857_v22, 0.0  ;;  %vm860_vm15 = vcmp.gt.f32.partialorder %v857_v22, 0.0 }
 0x21f   :  { %v862_v24 = vmul.f32 1.442695, %v861_v23 }
 0x221   :  { %1619 = vpow2.f32 %v862_v24 }
 0x222   :  { %v858_v25 = vpop.f32.mrf.mxu1 }
 0x227   :  { %v1620_v26 = vpop.eup %1619 }
 0x228   :  { %v1399_v27 = vadd.f32 -1.0, %v1620_v26 }
 0x22a   :  { %v865_v28 = vsel %vm860_vm15, %v857_v22, %v1399_v27 }
 0x22b   :  { %v866_v29 = vpack.c.bf16 %v865_v28, %v865_v28 }
 0x22d   :  { %942 = vmatmul.bf16.vlgmr.msrb.gmra.mxu2 %v866_v29 }
 0x2b0   :  { %v943_v36 = vpop.f32.mrf.mxu2 }
 0x2b1   :  { %v944_v37 = vadd.f32 %v1599_v35, %v943_v36 }
 0x2b3   :  { %v948_v38 = vmin.f32 %v944_v37, 0.0  ;;  %vm947_vm0 = vcmp.gt.f32.partialorder %v944_v37, 0.0 }
 0x2b5   :  { %v949_v39 = vmul.f32 1.442695, %v948_v38 }
 0x2b7   :  { %1621 = vpow2.f32 %v949_v39 }
 0x2b8   :  { %v945_v40 = vpop.f32.mrf.mxu2 }
 0x2bd   :  { %v1622_v41 = vpop.eup %1621 }
 0x2be   :  { %v1448_v42 = vadd.f32 -1.0, %v1622_v41 }
 0x2c0   :  { %v952_v43 = vsel %vm947_vm0, %v944_v37, %v1448_v42 }
 0x2c1   :  { %v953_v44 = vpack.c.bf16 %v952_v43, %v952_v43 }
 0x2c3   :  { %1029 = vmatmul.bf16.vlgmr.msrb.gmra.mxu0 %v953_v44 }
 0x340   :  { %v1030_v46 = vpop.f32.mrf.mxu0 }
 0x341   :  { %v1031_v47 = vadd.f32 %v1600_v45, %v1030_v46 }
 0x343   :  { %1034 = vst [vmem:[%s2247_s8] sm:$0xff] %v1031_v47 }
 0x348   :  { %v1032_v48 = vpop.f32.mrf.mxu0 }

</bundles_post_ra>
